<compile_context>
chip_gen: v6e
topology: v6e:2x2x1
jax: 0.10.0
libtpu: 0.0.40
codegen_flags: <defaults>
</compile_context>

<pallas_src>
import jax
import jax.numpy as jnp
from jax.experimental import pallas as pl
from jax.experimental.pallas import tpu as pltpu

BN_EPS = 1e-5


# ---------------------------------------------------------------------------
# Fused forward kernel
# ---------------------------------------------------------------------------
def _relu_bn(y, ep_ref):
    """y -> relu(y + bias) * scale + shift, with ep_ref rows = (bias, scale, shift)."""
    y = jnp.maximum(y + ep_ref[0:1, :], 0.0)
    return y * ep_ref[1:2, :] + ep_ref[2:3, :]


def _cnn3_kernel(x_ref, m1_ref, s2_ref, n2_ref, hp_ref, wp_ref, wf1_ref, wf2_ref,
                 ep1_ref, ep2_ref, ep3_ref, bfc2_ref, o_ref):
    f32, bf16 = jnp.float32, jnp.bfloat16

    # conv1 (1->20, k=4, s=1) + ReLU + BN1.
    # Y1[oh, ow*20+co] = sum_ki X[oh+ki, :] @ M1[ki]  (M1 structured from conv1 W).
    y1 = jnp.dot(x_ref[0, 0:25, :].astype(bf16), m1_ref[0],
                 preferred_element_type=f32)
    for ki in range(1, 4):
        y1 = y1 + jnp.dot(x_ref[0, ki:ki + 25, :].astype(bf16), m1_ref[ki],
                          preferred_element_type=f32)
    a1 = _relu_bn(y1, ep1_ref).astype(bf16)                      # [25, 500]

    # conv2 (20->20, k=4, s=2) + ReLU + BN2.
    # Y2 = sum_ki (S2[ki] @ A1) @ N2[ki];  S2[ki] is the 0/1 row selector 2*oh2+ki.
    y2 = jnp.zeros((11, 220), f32)
    for ki in range(4):
        rows = jnp.dot(s2_ref[ki], a1, preferred_element_type=f32)   # [11, 500]
        y2 = y2 + jnp.dot(rows.astype(bf16), n2_ref[ki],
                          preferred_element_type=f32)
    a2 = _relu_bn(y2, ep2_ref).astype(bf16)                      # [11, 220]

    # MaxPool2d(2, 2): max over row pairs, then over ow (lane-group) pairs, using
    # 0/1 selection matmuls on the VMEM-resident tile.
    ph = jnp.maximum(jnp.dot(hp_ref[0], a2, preferred_element_type=f32),
                     jnp.dot(hp_ref[1], a2, preferred_element_type=f32))
    phb = ph.astype(bf16)                                        # [5, 220]
    pw = jnp.maximum(jnp.dot(phb, wp_ref[0], preferred_element_type=f32),
                     jnp.dot(phb, wp_ref[1], preferred_element_type=f32))
    pooled = pw.astype(bf16)                                     # [5, 100]

    # dropout (eval-mode identity) -> fc1 + ReLU + BN3.
    # The NCHW flatten is folded into wf1's row permutation at init time.
    # TODO(synk): training-mode dropout randomness not reproduced (inference path).
    acc = jnp.dot(pooled[0:1, :], wf1_ref[0], preferred_element_type=f32)
    for h in range(1, 5):
        acc = acc + jnp.dot(pooled[h:h + 1, :], wf1_ref[h],
                            preferred_element_type=f32)
    h1 = _relu_bn(acc, ep3_ref).astype(bf16)                     # [1, 256]

    # dropout (identity) -> fc2 (N padded to 128 lanes; real logits are [:10]).
    logits = jnp.dot(h1, wf2_ref[...], preferred_element_type=f32) + bfc2_ref[...]
    o_ref[0, :, :] = logits[:, :10].astype(o_ref.dtype)


def cnn3_forward(x_nchw, p):
    B = x_nchw.shape[0]
    x = x_nchw.reshape(B, 28, 28)            # in_channels == 1

    def const(shape):
        return pl.BlockSpec(shape, lambda b, _s=shape: (0,) * len(_s))

    out = pl.pallas_call(
        _cnn3_kernel,
        out_shape=jax.ShapeDtypeStruct((B, 1, 10), jnp.float32),
        grid=(B,),
        in_specs=[
            pl.BlockSpec((1, 28, 28), lambda b: (b, 0, 0)),   # x (per sample)
            const((4, 28, 500)),     # m1   : conv1 structured weights
            const((4, 11, 25)),      # s2   : conv2 stride-2 row selectors
            const((4, 500, 220)),    # n2   : conv2 structured weights
            const((2, 5, 11)),       # hp   : pool row-pair selectors
            const((2, 220, 100)),    # wp   : pool lane-pair selectors
            const((5, 100, 256)),    # wf1  : fc1 weights (flatten-permuted, padded)
            const((256, 128)),       # wf2  : fc2 weights (padded)
            const((3, 500)),         # ep1  : conv1 bias / bn1 scale / bn1 shift
            const((3, 220)),         # ep2  : conv2 bias / bn2 scale / bn2 shift
            const((3, 256)),         # ep3  : fc1 bias / bn3 scale / bn3 shift
            const((1, 128)),         # bfc2 : fc2 bias (padded)
        ],
        out_specs=pl.BlockSpec((1, 1, 10), lambda b: (b, 0, 0)),
        compiler_params=pltpu.CompilerParams(
            dimension_semantics=("parallel",)),
    )(x, p["m1"], p["s2"], p["n2"], p["hp"], p["wp"], p["wf1"], p["wf2"],
      p["ep1"], p["ep2"], p["ep3"], p["bfc2"])
    return out.reshape(B, 10)


# ---------------------------------------------------------------------------
# Parameter preparation (one-time, outside the kernel)
# ---------------------------------------------------------------------------
def bn_fold(gamma, beta, running_mean, running_var, eps=BN_EPS):
    scale = gamma / jnp.sqrt(running_var + eps)
    shift = beta - running_mean * scale
    return scale, shift


def init_raw_params(key):
    """PyTorch-layout weights + BN params (running stats at defaults)."""
    ks = jax.random.split(key, 14)
    n = lambda k, s, sc=0.1: sc * jax.random.normal(k, s, jnp.float32)
    return dict(
        w1=n(ks[0], (20, 1, 4, 4)),   b1=n(ks[1], (20,)),
        w2=n(ks[2], (20, 20, 4, 4)),  b2=n(ks[3], (20,)),
        wfc1=n(ks[4], (250, 500), 0.05), bfc1=n(ks[5], (250,)),
        wfc2=n(ks[6], (10, 250), 0.05),  bfc2=n(ks[7], (10,)),
        g1=1.0 + n(ks[8], (20,)),  be1=n(ks[9], (20,)),
        rm1=jnp.zeros((20,), jnp.float32), rv1=jnp.ones((20,), jnp.float32),
        g2=1.0 + n(ks[10], (20,)), be2=n(ks[11], (20,)),
        rm2=jnp.zeros((20,), jnp.float32), rv2=jnp.ones((20,), jnp.float32),
        g3=1.0 + n(ks[12], (250,)), be3=n(ks[13], (250,)),
        rm3=jnp.zeros((250,), jnp.float32), rv3=jnp.ones((250,), jnp.float32),
    )


def prepare_params(raw):
    """Fold torch-layout weights + BN running stats into the fused-kernel constants."""
    f32, bf16 = jnp.float32, jnp.bfloat16

    scale1, shift1 = bn_fold(raw["g1"], raw["be1"], raw["rm1"], raw["rv1"])
    scale2, shift2 = bn_fold(raw["g2"], raw["be2"], raw["rm2"], raw["rv2"])
    scale3, shift3 = bn_fold(raw["g3"], raw["be3"], raw["rm3"], raw["rv3"])

    # conv1: M1[ki][w_in, ow*20+co] = W1[co, 0, ki, w_in-ow] for 0 <= w_in-ow < 4.
    wt1 = jnp.transpose(raw["w1"][:, 0], (1, 2, 0))           # [ki, kj, co]
    w_in = jnp.arange(28)[:, None]
    ow = jnp.arange(25)[None, :]
    kj = w_in - ow
    valid = (kj >= 0) & (kj < 4)
    m1 = wt1[:, jnp.clip(kj, 0, 3), :] * valid[None, :, :, None]   # [4,28,25,20]
    m1 = m1.reshape(4, 28, 500).astype(bf16)

    # conv2: N2[ki][w*20+ci, ow2*20+co] = W2[co, ci, ki, w-2*ow2] for 0 <= . < 4.
    wt2 = jnp.transpose(raw["w2"], (1, 2, 3, 0))              # [ci, ki, kj, co]
    w = jnp.arange(25)[:, None]
    ow2 = jnp.arange(11)[None, :]
    kj2 = w - 2 * ow2
    valid2 = (kj2 >= 0) & (kj2 < 4)
    n2 = wt2[:, :, jnp.clip(kj2, 0, 3), :] * valid2[None, None, :, :, None]
    n2 = jnp.transpose(n2, (1, 2, 0, 3, 4)).reshape(4, 500, 220).astype(bf16)

    # conv2 stride-2 row selectors: S2[ki][oh2, h] = 1 iff h == 2*oh2 + ki.
    oh2 = jnp.arange(11)[:, None]
    h_idx = jnp.arange(25)[None, :]
    s2 = jnp.stack([(h_idx == 2 * oh2 + ki) for ki in range(4)]).astype(bf16)

    # maxpool 2x2/2 selectors (row pairs, then ow/lane pairs).
    i5 = jnp.arange(5)[:, None]
    j11 = jnp.arange(11)[None, :]
    hp = jnp.stack([(j11 == 2 * i5), (j11 == 2 * i5 + 1)]).astype(bf16)   # [2,5,11]
    row = jnp.arange(220)[:, None]
    col = jnp.arange(100)[None, :]
    wp_even = (row == (col // 20) * 40 + (col % 20))
    wp_odd = (row == (col // 20) * 40 + 20 + (col % 20))
    wp = jnp.stack([wp_even, wp_odd]).astype(bf16)                        # [2,220,100]

    # fc1: permute rows so the NHWC-flattened pooled tile [h, w*20+co] feeds it
    # directly (folds the NCHW flatten transpose), pad N 250 -> 256.
    wf1 = raw["wfc1"].reshape(250, 20, 5, 5)                  # [n, co, h, w]
    wf1 = jnp.transpose(wf1, (2, 3, 1, 0)).reshape(5, 100, 250)
    wf1 = jnp.pad(wf1, ((0, 0), (0, 0), (0, 6))).astype(bf16)  # [5, 100, 256]

    # fc2: [10, 250] -> zero-padded [256, 128].
    wf2 = jnp.zeros((256, 128), f32).at[:250, :10].set(raw["wfc2"].T).astype(bf16)

    # Epilogue params (bias, bn scale, bn shift) tiled over the flattened lanes.
    ep1 = jnp.stack([jnp.tile(raw["b1"], 25), jnp.tile(scale1, 25),
                     jnp.tile(shift1, 25)]).astype(f32)        # [3, 500]
    ep2 = jnp.stack([jnp.tile(raw["b2"], 11), jnp.tile(scale2, 11),
                     jnp.tile(shift2, 11)]).astype(f32)        # [3, 220]
    pad6 = lambda v, c: jnp.pad(v, (0, 6), constant_values=c)
    ep3 = jnp.stack([pad6(raw["bfc1"], 0.0), pad6(scale3, 1.0),
                     pad6(shift3, 0.0)]).astype(f32)           # [3, 256]
    bfc2 = jnp.zeros((1, 128), f32).at[0, :10].set(raw["bfc2"])

    return dict(m1=m1, s2=s2, n2=n2, hp=hp, wp=wp, wf1=wf1, wf2=wf2,
                ep1=ep1, ep2=ep2, ep3=ep3, bfc2=bfc2)


if __name__ == "__main__":
    root = jax.random.PRNGKey(0)
    k_params, k_x = jax.random.split(root)
    raw = init_raw_params(k_params)
    params = prepare_params(raw)
    # fc1 expects 20*5*5 features, which forces a 28x28 single-channel input.
    x = jax.random.normal(k_x, (2, 1, 28, 28), jnp.float32)

    out = jax.jit(cnn3_forward)(x, params)
    out = jax.block_until_ready(out)
    assert out.shape == (2, 10) and out.dtype == jnp.float32
    print("KERNEL_OK")
</pallas_src>

<mosaic_0001>
module attributes {stable_mosaic.version = 11 : i64} {
  func.func @_cnn3_kernel(%arg0: i32, %arg1: memref<1x28x28xf32, #tpu.memory_space<vmem>>, %arg2: memref<4x28x500xbf16, #tpu.memory_space<vmem>>, %arg3: memref<4x11x25xbf16, #tpu.memory_space<vmem>>, %arg4: memref<4x500x220xbf16, #tpu.memory_space<vmem>>, %arg5: memref<2x5x11xbf16, #tpu.memory_space<vmem>>, %arg6: memref<2x220x100xbf16, #tpu.memory_space<vmem>>, %arg7: memref<5x100x256xbf16, #tpu.memory_space<vmem>>, %arg8: memref<256x128xbf16, #tpu.memory_space<vmem>>, %arg9: memref<3x500xf32, #tpu.memory_space<vmem>>, %arg10: memref<3x220xf32, #tpu.memory_space<vmem>>, %arg11: memref<3x256xf32, #tpu.memory_space<vmem>>, %arg12: memref<1x128xf32, #tpu.memory_space<vmem>>, %arg13: memref<1x1x10xf32, #tpu.memory_space<vmem>>) attributes {dimension_semantics = [#tpu.dimension_semantics<parallel>], iteration_bounds = array<i64: 2>, scalar_prefetch = 0 : i64, scratch_operands = 0 : i64, tpu.core_type = #tpu.core_type<tc>, window_params = [{transform_indices = @transform_0, window_bounds = array<i64: 1, 28, 28>}, {pipeline_mode = #tpu.pipeline_mode<synchronous>, transform_indices = @transform_1, window_bounds = array<i64: 4, 28, 500>}, {pipeline_mode = #tpu.pipeline_mode<synchronous>, transform_indices = @transform_2, window_bounds = array<i64: 4, 11, 25>}, {pipeline_mode = #tpu.pipeline_mode<synchronous>, transform_indices = @transform_3, window_bounds = array<i64: 4, 500, 220>}, {pipeline_mode = #tpu.pipeline_mode<synchronous>, transform_indices = @transform_4, window_bounds = array<i64: 2, 5, 11>}, {pipeline_mode = #tpu.pipeline_mode<synchronous>, transform_indices = @transform_5, window_bounds = array<i64: 2, 220, 100>}, {pipeline_mode = #tpu.pipeline_mode<synchronous>, transform_indices = @transform_6, window_bounds = array<i64: 5, 100, 256>}, {pipeline_mode = #tpu.pipeline_mode<synchronous>, transform_indices = @transform_7, window_bounds = array<i64: 256, 128>}, {pipeline_mode = #tpu.pipeline_mode<synchronous>, transform_indices = @transform_8, window_bounds = array<i64: 3, 500>}, {pipeline_mode = #tpu.pipeline_mode<synchronous>, transform_indices = @transform_9, window_bounds = array<i64: 3, 220>}, {pipeline_mode = #tpu.pipeline_mode<synchronous>, transform_indices = @transform_10, window_bounds = array<i64: 3, 256>}, {pipeline_mode = #tpu.pipeline_mode<synchronous>, transform_indices = @transform_11, window_bounds = array<i64: 1, 128>}, {transform_indices = @transform_12, window_bounds = array<i64: 1, 1, 10>}]} {
    %c0 = arith.constant 0 : index
    %c0_0 = arith.constant 0 : index
    %c0_1 = arith.constant 0 : index
    %0 = vector.load %arg1[%c0, %c0_0, %c0_1] : memref<1x28x28xf32, #tpu.memory_space<vmem>>, vector<1x25x28xf32>
    %1 = vector.shape_cast %0 : vector<1x25x28xf32> to vector<25x28xf32>
    %2 = arith.truncf %1 : vector<25x28xf32> to vector<25x28xbf16>
    %c0_2 = arith.constant 0 : index
    %c0_3 = arith.constant 0 : index
    %c0_4 = arith.constant 0 : index
    %3 = vector.load %arg2[%c0_2, %c0_3, %c0_4] : memref<4x28x500xbf16, #tpu.memory_space<vmem>>, vector<1x28x500xbf16>
    %4 = vector.shape_cast %3 : vector<1x28x500xbf16> to vector<28x500xbf16>
    %cst = arith.constant dense<0.000000e+00> : vector<25x500xf32>
    %5 = tpu.matmul %2, %4, %cst {dimension_numbers = #tpu.dot_dimension_numbers<[1], [0], [0], [1], [0, 0, 1, 1], [], []>} : vector<25x28xbf16>, vector<28x500xbf16>, vector<25x500xf32> -> vector<25x500xf32>
    %c0_5 = arith.constant 0 : index
    %c1 = arith.constant 1 : index
    %c0_6 = arith.constant 0 : index
    %6 = vector.load %arg1[%c0_5, %c1, %c0_6] : memref<1x28x28xf32, #tpu.memory_space<vmem>>, vector<1x25x28xf32>
    %7 = vector.shape_cast %6 : vector<1x25x28xf32> to vector<25x28xf32>
    %8 = arith.truncf %7 : vector<25x28xf32> to vector<25x28xbf16>
    %c1_7 = arith.constant 1 : index
    %c0_8 = arith.constant 0 : index
    %c0_9 = arith.constant 0 : index
    %9 = vector.load %arg2[%c1_7, %c0_8, %c0_9] : memref<4x28x500xbf16, #tpu.memory_space<vmem>>, vector<1x28x500xbf16>
    %10 = vector.shape_cast %9 : vector<1x28x500xbf16> to vector<28x500xbf16>
    %cst_10 = arith.constant dense<0.000000e+00> : vector<25x500xf32>
    %11 = tpu.matmul %8, %10, %cst_10 {dimension_numbers = #tpu.dot_dimension_numbers<[1], [0], [0], [1], [0, 0, 1, 1], [], []>} : vector<25x28xbf16>, vector<28x500xbf16>, vector<25x500xf32> -> vector<25x500xf32>
    %12 = arith.addf %5, %11 : vector<25x500xf32>
    %c0_11 = arith.constant 0 : index
    %c2 = arith.constant 2 : index
    %c0_12 = arith.constant 0 : index
    %13 = vector.load %arg1[%c0_11, %c2, %c0_12] : memref<1x28x28xf32, #tpu.memory_space<vmem>>, vector<1x25x28xf32>
    %14 = vector.shape_cast %13 : vector<1x25x28xf32> to vector<25x28xf32>
    %15 = arith.truncf %14 : vector<25x28xf32> to vector<25x28xbf16>
    %c2_13 = arith.constant 2 : index
    %c0_14 = arith.constant 0 : index
    %c0_15 = arith.constant 0 : index
    %16 = vector.load %arg2[%c2_13, %c0_14, %c0_15] : memref<4x28x500xbf16, #tpu.memory_space<vmem>>, vector<1x28x500xbf16>
    %17 = vector.shape_cast %16 : vector<1x28x500xbf16> to vector<28x500xbf16>
    %cst_16 = arith.constant dense<0.000000e+00> : vector<25x500xf32>
    %18 = tpu.matmul %15, %17, %cst_16 {dimension_numbers = #tpu.dot_dimension_numbers<[1], [0], [0], [1], [0, 0, 1, 1], [], []>} : vector<25x28xbf16>, vector<28x500xbf16>, vector<25x500xf32> -> vector<25x500xf32>
    %19 = arith.addf %12, %18 : vector<25x500xf32>
    %c0_17 = arith.constant 0 : index
    %c3 = arith.constant 3 : index
    %c0_18 = arith.constant 0 : index
    %20 = vector.load %arg1[%c0_17, %c3, %c0_18] : memref<1x28x28xf32, #tpu.memory_space<vmem>>, vector<1x25x28xf32>
    %21 = vector.shape_cast %20 : vector<1x25x28xf32> to vector<25x28xf32>
    %22 = arith.truncf %21 : vector<25x28xf32> to vector<25x28xbf16>
    %c3_19 = arith.constant 3 : index
    %c0_20 = arith.constant 0 : index
    %c0_21 = arith.constant 0 : index
    %23 = vector.load %arg2[%c3_19, %c0_20, %c0_21] : memref<4x28x500xbf16, #tpu.memory_space<vmem>>, vector<1x28x500xbf16>
    %24 = vector.shape_cast %23 : vector<1x28x500xbf16> to vector<28x500xbf16>
    %cst_22 = arith.constant dense<0.000000e+00> : vector<25x500xf32>
    %25 = tpu.matmul %22, %24, %cst_22 {dimension_numbers = #tpu.dot_dimension_numbers<[1], [0], [0], [1], [0, 0, 1, 1], [], []>} : vector<25x28xbf16>, vector<28x500xbf16>, vector<25x500xf32> -> vector<25x500xf32>
    %26 = arith.addf %19, %25 : vector<25x500xf32>
    %c0_23 = arith.constant 0 : index
    %c0_24 = arith.constant 0 : index
    %27 = vector.load %arg9[%c0_23, %c0_24] : memref<3x500xf32, #tpu.memory_space<vmem>>, vector<1x500xf32>
    %28 = vector.broadcast %27 : vector<1x500xf32> to vector<25x500xf32>
    %29 = arith.addf %26, %28 : vector<25x500xf32>
    %cst_25 = arith.constant 0.000000e+00 : f32
    %30 = vector.broadcast %cst_25 : f32 to vector<25x500xf32>
    %31 = arith.maximumf %29, %30 : vector<25x500xf32>
    %c1_26 = arith.constant 1 : index
    %c0_27 = arith.constant 0 : index
    %32 = vector.load %arg9[%c1_26, %c0_27] : memref<3x500xf32, #tpu.memory_space<vmem>>, vector<1x500xf32>
    %33 = vector.broadcast %32 : vector<1x500xf32> to vector<25x500xf32>
    %34 = arith.mulf %31, %33 : vector<25x500xf32>
    %c2_28 = arith.constant 2 : index
    %c0_29 = arith.constant 0 : index
    %35 = vector.load %arg9[%c2_28, %c0_29] : memref<3x500xf32, #tpu.memory_space<vmem>>, vector<1x500xf32>
    %36 = vector.broadcast %35 : vector<1x500xf32> to vector<25x500xf32>
    %37 = arith.addf %34, %36 : vector<25x500xf32>
    %38 = arith.truncf %37 : vector<25x500xf32> to vector<25x500xbf16>
    %cst_30 = arith.constant 0.000000e+00 : f32
    %39 = vector.broadcast %cst_30 : f32 to vector<11x220xf32>
    %c0_31 = arith.constant 0 : index
    %c0_32 = arith.constant 0 : index
    %c0_33 = arith.constant 0 : index
    %40 = vector.load %arg3[%c0_31, %c0_32, %c0_33] : memref<4x11x25xbf16, #tpu.memory_space<vmem>>, vector<1x11x25xbf16>
    %41 = vector.shape_cast %40 : vector<1x11x25xbf16> to vector<11x25xbf16>
    %cst_34 = arith.constant dense<0.000000e+00> : vector<11x500xf32>
    %42 = tpu.matmul %41, %38, %cst_34 {dimension_numbers = #tpu.dot_dimension_numbers<[1], [0], [0], [1], [0, 0, 1, 1], [], []>} : vector<11x25xbf16>, vector<25x500xbf16>, vector<11x500xf32> -> vector<11x500xf32>
    %43 = arith.truncf %42 : vector<11x500xf32> to vector<11x500xbf16>
    %c0_35 = arith.constant 0 : index
    %c0_36 = arith.constant 0 : index
    %c0_37 = arith.constant 0 : index
    %44 = vector.load %arg4[%c0_35, %c0_36, %c0_37] : memref<4x500x220xbf16, #tpu.memory_space<vmem>>, vector<1x500x220xbf16>
    %45 = vector.shape_cast %44 : vector<1x500x220xbf16> to vector<500x220xbf16>
    %cst_38 = arith.constant dense<0.000000e+00> : vector<11x220xf32>
    %46 = tpu.matmul %43, %45, %cst_38 {dimension_numbers = #tpu.dot_dimension_numbers<[1], [0], [0], [1], [0, 0, 1, 1], [], []>} : vector<11x500xbf16>, vector<500x220xbf16>, vector<11x220xf32> -> vector<11x220xf32>
    %47 = arith.addf %39, %46 : vector<11x220xf32>
    %c1_39 = arith.constant 1 : index
    %c0_40 = arith.constant 0 : index
    %c0_41 = arith.constant 0 : index
    %48 = vector.load %arg3[%c1_39, %c0_40, %c0_41] : memref<4x11x25xbf16, #tpu.memory_space<vmem>>, vector<1x11x25xbf16>
    %49 = vector.shape_cast %48 : vector<1x11x25xbf16> to vector<11x25xbf16>
    %cst_42 = arith.constant dense<0.000000e+00> : vector<11x500xf32>
    %50 = tpu.matmul %49, %38, %cst_42 {dimension_numbers = #tpu.dot_dimension_numbers<[1], [0], [0], [1], [0, 0, 1, 1], [], []>} : vector<11x25xbf16>, vector<25x500xbf16>, vector<11x500xf32> -> vector<11x500xf32>
    %51 = arith.truncf %50 : vector<11x500xf32> to vector<11x500xbf16>
    %c1_43 = arith.constant 1 : index
    %c0_44 = arith.constant 0 : index
    %c0_45 = arith.constant 0 : index
    %52 = vector.load %arg4[%c1_43, %c0_44, %c0_45] : memref<4x500x220xbf16, #tpu.memory_space<vmem>>, vector<1x500x220xbf16>
    %53 = vector.shape_cast %52 : vector<1x500x220xbf16> to vector<500x220xbf16>
    %cst_46 = arith.constant dense<0.000000e+00> : vector<11x220xf32>
    %54 = tpu.matmul %51, %53, %cst_46 {dimension_numbers = #tpu.dot_dimension_numbers<[1], [0], [0], [1], [0, 0, 1, 1], [], []>} : vector<11x500xbf16>, vector<500x220xbf16>, vector<11x220xf32> -> vector<11x220xf32>
    %55 = arith.addf %47, %54 : vector<11x220xf32>
    %c2_47 = arith.constant 2 : index
    %c0_48 = arith.constant 0 : index
    %c0_49 = arith.constant 0 : index
    %56 = vector.load %arg3[%c2_47, %c0_48, %c0_49] : memref<4x11x25xbf16, #tpu.memory_space<vmem>>, vector<1x11x25xbf16>
    %57 = vector.shape_cast %56 : vector<1x11x25xbf16> to vector<11x25xbf16>
    %cst_50 = arith.constant dense<0.000000e+00> : vector<11x500xf32>
    %58 = tpu.matmul %57, %38, %cst_50 {dimension_numbers = #tpu.dot_dimension_numbers<[1], [0], [0], [1], [0, 0, 1, 1], [], []>} : vector<11x25xbf16>, vector<25x500xbf16>, vector<11x500xf32> -> vector<11x500xf32>
    %59 = arith.truncf %58 : vector<11x500xf32> to vector<11x500xbf16>
    %c2_51 = arith.constant 2 : index
    %c0_52 = arith.constant 0 : index
    %c0_53 = arith.constant 0 : index
    %60 = vector.load %arg4[%c2_51, %c0_52, %c0_53] : memref<4x500x220xbf16, #tpu.memory_space<vmem>>, vector<1x500x220xbf16>
    %61 = vector.shape_cast %60 : vector<1x500x220xbf16> to vector<500x220xbf16>
    %cst_54 = arith.constant dense<0.000000e+00> : vector<11x220xf32>
    %62 = tpu.matmul %59, %61, %cst_54 {dimension_numbers = #tpu.dot_dimension_numbers<[1], [0], [0], [1], [0, 0, 1, 1], [], []>} : vector<11x500xbf16>, vector<500x220xbf16>, vector<11x220xf32> -> vector<11x220xf32>
    %63 = arith.addf %55, %62 : vector<11x220xf32>
    %c3_55 = arith.constant 3 : index
    %c0_56 = arith.constant 0 : index
    %c0_57 = arith.constant 0 : index
    %64 = vector.load %arg3[%c3_55, %c0_56, %c0_57] : memref<4x11x25xbf16, #tpu.memory_space<vmem>>, vector<1x11x25xbf16>
    %65 = vector.shape_cast %64 : vector<1x11x25xbf16> to vector<11x25xbf16>
    %cst_58 = arith.constant dense<0.000000e+00> : vector<11x500xf32>
    %66 = tpu.matmul %65, %38, %cst_58 {dimension_numbers = #tpu.dot_dimension_numbers<[1], [0], [0], [1], [0, 0, 1, 1], [], []>} : vector<11x25xbf16>, vector<25x500xbf16>, vector<11x500xf32> -> vector<11x500xf32>
    %67 = arith.truncf %66 : vector<11x500xf32> to vector<11x500xbf16>
    %c3_59 = arith.constant 3 : index
    %c0_60 = arith.constant 0 : index
    %c0_61 = arith.constant 0 : index
    %68 = vector.load %arg4[%c3_59, %c0_60, %c0_61] : memref<4x500x220xbf16, #tpu.memory_space<vmem>>, vector<1x500x220xbf16>
    %69 = vector.shape_cast %68 : vector<1x500x220xbf16> to vector<500x220xbf16>
    %cst_62 = arith.constant dense<0.000000e+00> : vector<11x220xf32>
    %70 = tpu.matmul %67, %69, %cst_62 {dimension_numbers = #tpu.dot_dimension_numbers<[1], [0], [0], [1], [0, 0, 1, 1], [], []>} : vector<11x500xbf16>, vector<500x220xbf16>, vector<11x220xf32> -> vector<11x220xf32>
    %71 = arith.addf %63, %70 : vector<11x220xf32>
    %c0_63 = arith.constant 0 : index
    %c0_64 = arith.constant 0 : index
    %72 = vector.load %arg10[%c0_63, %c0_64] : memref<3x220xf32, #tpu.memory_space<vmem>>, vector<1x220xf32>
    %73 = vector.broadcast %72 : vector<1x220xf32> to vector<11x220xf32>
    %74 = arith.addf %71, %73 : vector<11x220xf32>
    %cst_65 = arith.constant 0.000000e+00 : f32
    %75 = vector.broadcast %cst_65 : f32 to vector<11x220xf32>
    %76 = arith.maximumf %74, %75 : vector<11x220xf32>
    %c1_66 = arith.constant 1 : index
    %c0_67 = arith.constant 0 : index
    %77 = vector.load %arg10[%c1_66, %c0_67] : memref<3x220xf32, #tpu.memory_space<vmem>>, vector<1x220xf32>
    %78 = vector.broadcast %77 : vector<1x220xf32> to vector<11x220xf32>
    %79 = arith.mulf %76, %78 : vector<11x220xf32>
    %c2_68 = arith.constant 2 : index
    %c0_69 = arith.constant 0 : index
    %80 = vector.load %arg10[%c2_68, %c0_69] : memref<3x220xf32, #tpu.memory_space<vmem>>, vector<1x220xf32>
    %81 = vector.broadcast %80 : vector<1x220xf32> to vector<11x220xf32>
    %82 = arith.addf %79, %81 : vector<11x220xf32>
    %83 = arith.truncf %82 : vector<11x220xf32> to vector<11x220xbf16>
    %c0_70 = arith.constant 0 : index
    %c0_71 = arith.constant 0 : index
    %c0_72 = arith.constant 0 : index
    %84 = vector.load %arg5[%c0_70, %c0_71, %c0_72] : memref<2x5x11xbf16, #tpu.memory_space<vmem>>, vector<1x5x11xbf16>
    %85 = vector.shape_cast %84 : vector<1x5x11xbf16> to vector<5x11xbf16>
    %cst_73 = arith.constant dense<0.000000e+00> : vector<5x220xf32>
    %86 = tpu.matmul %85, %83, %cst_73 {dimension_numbers = #tpu.dot_dimension_numbers<[1], [0], [0], [1], [0, 0, 1, 1], [], []>} : vector<5x11xbf16>, vector<11x220xbf16>, vector<5x220xf32> -> vector<5x220xf32>
    %c1_74 = arith.constant 1 : index
    %c0_75 = arith.constant 0 : index
    %c0_76 = arith.constant 0 : index
    %87 = vector.load %arg5[%c1_74, %c0_75, %c0_76] : memref<2x5x11xbf16, #tpu.memory_space<vmem>>, vector<1x5x11xbf16>
    %88 = vector.shape_cast %87 : vector<1x5x11xbf16> to vector<5x11xbf16>
    %cst_77 = arith.constant dense<0.000000e+00> : vector<5x220xf32>
    %89 = tpu.matmul %88, %83, %cst_77 {dimension_numbers = #tpu.dot_dimension_numbers<[1], [0], [0], [1], [0, 0, 1, 1], [], []>} : vector<5x11xbf16>, vector<11x220xbf16>, vector<5x220xf32> -> vector<5x220xf32>
    %90 = arith.maximumf %86, %89 : vector<5x220xf32>
    %91 = arith.truncf %90 : vector<5x220xf32> to vector<5x220xbf16>
    %c0_78 = arith.constant 0 : index
    %c0_79 = arith.constant 0 : index
    %c0_80 = arith.constant 0 : index
    %92 = vector.load %arg6[%c0_78, %c0_79, %c0_80] : memref<2x220x100xbf16, #tpu.memory_space<vmem>>, vector<1x220x100xbf16>
    %93 = vector.shape_cast %92 : vector<1x220x100xbf16> to vector<220x100xbf16>
    %cst_81 = arith.constant dense<0.000000e+00> : vector<5x100xf32>
    %94 = tpu.matmul %91, %93, %cst_81 {dimension_numbers = #tpu.dot_dimension_numbers<[1], [0], [0], [1], [0, 0, 1, 1], [], []>} : vector<5x220xbf16>, vector<220x100xbf16>, vector<5x100xf32> -> vector<5x100xf32>
    %c1_82 = arith.constant 1 : index
    %c0_83 = arith.constant 0 : index
    %c0_84 = arith.constant 0 : index
    %95 = vector.load %arg6[%c1_82, %c0_83, %c0_84] : memref<2x220x100xbf16, #tpu.memory_space<vmem>>, vector<1x220x100xbf16>
    %96 = vector.shape_cast %95 : vector<1x220x100xbf16> to vector<220x100xbf16>
    %cst_85 = arith.constant dense<0.000000e+00> : vector<5x100xf32>
    %97 = tpu.matmul %91, %96, %cst_85 {dimension_numbers = #tpu.dot_dimension_numbers<[1], [0], [0], [1], [0, 0, 1, 1], [], []>} : vector<5x220xbf16>, vector<220x100xbf16>, vector<5x100xf32> -> vector<5x100xf32>
    %98 = arith.maximumf %94, %97 : vector<5x100xf32>
    %99 = arith.truncf %98 : vector<5x100xf32> to vector<5x100xbf16>
    %100 = vector.extract_strided_slice %99 {offsets = [0, 0], sizes = [1, 100], strides = [1, 1]} : vector<5x100xbf16> to vector<1x100xbf16>
    %c0_86 = arith.constant 0 : index
    %c0_87 = arith.constant 0 : index
    %c0_88 = arith.constant 0 : index
    %101 = vector.load %arg7[%c0_86, %c0_87, %c0_88] : memref<5x100x256xbf16, #tpu.memory_space<vmem>>, vector<1x100x256xbf16>
    %102 = vector.shape_cast %101 : vector<1x100x256xbf16> to vector<100x256xbf16>
    %cst_89 = arith.constant dense<0.000000e+00> : vector<1x256xf32>
    %103 = tpu.matmul %100, %102, %cst_89 {dimension_numbers = #tpu.dot_dimension_numbers<[1], [0], [0], [1], [0, 0, 1, 1], [], []>} : vector<1x100xbf16>, vector<100x256xbf16>, vector<1x256xf32> -> vector<1x256xf32>
    %104 = vector.extract_strided_slice %99 {offsets = [1, 0], sizes = [1, 100], strides = [1, 1]} : vector<5x100xbf16> to vector<1x100xbf16>
    %c1_90 = arith.constant 1 : index
    %c0_91 = arith.constant 0 : index
    %c0_92 = arith.constant 0 : index
    %105 = vector.load %arg7[%c1_90, %c0_91, %c0_92] : memref<5x100x256xbf16, #tpu.memory_space<vmem>>, vector<1x100x256xbf16>
    %106 = vector.shape_cast %105 : vector<1x100x256xbf16> to vector<100x256xbf16>
    %cst_93 = arith.constant dense<0.000000e+00> : vector<1x256xf32>
    %107 = tpu.matmul %104, %106, %cst_93 {dimension_numbers = #tpu.dot_dimension_numbers<[1], [0], [0], [1], [0, 0, 1, 1], [], []>} : vector<1x100xbf16>, vector<100x256xbf16>, vector<1x256xf32> -> vector<1x256xf32>
    %108 = arith.addf %103, %107 : vector<1x256xf32>
    %109 = vector.extract_strided_slice %99 {offsets = [2, 0], sizes = [1, 100], strides = [1, 1]} : vector<5x100xbf16> to vector<1x100xbf16>
    %c2_94 = arith.constant 2 : index
    %c0_95 = arith.constant 0 : index
    %c0_96 = arith.constant 0 : index
    %110 = vector.load %arg7[%c2_94, %c0_95, %c0_96] : memref<5x100x256xbf16, #tpu.memory_space<vmem>>, vector<1x100x256xbf16>
    %111 = vector.shape_cast %110 : vector<1x100x256xbf16> to vector<100x256xbf16>
    %cst_97 = arith.constant dense<0.000000e+00> : vector<1x256xf32>
    %112 = tpu.matmul %109, %111, %cst_97 {dimension_numbers = #tpu.dot_dimension_numbers<[1], [0], [0], [1], [0, 0, 1, 1], [], []>} : vector<1x100xbf16>, vector<100x256xbf16>, vector<1x256xf32> -> vector<1x256xf32>
    %113 = arith.addf %108, %112 : vector<1x256xf32>
    %114 = vector.extract_strided_slice %99 {offsets = [3, 0], sizes = [1, 100], strides = [1, 1]} : vector<5x100xbf16> to vector<1x100xbf16>
    %c3_98 = arith.constant 3 : index
    %c0_99 = arith.constant 0 : index
    %c0_100 = arith.constant 0 : index
    %115 = vector.load %arg7[%c3_98, %c0_99, %c0_100] : memref<5x100x256xbf16, #tpu.memory_space<vmem>>, vector<1x100x256xbf16>
    %116 = vector.shape_cast %115 : vector<1x100x256xbf16> to vector<100x256xbf16>
    %cst_101 = arith.constant dense<0.000000e+00> : vector<1x256xf32>
    %117 = tpu.matmul %114, %116, %cst_101 {dimension_numbers = #tpu.dot_dimension_numbers<[1], [0], [0], [1], [0, 0, 1, 1], [], []>} : vector<1x100xbf16>, vector<100x256xbf16>, vector<1x256xf32> -> vector<1x256xf32>
    %118 = arith.addf %113, %117 : vector<1x256xf32>
    %119 = vector.extract_strided_slice %99 {offsets = [4, 0], sizes = [1, 100], strides = [1, 1]} : vector<5x100xbf16> to vector<1x100xbf16>
    %c4 = arith.constant 4 : index
    %c0_102 = arith.constant 0 : index
    %c0_103 = arith.constant 0 : index
    %120 = vector.load %arg7[%c4, %c0_102, %c0_103] : memref<5x100x256xbf16, #tpu.memory_space<vmem>>, vector<1x100x256xbf16>
    %121 = vector.shape_cast %120 : vector<1x100x256xbf16> to vector<100x256xbf16>
    %cst_104 = arith.constant dense<0.000000e+00> : vector<1x256xf32>
    %122 = tpu.matmul %119, %121, %cst_104 {dimension_numbers = #tpu.dot_dimension_numbers<[1], [0], [0], [1], [0, 0, 1, 1], [], []>} : vector<1x100xbf16>, vector<100x256xbf16>, vector<1x256xf32> -> vector<1x256xf32>
    %123 = arith.addf %118, %122 : vector<1x256xf32>
    %c0_105 = arith.constant 0 : index
    %c0_106 = arith.constant 0 : index
    %124 = vector.load %arg11[%c0_105, %c0_106] : memref<3x256xf32, #tpu.memory_space<vmem>>, vector<1x256xf32>
    %125 = arith.addf %123, %124 : vector<1x256xf32>
    %cst_107 = arith.constant 0.000000e+00 : f32
    %126 = vector.broadcast %cst_107 : f32 to vector<1x256xf32>
    %127 = arith.maximumf %125, %126 : vector<1x256xf32>
    %c1_108 = arith.constant 1 : index
    %c0_109 = arith.constant 0 : index
    %128 = vector.load %arg11[%c1_108, %c0_109] : memref<3x256xf32, #tpu.memory_space<vmem>>, vector<1x256xf32>
    %129 = arith.mulf %127, %128 : vector<1x256xf32>
    %c2_110 = arith.constant 2 : index
    %c0_111 = arith.constant 0 : index
    %130 = vector.load %arg11[%c2_110, %c0_111] : memref<3x256xf32, #tpu.memory_space<vmem>>, vector<1x256xf32>
    %131 = arith.addf %129, %130 : vector<1x256xf32>
    %132 = arith.truncf %131 : vector<1x256xf32> to vector<1x256xbf16>
    %c0_112 = arith.constant 0 : index
    %c0_113 = arith.constant 0 : index
    %133 = vector.load %arg8[%c0_112, %c0_113] : memref<256x128xbf16, #tpu.memory_space<vmem>>, vector<256x128xbf16>
    %cst_114 = arith.constant dense<0.000000e+00> : vector<1x128xf32>
    %134 = tpu.matmul %132, %133, %cst_114 {dimension_numbers = #tpu.dot_dimension_numbers<[1], [0], [0], [1], [0, 0, 1, 1], [], []>} : vector<1x256xbf16>, vector<256x128xbf16>, vector<1x128xf32> -> vector<1x128xf32>
    %c0_115 = arith.constant 0 : index
    %c0_116 = arith.constant 0 : index
    %135 = vector.load %arg12[%c0_115, %c0_116] : memref<1x128xf32, #tpu.memory_space<vmem>>, vector<1x128xf32>
    %136 = arith.addf %134, %135 : vector<1x128xf32>
    %137 = vector.extract_strided_slice %136 {offsets = [0, 0], sizes = [1, 10], strides = [1, 1]} : vector<1x128xf32> to vector<1x10xf32>
    %c0_117 = arith.constant 0 : index
    %c0_118 = arith.constant 0 : index
    %c0_119 = arith.constant 0 : index
    %138 = vector.load %arg13[%c0_117, %c0_118, %c0_119] : memref<1x1x10xf32, #tpu.memory_space<vmem>>, vector<1x1x10xf32>
    %139 = vector.shape_cast %138 : vector<1x1x10xf32> to vector<1x10xf32>
    %140 = vector.shape_cast %137 : vector<1x10xf32> to vector<1x1x10xf32>
    tpu.vector_store %arg13[%c0_117, %c0_118, %c0_119], %140 {strides = array<i32>} : memref<1x1x10xf32, #tpu.memory_space<vmem>>, vector<1x1x10xf32>,
    return
  }
  func.func @transform_0(%arg0: i32) -> (i32, i32, i32) {
    %c0_i32 = arith.constant 0 : i32
    %c0_i32_0 = arith.constant 0 : i32
    %c0_i32_1 = arith.constant 0 : i32
    return %arg0, %c0_i32, %c0_i32_0 : i32, i32, i32
  }
  func.func @transform_1(%arg0: i32) -> (i32, i32, i32) {
    %c0_i32 = arith.constant 0 : i32
    %c0_i32_0 = arith.constant 0 : i32
    %c0_i32_1 = arith.constant 0 : i32
    %c0_i32_2 = arith.constant 0 : i32
    return %c0_i32, %c0_i32_0, %c0_i32_1 : i32, i32, i32
  }
  func.func @transform_2(%arg0: i32) -> (i32, i32, i32) {
    %c0_i32 = arith.constant 0 : i32
    %c0_i32_0 = arith.constant 0 : i32
    %c0_i32_1 = arith.constant 0 : i32
    %c0_i32_2 = arith.constant 0 : i32
    return %c0_i32, %c0_i32_0, %c0_i32_1 : i32, i32, i32
  }
  func.func @transform_3(%arg0: i32) -> (i32, i32, i32) {
    %c0_i32 = arith.constant 0 : i32
    %c0_i32_0 = arith.constant 0 : i32
    %c0_i32_1 = arith.constant 0 : i32
    %c0_i32_2 = arith.constant 0 : i32
    return %c0_i32, %c0_i32_0, %c0_i32_1 : i32, i32, i32
  }
  func.func @transform_4(%arg0: i32) -> (i32, i32, i32) {
    %c0_i32 = arith.constant 0 : i32
    %c0_i32_0 = arith.constant 0 : i32
    %c0_i32_1 = arith.constant 0 : i32
    %c0_i32_2 = arith.constant 0 : i32
    return %c0_i32, %c0_i32_0, %c0_i32_1 : i32, i32, i32
  }
  func.func @transform_5(%arg0: i32) -> (i32, i32, i32) {
    %c0_i32 = arith.constant 0 : i32
    %c0_i32_0 = arith.constant 0 : i32
    %c0_i32_1 = arith.constant 0 : i32
    %c0_i32_2 = arith.constant 0 : i32
    return %c0_i32, %c0_i32_0, %c0_i32_1 : i32, i32, i32
  }
  func.func @transform_6(%arg0: i32) -> (i32, i32, i32) {
    %c0_i32 = arith.constant 0 : i32
    %c0_i32_0 = arith.constant 0 : i32
    %c0_i32_1 = arith.constant 0 : i32
    %c0_i32_2 = arith.constant 0 : i32
    return %c0_i32, %c0_i32_0, %c0_i32_1 : i32, i32, i32
  }
  func.func @transform_7(%arg0: i32) -> (i32, i32) {
    %c0_i32 = arith.constant 0 : i32
    %c0_i32_0 = arith.constant 0 : i32
    %c0_i32_1 = arith.constant 0 : i32
    return %c0_i32, %c0_i32_0 : i32, i32
  }
  func.func @transform_8(%arg0: i32) -> (i32, i32) {
    %c0_i32 = arith.constant 0 : i32
    %c0_i32_0 = arith.constant 0 : i32
    %c0_i32_1 = arith.constant 0 : i32
    return %c0_i32, %c0_i32_0 : i32, i32
  }
  func.func @transform_9(%arg0: i32) -> (i32, i32) {
    %c0_i32 = arith.constant 0 : i32
    %c0_i32_0 = arith.constant 0 : i32
    %c0_i32_1 = arith.constant 0 : i32
    return %c0_i32, %c0_i32_0 : i32, i32
  }
  func.func @transform_10(%arg0: i32) -> (i32, i32) {
    %c0_i32 = arith.constant 0 : i32
    %c0_i32_0 = arith.constant 0 : i32
    %c0_i32_1 = arith.constant 0 : i32
    return %c0_i32, %c0_i32_0 : i32, i32
  }
  func.func @transform_11(%arg0: i32) -> (i32, i32) {
    %c0_i32 = arith.constant 0 : i32
    %c0_i32_0 = arith.constant 0 : i32
    %c0_i32_1 = arith.constant 0 : i32
    return %c0_i32, %c0_i32_0 : i32, i32
  }
  func.func @transform_12(%arg0: i32) -> (i32, i32, i32) {
    %c0_i32 = arith.constant 0 : i32
    %c0_i32_0 = arith.constant 0 : i32
    %c0_i32_1 = arith.constant 0 : i32
    return %arg0, %c0_i32, %c0_i32_0 : i32, i32, i32
  }
}

</mosaic_0001>

<bundles_post_ra>
// kernel: cnn3_forward.1
= control target key start
LH: loop header
LB: loop body
LE: loop exit
PB: predicated region body
PF: predicated region fallthrough
CT: control target
= control target key end

     0   :  { %17 = vsyncpa [#allocation3], 0  ;;  %s8337_s0 = inlined_call_operand.vmem [shape: f32[2,28,28], index: 0, kind: input, shape index: {}]   ;;  %s8338_s1 = inlined_call_operand.vmem [shape: bf16[4,28,500], index: 1, kind: input, shape index: {}]   ;;  %s8339_s2 = inlined_call_operand.vmem [shape: bf16[4,11,25], index: 2, kind: input, shape index: {}]   ;;  %s8340_s3 = inlined_call_operand.vmem [shape: bf16[4,500,220], index: 3, kind: input, shape index: {}]   ;;  %s8341_s4 = inlined_call_operand.vmem [shape: bf16[2,5,11], index: 4, kind: input, shape index: {}]   ;;  %s8342_s5 = inlined_call_operand.vmem [shape: bf16[2,220,100], index: 5, kind: input, shape index: {}]   ;;  %s8343_s6 = inlined_call_operand.vmem [shape: bf16[5,100,256], index: 6, kind: input, shape index: {}]   ;;  %s8344_s7 = inlined_call_operand.vmem [shape: bf16[256,128], index: 7, kind: input, shape index: {}]   ;;  %s8345_s8 = inlined_call_operand.vmem [shape: f32[3,500], index: 8, kind: input, shape index: {}]   ;;  %s8346_s9 = inlined_call_operand.vmem [shape: f32[3,220], index: 9, kind: input, shape index: {}]   ;;  %s8347_s10 = inlined_call_operand.vmem [shape: f32[3,256], index: 10, kind: input, shape index: {}]   ;;  %s8348_s11 = inlined_call_operand.vmem [shape: f32[1,128], index: 11, kind: input, shape index: {}]   ;;  %s8349_s12 = inlined_call_operand.hbm [shape: f32[2,1,10], index: 12, kind: output, shape index: {}]  }
   0x1   :  { %19 = vsyncpa [#allocation3 + $0x1], 0  ;;  %s6574_s21 = smov 0   ;;  %s6576_s22 = smov 0  }
   0x2   :  { %s6578_s23 = smov 0   ;;  %s6580_s24 = smov 0  }
   0x3 LB: > { %8366 = sst [smem:[#allocation5_spill]] %s6500_s23  ;;  %s6595_s25 = sadd.s32 4294967295, %s6504_s24   ;;  %s6504_s24 = sphi %s6580_s24, %s8400_s24   ;;  %s6500_s23 = sphi %s6578_s23, %s8397_s23   ;;  %s6496_s22 = sphi %s6576_s22, %s8399_s22   ;;  %s6492_s21 = sphi %s6574_s21, %s8398_s21  }
   0x4   : > { %s5029_s26 = sadd.s32 4294967294, %s6504_s24   ;;  %s6599_s27 = sadd.s32 1, %s6504_s24  }
   0x5   : > { %s289_s28 = sadd.s32 1, %s6500_s23  ;;  %s286_s29 = ssub.s32 %s6504_s24, %s6599_s27 }
   0x6   : > { %p299_p0 = scmp.ne.s32.totalorder %s6500_s23, %s6496_s22  ;;  %p287_p1 = scmp.eq.s32.totalorder %s286_s29, 0 }
   0x7   : > { %p300_p2 = scmp.eq.s32.totalorder %s6595_s25, 1  ;;  %p305_p3 = scmp.ne.s32.totalorder %s6496_s22, %s6492_s21 }
   0x8   : > { %p306_p4 = scmp.eq.s32.totalorder %s5029_s26, 1  ;;  %p5032_p7 = scmp.ge.s32.totalorder %s6504_s24, 1 }
   0x9   : > { %s6610_s30 = scalar_select %p287_p1, %s6500_s23, %s289_s28  }
   0xa   : > { %p6612_p5 = por %p300_p2, %p299_p0  ;;  %p6616_p6 = por %p306_p4, %p305_p3 }
   0xb   : > { %8367 = sst [smem:[#allocation6_spill]] %s6610_s30  ;;  %p365_p8 = scmp.lt.s32.totalorder %s6504_s24, 3 }
   0xd   : > { %p366_p9 = pnand %p5032_p7, %p365_p8 }
   0xf   : > { %369 = sbr.rel (%p366_p9) target bundleno = 2096 (0x830), region = 68 }
  0x14   : > { %v5868_v0 = vld [vmem:[%s8338_s1 + $0x64] ss:$16 sps:$4 sm:$0x3f]   ;;  %vm484_vm0 = vcmask 1045504   ;;  %v8351_v3 = vmov 0   ;;  %p406_p10 = scmp.lt.s32.totalorder %s6595_s25, 1 }
  0x15   : > { %5051 = vmatprep.subr.msk.bf16.mxu0 %vm484_vm0, %v5868_v0  ;;  %v5870_v1 = vld [vmem:[%s8338_s1 + $0x6c] ss:$16 sps:$4 sm:$0x3f]   ;;  %v5872_v2 = vld [vmem:[%s8338_s1 + $0x60] ss:$16 sps:$4 sm:$0x3f]   ;;  %529 = vmatprep.mubr.bf16.mxu0 %v8351_v3 }
  0x16   : > { %v5873_v4 = vld [vmem:[%s8338_s1 + $0x68] ss:$16 sps:$4 sm:$0x3f]   ;;  %v5874_v5 = vld [vmem:[%s8338_s1 + $0x44] ss:$16 sps:$4 sm:$0xff]   ;;  %582 = vmatprep.mubr.bf16.mxu1 %v8351_v3  ;;  %5054 = vmatprep.subr.msk.bf16.mxu1 %vm484_vm0, %v5870_v1  ;;  %v486_v6 = vsel %vm484_vm0, %v5872_v2, 0 }
  0x17   : > { %v5876_v7 = vld [vmem:[%s8338_s1 + $0x4c] ss:$16 sps:$4 sm:$0xff]   ;;  %510 = vmatpush1.bf16.msra.mxu0 %v486_v6  ;;  %v492_v8 = vsel %vm484_vm0, %v5873_v4, 0  ;;  %v5878_v9 = vld [vmem:[%s8338_s1 + $0x40] ss:$16 sps:$4 sm:$0xff]   ;;  %s407_s28 = scalar_select %p406_p10, %s6595_s25, 1 }
  0x18   : > { %v5879_v10 = vld [vmem:[%s8338_s1 + $0x48] ss:$16 sps:$4 sm:$0xff]   ;;  %563 = vmatpush1.bf16.msra.mxu1 %v492_v8  ;;  %511 = vmatprep.subr.bf16.mxu0 %v5874_v5  ;;  %v5880_v11 = vld [vmem:[%s8338_s1 + $0x24] ss:$16 sps:$4 sm:$0x3f]   ;;  %vm477_vm1 = vcmask 228352  }
  0x19   : > { %564 = vmatprep.subr.bf16.mxu1 %v5876_v7  ;;  %s5804_s16 = sshll.u32 %s407_s28, 5  ;;  %v5882_v12 = vld [vmem:[%s8338_s1 + $0x2c] ss:$16 sps:$4 sm:$0x3f]   ;;  %v5888_v20 = vld [vmem:[%s8338_s1 + $0x4] ss:$16 sps:$4 sm:$0xff]  }
  0x1a   : > { %s6663_s23 = scalar_lea.vmem %s8337_s0, %s5804_s16  ;;  %v5884_v13 = vld [vmem:[%s8338_s1 + $0x20] ss:$16 sps:$4 sm:$0x3f]   ;;  %v5885_v14 = vld [vmem:[%s8338_s1 + $0x28] ss:$16 sps:$4 sm:$0x3f]  }
  0x1b   : > { %512 = vmatpush1.bf16.msra.mxu0 %v5878_v9  ;;  %v426_v15 = vld [vmem:[%s6663_s23 + $0x1] sm:$0xff]  ;;  %v427_v16 = vld [vmem:[%s6663_s23 + $0x9] sm:$0xff]  ;;  %v646_v18 = vsel %vm484_vm0, %v5884_v13, 0  ;;  %v652_v19 = vsel %vm484_vm0, %v5885_v14, 0  ;;  %v428_v21 = vld [vmem:[%s6663_s23 + $0x11] sm:$0xff]  ;;  %vm1296_vm2 = vcmask 1043456  }
  0x1c   : > { %565 = vmatpush1.bf16.msra.mxu1 %v5879_v10  ;;  %5065 = vmatprep.subr.msk.bf16.mxu0 %vm484_vm0, %v5880_v11  ;;  %v430_v17 = vpack.c.bf16 %v427_v16, %v426_v15  ;;  %v429_v22 = vld [vmem:[%s6663_s23 + $0x19] sm:$0x1]  ;;  %v5891_v23 = vld [vmem:[%s8338_s1 + $0xc] ss:$16 sps:$4 sm:$0xff]   ;;  %v5886_v24 = vld [vmem:[%s8338_s1] ss:$16 sps:$4 sm:$0xff]  }
  0x1d   : > { %5068 = vmatprep.subr.msk.bf16.mxu1 %vm484_vm0, %v5882_v12  ;;  %v5889_v25 = vld [vmem:[%s8338_s1 + $0x8] ss:$16 sps:$4 sm:$0xff]   ;;  %v5892_v26 = vld [vmem:[%s8338_s1 + $0xa4] ss:$16 sps:$4 sm:$0x3f]   ;;  %v431_v28 = vpack.c.bf16 %v429_v22, %v428_v21  ;;  %vm1297_vm3 = vcmask 1044480  }
  0x1e   : > { %5052 = vmatmul.mubr.msk.bf16.vlgmr.msra.gmra.mxu0 %vm477_vm1, %v430_v17  ;;  %v5894_v27 = vld [vmem:[%s8338_s1 + $0xac] ss:$16 sps:$4 sm:$0x3f]   ;;  %v412_v29 = vld [vmem:[%s6663_s23] sm:$0xff]  ;;  %v414_v35 = vld [vmem:[%s6663_s23 + $0x10] sm:$0xff]  ;;  %vm1292_vm4 = vcmask 203776  }
  0x1f   : > { %5055 = vmatmul.mubr.msk.bf16.vlgmr.msra.gmra.mxu1 %vm477_vm1, %v430_v17  ;;  %539 = vmatprep.mubr.bf16.mxu0 %v8351_v3  ;;  %v413_v30 = vld [vmem:[%s6663_s23 + $0x8] sm:$0xff]  ;;  %v5896_v31 = vld [vmem:[%s8338_s1 + $0xa0] ss:$16 sps:$4 sm:$0x3f]   ;;  %v5900_v34 = vld [vmem:[%s8338_s1 + $0x84] ss:$16 sps:$4 sm:$0xff]  }
  0x20   : > { %592 = vmatprep.mubr.bf16.mxu1 %v8351_v3  ;;  %670 = vmatpush1.bf16.msra.mxu0 %v646_v18  ;;  %v5897_v32 = vld [vmem:[%s8338_s1 + $0xa8] ss:$16 sps:$4 sm:$0x3f]   ;;  %v416_v33 = vpack.c.bf16 %v413_v30, %v412_v29  ;;  %v821_v37 = vsel %vm484_vm0, %v5896_v31, 0  ;;  %v5903_v39 = vld [vmem:[%s8338_s1 + $0x8c] ss:$16 sps:$4 sm:$0xff]  }
  0x21   : > { %723 = vmatpush1.bf16.msra.mxu1 %v652_v19  ;;  %671 = vmatprep.subr.bf16.mxu0 %v5888_v20  ;;  %v415_v36 = vld [vmem:[%s6663_s23 + $0x18] sm:$0x1]  ;;  %v827_v38 = vsel %vm484_vm0, %v5897_v32, 0  ;;  %v5898_v40 = vld [vmem:[%s8338_s1 + $0x80] ss:$16 sps:$4 sm:$0xff]   ;;  %vm1949_vm5 = vcmask 1041408  }
  0x22   : > { %724 = vmatprep.subr.bf16.mxu1 %v5891_v23  ;;  %v5901_v41 = vld [vmem:[%s8338_s1 + $0x88] ss:$16 sps:$4 sm:$0xff]   ;;  %v5904_v42 = vld [vmem:[%s8338_s1 + $0xe4] ss:$16 sps:$4 sm:$0x3f]   ;;  %v417_v44 = vpack.c.bf16 %v415_v36, %v414_v35  ;;  %vm1945_vm6 = vcmask 949248  }
  0x23   : > { %v5906_v43 = vld [vmem:[%s8338_s1 + $0xec] ss:$16 sps:$4 sm:$0x3f]   ;;  %v763_v45 = vld [vmem:[%s6663_s23 + $0x2] sm:$0xff]  ;;  %v765_v52 = vld [vmem:[%s6663_s23 + $0x12] sm:$0xff]  ;;  %vm3667_vm7 = vcmask 89088  }
  0x24   : > { %672 = vmatpush1.bf16.msra.mxu0 %v5886_v24  ;;  %v764_v46 = vld [vmem:[%s6663_s23 + $0xa] sm:$0xff]  ;;  %v5912_v50 = vld [vmem:[%s8338_s1 + $0xc4] ss:$16 sps:$4 sm:$0xff]   ;;  %v766_v53 = vld [vmem:[%s6663_s23 + $0x1a] sm:$0x1]  ;;  %vm3881_vm8 = vcmask 752640  }
  0x25   : > { %725 = vmatpush1.bf16.msra.mxu1 %v5889_v25  ;;  %5087 = vmatprep.subr.msk.bf16.mxu0 %vm484_vm0, %v5892_v26  ;;  %v5908_v47 = vld [vmem:[%s8338_s1 + $0xe0] ss:$16 sps:$4 sm:$0x3f]   ;;  %v5909_v48 = vld [vmem:[%s8338_s1 + $0xe8] ss:$16 sps:$4 sm:$0x3f]   ;;  %v767_v49 = vpack.c.bf16 %v764_v46, %v763_v45  ;;  %v768_v58 = vpack.c.bf16 %v766_v53, %v765_v52 }
  0x26   : > { %5090 = vmatprep.subr.msk.bf16.mxu1 %vm484_vm0, %v5894_v27  ;;  %5053 = vmatmul.mubr.msk.bf16.gmra.mxu0 %vm477_vm1, %v431_v28  ;;  %v5915_v51 = vld [vmem:[%s8338_s1 + $0xcc] ss:$16 sps:$4 sm:$0xff]   ;;  %v1012_v54 = vsel %vm484_vm0, %v5908_v47, 0  ;;  %v1018_v55 = vsel %vm484_vm0, %v5909_v48, 0  ;;  %v5910_v56 = vld [vmem:[%s8338_s1 + $0xc0] ss:$16 sps:$4 sm:$0xff]  }
  0x27   : > { %5056 = vmatmul.mubr.msk.bf16.gmra.mxu1 %vm477_vm1, %v431_v28  ;;  %689 = vmatprep.mubr.bf16.mxu0 %v8351_v3  ;;  %v5913_v57 = vld [vmem:[%s8338_s1 + $0xc8] ss:$16 sps:$4 sm:$0xff]   ;;  %vm4180_vm9 = vcmask 818176   ;;  %s404_s17 = sand.u32 1, %s6496_s22   ;;  %s5801_s20 = sshll.u32 %s6595_s25, 4  ;;  %vm4959_vm10 = vcmask 73728  }
  0x28   : > { %742 = vmatprep.mubr.bf16.mxu1 %v8351_v3  ;;  %v954_v59 = vld [vmem:[%s6663_s23 + $0x3] sm:$0xff]  ;;  %v955_v60 = vld [vmem:[%s6663_s23 + $0xb] sm:$0xff]  ;;  %v956_v62 = vld [vmem:[%s6663_s23 + $0x13] sm:$0xff]  ;;  %s405_s26 = scalar_lea.vmem [#allocation2], %s404_s17  ;;  %s8302_s30 = scalar_lea.hbm %s8349_s12, %s5801_s20 }
  0x29   : > { %v958_v61 = vpack.c.bf16 %v955_v60, %v954_v59  ;;  %v957_v63 = vld [vmem:[%s6663_s23 + $0x1b] sm:$0x1]  ;;  %v1145_v48 = vld [vmem:[%s8345_s8] ss:$4 sm:$0xf]  ;;  %v8354_v60 = vmov 65535  }
  0x2a   : > { %v959_v0 = vpack.c.bf16 %v957_v63, %v956_v62  ;;  %s4974_s29 = sshll.u32 %s405_s26, 4  ;;  %s4962_s15 = scalar_lea.sflag [#allocation3], %s404_s17  ;;  %s4975_s29 = int_to_ptr.vmem [resolvable:$true] %s4974_s29 }
  0x2b   : > { %s6444_s16 = scalar_lea.vmem %s4975_s29, 16  ;;  %s6508_s25 = smov [#allocation2]  }
  0x2c   : > { %p6445_p11 = scmp.ne.s32.totalorder %s4975_s29, %s6444_s16  ;;  %s6448_s18 = sshll.u32 %s6508_s25, 4  ;;  %s6449_s18 = int_to_ptr.vmem [resolvable:$false] %s6448_s18 }
  0x2d   : > { %s6450_s19 = scalar_lea.vmem %s6449_s18, 32  ;;  %p6451_p0 = scmp.lt.s32.totalorder %s4975_s29, %s6449_s18 }
  0x2e   : > { %5066 = vmatmul.mubr.msk.bf16.vlgmr.msra.gmra.mxu0 %vm477_vm1, %v416_v33  ;;  %p6446_p12 = pnand %p6445_p11, %p6612_p5  ;;  %p6452_p1 = scmp.lt.s32.totalorder %s6450_s19, %s6444_s16 }
  0x2f   : > { %5069 = vmatmul.mubr.msk.bf16.vlgmr.msra.gmra.mxu1 %vm477_vm1, %v416_v33  ;;  %699 = vmatprep.mubr.bf16.mxu0 %v8351_v3 }
  0x30   : > { %752 = vmatprep.mubr.bf16.mxu1 %v8351_v3  ;;  %845 = vmatpush1.bf16.msra.mxu0 %v821_v37  ;;  %p6447_p13 = pneg %p6446_p12  ;;  %p6453_p2 = por %p6452_p1, %p6451_p0 }
  0x31   : > { %898 = vmatpush1.bf16.msra.mxu1 %v827_v38  ;;  %846 = vmatprep.subr.bf16.mxu0 %v5900_v34  ;;  %v1147_v38 = vlaneseq }
  0x32   : > { %899 = vmatprep.subr.bf16.mxu1 %v5903_v39  ;;  %p6454_p3 = pnand %p6453_p2, %p6447_p13 }
  0x34   : > { %847 = vmatpush1.bf16.msra.mxu0 %v5898_v40 }
  0x35   : > { %900 = vmatpush1.bf16.msra.mxu1 %v5901_v41  ;;  %5109 = vmatprep.subr.msk.bf16.mxu0 %vm484_vm0, %v5904_v42 }
  0x36   : > { %5112 = vmatprep.subr.msk.bf16.mxu1 %vm484_vm0, %v5906_v43  ;;  %5067 = vmatmul.mubr.msk.bf16.gmra.mxu0 %vm477_vm1, %v417_v44  ;;  %v1148_v43 = vshrl.u32 %v1147_v38, 7 }
  0x37   : > { %5070 = vmatmul.mubr.msk.bf16.gmra.mxu1 %vm477_vm1, %v417_v44  ;;  %864 = vmatprep.mubr.bf16.mxu0 %v8351_v3 }
  0x38   : > { %917 = vmatprep.mubr.bf16.mxu1 %v8351_v3  ;;  %v1161_v52 = vsub.s32 3, %v1148_v43 }
  0x3a   : > { %v6884_v38 = vrot.slane %v1145_v48, %v1161_v52 }
  0x3e   : > { %5088 = vmatmul.mubr.msk.bf16.vlgmr.msra.gmra.mxu0 %vm477_vm1, %v767_v49 }
  0x3f   : > { %5091 = vmatmul.mubr.msk.bf16.vlgmr.msra.gmra.mxu1 %vm477_vm1, %v767_v49  ;;  %874 = vmatprep.mubr.bf16.mxu0 %v8351_v3  ;;  %v6854_v49 = vsub.s32 0, %v1148_v43 }
  0x40   : > { %927 = vmatprep.mubr.bf16.mxu1 %v8351_v3  ;;  %1036 = vmatpush1.bf16.msra.mxu0 %v1012_v54 }
  0x41   : > { %1089 = vmatpush1.bf16.msra.mxu1 %v1018_v55  ;;  %1037 = vmatprep.subr.bf16.mxu0 %v5912_v50  ;;  %8370 = vst [vmem:[#allocation7_spill] sm:$0xff] %v6854_v49  ;;  %v1157_v50 = vsub.s32 2, %v1148_v43  ;;  %v5115_v55 = vld [vmem:[%s8345_s8 + $0x1] ss:$4 sm:$0xf]  ;;  %v6873_v59 = vrot.slane %v1145_v48, %v6854_v49 }
  0x42   : > { %1090 = vmatprep.subr.bf16.mxu1 %v5915_v51  ;;  %v6856_v51 = vsub.s32 1, %v1148_v43  ;;  %v6877_v62 = vrot.slane %v5115_v55, %v6854_v49 }
  0x43   : > { %8374 = vst [vmem:[#allocation11_spill] sm:$0xff] %v6873_v59  ;;  %v6879_v63 = vrot.slane %v1145_v48, %v1157_v50 }
  0x44   : > { %1038 = vmatpush1.bf16.msra.mxu0 %v5910_v56  ;;  %8371 = vst [vmem:[#allocation8_spill] sm:$0xff] %v6856_v51  ;;  %v5116_v56 = vld [vmem:[%s8345_s8 + $0x2] ss:$4 sm:$0xf]  ;;  %8375 = vst [vmem:[#allocation12_spill] sm:$0xff] %v6877_v62 }
  0x45   : > { %1091 = vmatpush1.bf16.msra.mxu1 %v5913_v57  ;;  %8376 = vst [vmem:[#allocation13_spill] sm:$0xff] %v6879_v63  ;;  %v6891_v59 = vrot.slane %v5116_v56, %v1157_v50  ;;  %v6897_v62 = vrot.slane %v5116_v56, %v6856_v51  ;;  %v6899_v63 = vrot.slane %v5115_v55, %v1161_v52 }
  0x46   : > { %5089 = vmatmul.mubr.msk.bf16.gmra.mxu0 %vm477_vm1, %v768_v58 }
  0x47   : > { %5092 = vmatmul.mubr.msk.bf16.gmra.mxu1 %vm477_vm1, %v768_v58  ;;  %1055 = vmatprep.mubr.bf16.mxu0 %v8351_v3  ;;  %8380 = vst [vmem:[#allocation17_spill] sm:$0xff] %v6891_v59 }
  0x48   : > { %1108 = vmatprep.mubr.bf16.mxu1 %v8351_v3 }
  0x4e   : > { %5110 = vmatmul.mubr.msk.bf16.vlgmr.msra.gmra.mxu0 %vm477_vm1, %v958_v61 }
  0x4f   : > { %5113 = vmatmul.mubr.msk.bf16.vlgmr.msra.gmra.mxu1 %vm477_vm1, %v958_v61  ;;  %1065 = vmatprep.mubr.bf16.mxu0 %v8351_v3  ;;  %v1298_v61 = vsel %vm1296_vm2, 4294967295, %v8354_v60  ;;  %v6894_v60 = vrot.slane %v5115_v55, %v6856_v51 }
  0x50   : > { %1118 = vmatprep.mubr.bf16.mxu1 %v8351_v3 }
  0x51   : > { %8381 = vst [vmem:[#allocation18_spill] sm:$0xff] %v6894_v60 }
  0x56   : > { %5111 = vmatmul.mubr.msk.bf16.gmra.mxu0 %vm477_vm1, %v959_v0 }
  0x57   : > { %5114 = vmatmul.mubr.msk.bf16.gmra.mxu1 %vm477_vm1, %v959_v0  ;;  %1344 = vmatprep.mubr.bf16.mxu0 %v8351_v3  ;;  %v6882_v0 = vrot.slane %v1145_v48, %v6856_v51  ;;  %v6904_v48 = vsel %vm1297_vm3, %v1298_v61, 0 }
  0x58   : > { %1387 = vmatprep.mubr.bf16.mxu1 %v8351_v3  ;;  %v6887_v3 = vrot.slane %v5116_v56, %v6854_v49 }
  0x59   : > { %8377 = vst [vmem:[#allocation14_spill] sm:$0xff] %v6882_v0  ;;  %v6901_v0 = vrot.slane %v5116_v56, %v1161_v52 }
  0x5a   : > { %8378 = vst [vmem:[#allocation15_spill] sm:$0xff] %v6887_v3 }
  0xde   : > { %v6791_v1 = vpop.f32.mrf.mxu0 }
  0xdf   : > { %v6793_v2 = vpop.f32.mrf.mxu1 }
  0xe0   : > { %v6795_v4 = vpop.f32.mrf.mxu0 }
  0xe1   : > { %v6797_v5 = vpop.f32.mrf.mxu1 }
  0xe2   : > { %v6799_v6 = vpop.f32.mrf.mxu0 }
  0xe3   : > { %v6801_v7 = vpop.f32.mrf.mxu1 }
  0xe4   : > { %v6803_v8 = vpop.f32.mrf.mxu0 }
  0xe5   : > { %v6805_v9 = vpop.f32.mrf.mxu1 }
  0xe6   : > { %v6807_v10 = vpop.f32.mrf.mxu0 }
  0xe7   : > { %v6809_v11 = vpop.f32.mrf.mxu1 }
  0xe8   : > { %v6811_v12 = vpop.f32.mrf.mxu0 }
  0xe9   : > { %v6813_v13 = vpop.f32.mrf.mxu1 }
  0xea   : > { %v6815_v14 = vpop.f32.mrf.mxu0 }
  0xeb   : > { %v6817_v15 = vpop.f32.mrf.mxu1 }
  0xec   : > { %v6819_v16 = vpop.f32.mrf.mxu0 }
  0xed   : > { %v6821_v17 = vpop.f32.mrf.mxu1 }
  0xee   : > { %v691_v18 = vpop.f32.mrf.mxu0 }
  0xef   : > { %v744_v19 = vpop.f32.mrf.mxu1  ;;  %v692_v49 = vadd.f32 %v691_v18, %v6791_v1 }
  0xf0   : > { %v693_v20 = vpop.f32.mrf.mxu0  ;;  %v745_v3 = vadd.f32 %v744_v19, %v6793_v2 }
  0xf1   : > { %v746_v21 = vpop.f32.mrf.mxu1 }
  0xf2   : > { %v695_v22 = vpop.f32.mrf.mxu0  ;;  %v747_v59 = vadd.f32 %v746_v21, %v6797_v5 }
  0xf3   : > { %v748_v23 = vpop.f32.mrf.mxu1  ;;  %v696_v51 = vadd.f32 %v695_v22, %v6799_v6 }
  0xf4   : > { %v697_v24 = vpop.f32.mrf.mxu0 }
  0xf5   : > { %v750_v25 = vpop.f32.mrf.mxu1  ;;  %v698_v52 = vadd.f32 %v697_v24, %v6803_v8 }
  0xf6   : > { %v701_v26 = vpop.f32.mrf.mxu0  ;;  %v751_v56 = vadd.f32 %v750_v25, %v6805_v9 }
  0xf7   : > { %v754_v27 = vpop.f32.mrf.mxu1  ;;  %v702_v61 = vadd.f32 %v701_v26, %v6807_v10 }
  0xf8   : > { %v6823_v28 = vpop.f32.mrf.mxu0  ;;  %v755_v1 = vadd.f32 %v754_v27, %v6809_v11 }
  0xf9   : > { %v6825_v29 = vpop.f32.mrf.mxu1  ;;  %v704_v5 = vadd.f32 %v6823_v28, %v6811_v12 }
  0xfa   : > { %v6827_v30 = vpop.f32.mrf.mxu0  ;;  %v757_v6 = vadd.f32 %v6825_v29, %v6813_v13 }
  0xfb   : > { %v6829_v31 = vpop.f32.mrf.mxu1 }
  0xfc   : > { %v6831_v32 = vpop.f32.mrf.mxu0  ;;  %v759_v8 = vadd.f32 %v6829_v31, %v6817_v15 }
  0xfd   : > { %v6833_v33 = vpop.f32.mrf.mxu1  ;;  %v708_v22 = vadd.f32 %v6831_v32, %v6819_v16  ;;  %v8382_v32 = vld [vmem:[#allocation11_spill] sm:$0xff] }
  0xfe   : > { %v866_v34 = vpop.f32.mrf.mxu0  ;;  %v761_v12 = vadd.f32 %v6833_v33, %v6821_v17 }
  0xff   : > { %v919_v35 = vpop.f32.mrf.mxu1  ;;  %v938_v18 = vadd.f32 %v866_v34, %v692_v49  ;;  %v8383_v34 = vld [vmem:[#allocation13_spill] sm:$0xff]  ;;  %v8386_v49 = vld [vmem:[#allocation14_spill] sm:$0xff] }
 0x100   : > { %v868_v36 = vpop.f32.mrf.mxu0  ;;  %v940_v2 = vadd.f32 %v919_v35, %v745_v3 }
 0x101   : > { %v921_v37 = vpop.f32.mrf.mxu1 }
 0x102   : > { %v6835_v39 = vpop.f32.mrf.mxu0  ;;  %v941_v10 = vadd.f32 %v921_v37, %v747_v59 }
 0x103   : > { %v6837_v40 = vpop.f32.mrf.mxu1  ;;  %v942_v13 = vadd.f32 %v6835_v39, %v696_v51 }
 0x104   : > { %v6839_v41 = vpop.f32.mrf.mxu0 }
 0x105   : > { %v6841_v42 = vpop.f32.mrf.mxu1 }
 0x106   : > { %v6843_v44 = vpop.f32.mrf.mxu0  ;;  %v945_v15 = vadd.f32 %v6841_v42, %v751_v56 }
 0x107   : > { %v6845_v45 = vpop.f32.mrf.mxu1  ;;  %v946_v28 = vadd.f32 %v6843_v44, %v702_v61 }
 0x108   : > { %v6847_v46 = vpop.f32.mrf.mxu0  ;;  %v948_v29 = vadd.f32 %v6845_v45, %v755_v1 }
 0x109   : > { %v6849_v47 = vpop.f32.mrf.mxu1  ;;  %v947_v16 = vadd.f32 %v6847_v46, %v704_v5 }
 0x10a   : > { %v6858_v53 = vpop.f32.mrf.mxu0  ;;  %v949_v17 = vadd.f32 %v6849_v47, %v757_v6 }
 0x10b   : > { %v6860_v54 = vpop.f32.mrf.mxu1 }
 0x10c   : > { %v6868_v57 = vpop.f32.mrf.mxu0  ;;  %v952_v31 = vadd.f32 %v6860_v54, %v759_v8 }
 0x10d   : > { %8372 = vst [vmem:[#allocation9_spill] sm:$0xff] %v6868_v57  ;;  %v6870_v58 = vpop.f32.mrf.mxu1  ;;  %v6889_v57 = vrot.slane %v5115_v55, %v1157_v50  ;;  %v694_v50 = vadd.f32 %v693_v20, %v6795_v4  ;;  %v749_v55 = vadd.f32 %v748_v23, %v6801_v7  ;;  %v706_v7 = vadd.f32 %v6827_v30, %v6815_v14 }
 0x10e   : > { %8373 = vst [vmem:[#allocation10_spill] sm:$0xff] %v6870_v58  ;;  %v1057_v43 = vpop.f32.mrf.mxu0  ;;  %v943_v14 = vadd.f32 %v6839_v41, %v698_v52 }
 0x10f   : > { %v1110_v58 = vpop.f32.mrf.mxu1  ;;  %8379 = vst [vmem:[#allocation16_spill] sm:$0xff] %v6889_v57  ;;  %v939_v9 = vadd.f32 %v868_v36, %v694_v50  ;;  %v1129_v20 = vadd.f32 %v1057_v43, %v938_v18  ;;  %v944_v23 = vadd.f32 %v6837_v40, %v749_v55  ;;  %v950_v30 = vadd.f32 %v6858_v53, %v706_v7 }
 0x110   : > { %v1059_v57 = vpop.f32.mrf.mxu0  ;;  %v1131_v11 = vadd.f32 %v1110_v58, %v940_v2 }
 0x111   : > { %v1112_v60 = vpop.f32.mrf.mxu1  ;;  %v1130_v24 = vadd.f32 %v1059_v57, %v939_v9  ;;  %v6939_v33 = vadd.f32 %v8382_v32, %v1129_v20 }
 0x112   : > { %v1061_v19 = vpop.f32.mrf.mxu0  ;;  %v1132_v25 = vadd.f32 %v1112_v60, %v941_v10  ;;  %v6942_v35 = vadd.f32 %v8383_v34, %v1131_v11 }
 0x113   : > { %v1114_v4 = vpop.f32.mrf.mxu1  ;;  %v1168_v51 = vadd.f32 %v8386_v49, %v1130_v24  ;;  %v1183_v50 = vmax.f32 %v6939_v33, 0.0  ;;  %v1133_v52 = vadd.f32 %v1061_v19, %v942_v13 }
 0x114   : > { %v1063_v21 = vpop.f32.mrf.mxu0  ;;  %v8384_v44 = vld [vmem:[#allocation9_spill] sm:$0xff]  ;;  %v1170_v53 = vadd.f32 %v6884_v38, %v1132_v25  ;;  %v1185_v55 = vmax.f32 %v6942_v35, 0.0  ;;  %v1135_v56 = vadd.f32 %v1114_v4, %v944_v23 }
 0x115   : > { %v1116_v3 = vpop.f32.mrf.mxu1  ;;  %v1134_v39 = vadd.f32 %v1063_v21, %v943_v14  ;;  %v951_v45 = vadd.f32 %v8384_v44, %v708_v22  ;;  %v8385_v46 = vld [vmem:[#allocation10_spill] sm:$0xff]  ;;  %v1184_v7 = vmax.f32 %v1168_v51, 0.0  ;;  %v1171_v13 = vadd.f32 %v8382_v32, %v1133_v52  ;;  %v8391_v44 = vld [vmem:[#allocation17_spill] sm:$0xff] }
 0x116   : > { %v1067_v26 = vpop.f32.mrf.mxu0  ;;  %v1136_v40 = vadd.f32 %v1116_v3, %v945_v15  ;;  %v953_v47 = vadd.f32 %v8385_v46, %v761_v12  ;;  %v1186_v8 = vmax.f32 %v1170_v53, 0.0  ;;  %v1173_v23 = vadd.f32 %v8383_v34, %v1135_v56 }
 0x117   : > { %v1120_v27 = vpop.f32.mrf.mxu1  ;;  %v1137_v41 = vadd.f32 %v1067_v26, %v946_v28  ;;  %v1172_v61 = vadd.f32 %v8386_v49, %v1134_v39  ;;  %v8387_v28 = vld [vmem:[#allocation12_spill] sm:$0xff] }
 0x118   : > { %v1069_v36 = vpop.f32.mrf.mxu0  ;;  %v1139_v42 = vadd.f32 %v1120_v27, %v948_v29  ;;  %v1174_v1 = vadd.f32 %v6884_v38, %v1136_v40  ;;  %v1189_v39 = vmax.f32 %v1173_v23, 0.0  ;;  %v1225_v51 = vmul.f32 %v6899_v63, %v1186_v8  ;;  %v5917_v23 = vld [vmem:[%s8339_s2 + $0x8] sm:$0x3f]  }
 0x119   : > { %v1122_v37 = vpop.f32.mrf.mxu1  ;;  %v1175_v58 = vadd.f32 %v8382_v32, %v1137_v41  ;;  %v1138_v60 = vadd.f32 %v1069_v36, %v947_v16  ;;  %v1188_v14 = vmax.f32 %v1172_v61, 0.0  ;;  %v8388_v16 = vld [vmem:[#allocation16_spill] sm:$0xff]  ;;  %v8390_v41 = vld [vmem:[#allocation15_spill] sm:$0xff] }
 0x11a   : > { %v1071_v54 = vpop.f32.mrf.mxu0  ;;  %v1177_v59 = vadd.f32 %v8383_v34, %v1139_v42  ;;  %v1140_v43 = vadd.f32 %v1122_v37, %v949_v17  ;;  %v1190_v15 = vmax.f32 %v1174_v1, 0.0  ;;  %v1187_v37 = vmax.f32 %v1171_v13, 0.0 }
 0x11b   : > { %v1124_v57 = vpop.f32.mrf.mxu1  ;;  %v1176_v18 = vadd.f32 %v8386_v49, %v1138_v60  ;;  %v1141_v9 = vadd.f32 %v1071_v54, %v950_v30  ;;  %v1191_v20 = vmax.f32 %v1175_v58, 0.0  ;;  %v8389_v30 = vld [vmem:[#allocation18_spill] sm:$0xff]  ;;  %v1228_v52 = vmul.f32 %v8388_v16, %v1189_v39 }
 0x11c   : > { %v1178_v2 = vadd.f32 %v6884_v38, %v1140_v43  ;;  %v1073_v5 = vpop.f32.mrf.mxu0  ;;  %v1143_v10 = vadd.f32 %v1124_v57, %v952_v31  ;;  %v1193_v11 = vmax.f32 %v1177_v59, 0.0  ;;  %v1227_v40 = vmul.f32 %v8389_v30, %v1188_v14  ;;  %v5918_v14 = vld [vmem:[%s8340_s3 + $0x268] ss:$8 sps:$4 sm:$0xff]   ;;  %v5950_v39 = vld [vmem:[%s8340_s3 + $0x21c] ss:$8 sps:$4 sm:$0xff]  }
 0x11d   : > { %v1126_v6 = vpop.f32.mrf.mxu1  ;;  %v1192_v21 = vmax.f32 %v1176_v18, 0.0  ;;  %v1179_v19 = vadd.f32 %v8382_v32, %v1141_v9  ;;  %v1142_v22 = vadd.f32 %v1073_v5, %v951_v45  ;;  %v1230_v29 = vmul.f32 %v8387_v28, %v1191_v20 }
 0x11e   : > { %v1194_v3 = vmax.f32 %v1178_v2, 0.0  ;;  %v1181_v4 = vadd.f32 %v8383_v34, %v1143_v10  ;;  %v1144_v12 = vadd.f32 %v1126_v6, %v953_v47  ;;  %v1232_v17 = vmul.f32 %v8388_v16, %v1193_v11 }
 0x11f   : > { %v1195_v24 = vmax.f32 %v1179_v19, 0.0  ;;  %v1180_v26 = vadd.f32 %v8386_v49, %v1142_v22  ;;  %v1231_v31 = vmul.f32 %v8389_v30, %v1192_v21  ;;  %v1223_v49 = vmul.f32 %v8389_v30, %v1184_v7  ;;  %v5920_v22 = vld [vmem:[%s8340_s3 + $0x26c] ss:$8 sps:$4 sm:$0xff]  }
 0x120   : > { %v1197_v25 = vmax.f32 %v1181_v4, 0.0  ;;  %v1182_v27 = vadd.f32 %v6884_v38, %v1144_v12  ;;  %v1233_v33 = vmul.f32 %v6899_v63, %v1194_v3  ;;  %v1229_v38 = vmul.f32 %v6899_v63, %v1190_v15  ;;  %v5916_v4 = vld [vmem:[%s8339_s2] sm:$0x3f]   ;;  %v5923_v12 = vld [vmem:[%s8340_s3 + $0x36c] ss:$8 sps:$4 sm:$0xff]  }
 0x121   : > { %v1234_v32 = vmul.f32 %v8387_v28, %v1195_v24  ;;  %v1196_v35 = vmax.f32 %v1180_v26, 0.0  ;;  %v1269_v53 = vadd.f32 %v8390_v41, %v1230_v29  ;;  %v1271_v54 = vadd.f32 %v8391_v44, %v1232_v17  ;;  %v5921_v15 = vld [vmem:[%s8340_s3 + $0x368] ss:$8 sps:$4 sm:$0xff]   ;;  %v5926_v24 = vld [vmem:[%s8340_s3 + $0x25c] ss:$8 sps:$4 sm:$0xff]  }
 0x122   : > { %v1236_v34 = vmul.f32 %v8388_v16, %v1197_v25  ;;  %v1198_v36 = vmax.f32 %v1182_v27, 0.0  ;;  %v1270_v57 = vadd.f32 %v6897_v62, %v1231_v31  ;;  %v1272_v58 = vadd.f32 %v6901_v0, %v1233_v33  ;;  %v5929_v25 = vld [vmem:[%s8340_s3 + $0x35c] ss:$8 sps:$4 sm:$0xff]   ;;  %v5924_v26 = vld [vmem:[%s8340_s3 + $0x258] ss:$8 sps:$4 sm:$0xff]  }
 0x123   : > { %v1273_v42 = vadd.f32 %v8390_v41, %v1234_v32  ;;  %v1235_v46 = vmul.f32 %v8389_v30, %v1196_v35  ;;  %v1226_v43 = vmul.f32 %v8387_v28, %v1187_v37  ;;  %v1268_v1 = vadd.f32 %v6901_v0, %v1229_v38  ;;  %v5927_v27 = vld [vmem:[%s8340_s3 + $0x358] ss:$8 sps:$4 sm:$0xff]   ;;  %v5935_v29 = vld [vmem:[%s8340_s3 + $0x34c] ss:$8 sps:$4 sm:$0xff]   ;;  %v5933_v17 = vld [vmem:[%s8340_s3 + $0x348] ss:$8 sps:$4 sm:$0xff]  }
 0x124   : > { %v1275_v45 = vadd.f32 %v8391_v44, %v1236_v34  ;;  %v1237_v47 = vmul.f32 %v6899_v63, %v1198_v36  ;;  %v1266_v63 = vadd.f32 %v6897_v62, %v1227_v40  ;;  %v1222_v5 = vmul.f32 %v8387_v28, %v1183_v50  ;;  %v5932_v28 = vld [vmem:[%s8340_s3 + $0x24c] ss:$8 sps:$4 sm:$0xff]   ;;  %v5938_v30 = vld [vmem:[%s8340_s3 + $0x23c] ss:$8 sps:$4 sm:$0xff]   ;;  %v5936_v33 = vld [vmem:[%s8340_s3 + $0x238] ss:$8 sps:$4 sm:$0xff]  }
 0x125   : > { %v1274_v59 = vadd.f32 %v6897_v62, %v1235_v46  ;;  %v1281_v56 = vpack.c.bf16 %v1273_v42, %v1269_v53  ;;  %v1224_v6 = vmul.f32 %v8388_v16, %v1185_v55  ;;  %v1262_v7 = vadd.f32 %v6897_v62, %v1223_v49  ;;  %v5930_v16 = vld [vmem:[%s8340_s3 + $0x248] ss:$8 sps:$4 sm:$0xff]   ;;  %v5941_v31 = vld [vmem:[%s8340_s3 + $0x33c] ss:$8 sps:$4 sm:$0xff]   ;;  %v5939_v32 = vld [vmem:[%s8340_s3 + $0x338] ss:$8 sps:$4 sm:$0xff]  }
 0x126   : > { %v1276_v60 = vadd.f32 %v6901_v0, %v1237_v47  ;;  %v1283_v61 = vpack.c.bf16 %v1275_v45, %v1271_v54  ;;  %v1264_v8 = vadd.f32 %v6901_v0, %v1225_v51  ;;  %v1265_v20 = vadd.f32 %v8390_v41, %v1226_v43  ;;  %v5944_v34 = vld [vmem:[%s8340_s3 + $0x22c] ss:$8 sps:$4 sm:$0xff]   ;;  %v5942_v36 = vld [vmem:[%s8340_s3 + $0x228] ss:$8 sps:$4 sm:$0xff]   ;;  %v5953_v40 = vld [vmem:[%s8340_s3 + $0x31c] ss:$8 sps:$4 sm:$0xff]  }
 0x127   : > { %v1282_v18 = vpack.c.bf16 %v1274_v59, %v1270_v57  ;;  %v1267_v11 = vadd.f32 %v8391_v44, %v1228_v52  ;;  %v6999_v21 = vand.u32 %v6904_v48, %v1281_v56  ;;  %v7006_v62 = vpack.c.bf16 %v1266_v63, %v1262_v7  ;;  %v5947_v35 = vld [vmem:[%s8340_s3 + $0x32c] ss:$8 sps:$4 sm:$0xff]   ;;  %v5945_v37 = vld [vmem:[%s8340_s3 + $0x328] ss:$8 sps:$4 sm:$0xff]   ;;  %v5948_v38 = vld [vmem:[%s8340_s3 + $0x218] ss:$8 sps:$4 sm:$0xff]  }
 0x128   : > { %v1284_v2 = vpack.c.bf16 %v1276_v60, %v1272_v58  ;;  %v7002_v50 = vand.u32 %v6904_v48, %v1283_v61  ;;  %v7008_v0 = vpack.c.bf16 %v1268_v1, %v1264_v8  ;;  %v1261_v55 = vadd.f32 %v8390_v41, %v1222_v5  ;;  %v5951_v41 = vld [vmem:[%s8340_s3 + $0x318] ss:$8 sps:$4 sm:$0xff]   ;;  %v5956_v42 = vld [vmem:[%s8340_s3 + $0x20c] ss:$8 sps:$4 sm:$0xff]   ;;  %v5954_v45 = vld [vmem:[%s8340_s3 + $0x208] ss:$8 sps:$4 sm:$0xff]  }
 0x129   : > { %v6991_v9 = vand.u32 %v6904_v48, %v1282_v18  ;;  %v1263_v3 = vadd.f32 %v8391_v44, %v1224_v6  ;;  %v8392_v13 = vmov 0   ;;  %v5959_v44 = vld [vmem:[%s8340_s3 + $0x30c] ss:$8 sps:$4 sm:$0xff]   ;;  %v5957_v46 = vld [vmem:[%s8340_s3 + $0x308] ss:$8 sps:$4 sm:$0xff]  }
 0x12a   : > { %v6994_v10 = vand.u32 %v6904_v48, %v1284_v2  ;;  %v7016_v48 = vpack.c.bf16 %v1265_v20, %v1261_v55  ;;  %v5962_v47 = vld [vmem:[%s8340_s3 + $0x1fc] ss:$8 sps:$4 sm:$0xff]   ;;  %v5187_v51 = vld [vmem:[%s8340_s3 + $0x3e8] sm:$0x33]  ;;  %v5960_v53 = vld [vmem:[%s8340_s3 + $0x1f8] ss:$8 sps:$4 sm:$0xff]  }
 0x12b   : > { %1324 = vmatprep.subr.bf16.mxu0 %v6991_v9  ;;  %v7018_v19 = vpack.c.bf16 %v1267_v11, %v1263_v3  ;;  %v5965_v49 = vld [vmem:[%s8340_s3 + $0x2fc] ss:$8 sps:$4 sm:$0xff]   ;;  %v5963_v54 = vld [vmem:[%s8340_s3 + $0x2f8] ss:$8 sps:$4 sm:$0xff]   ;;  %v5968_v57 = vld [vmem:[%s8340_s3 + $0x2ec] ss:$8 sps:$4 sm:$0xff]   ;;  %v5251_v58 = vcombine.high %v5187_v51, %v5187_v51  ;;  %v5250_v59 = vcombine.low %v5187_v51, %v5187_v51 }
 0x12c   : > { %1367 = vmatprep.subr.bf16.mxu1 %v6994_v10  ;;  %1325 = vmatpush1.bf16.msra.mxu0 %v6999_v21  ;;  %v5966_v60 = vld [vmem:[%s8340_s3 + $0x2e8] ss:$8 sps:$4 sm:$0xff]   ;;  %v5973_v52 = vld [vmem:[%s8340_s3 + $0x2dc] ss:$8 sps:$4 sm:$0xff]   ;;  %v5971_v61 = vld [vmem:[%s8340_s3 + $0x2d8] ss:$8 sps:$4 sm:$0xff]  }
 0x12d   : > { %1368 = vmatpush1.bf16.msra.mxu1 %v7002_v50  ;;  %1326 = vmatprep.subr.bf16.mxu0 %v7006_v62  ;;  %v1951_v43 = vsel %vm1949_vm5, %v5250_v59, 0  ;;  %v5976_v56 = vld [vmem:[%s8340_s3 + $0x3dc] ss:$8 sps:$4 sm:$0xff]   ;;  %v5974_v63 = vld [vmem:[%s8340_s3 + $0x3d8] ss:$8 sps:$4 sm:$0xff]  }
 0x12e   : > { %1369 = vmatprep.subr.bf16.mxu1 %v7008_v0  ;;  %v5979_v1 = vld [vmem:[%s8340_s3 + $0x2cc] ss:$8 sps:$4 sm:$0xff]   ;;  %v5977_v2 = vld [vmem:[%s8340_s3 + $0x2c8] ss:$8 sps:$4 sm:$0xff]   ;;  %v5985_v6 = vld [vmem:[%s8340_s3 + $0x2bc] ss:$8 sps:$4 sm:$0xff]  }
 0x12f   : > { %v5982_v18 = vld [vmem:[%s8340_s3 + $0x3cc] ss:$8 sps:$4 sm:$0xff]   ;;  %v5980_v5 = vld [vmem:[%s8340_s3 + $0x3c8] ss:$8 sps:$4 sm:$0xff]   ;;  %v5988_v7 = vld [vmem:[%s8340_s3 + $0x3bc] ss:$8 sps:$4 sm:$0xff]  }
 0x130   : > { %1327 = vmatpush1.bf16.msra.mxu0 %v7016_v48  ;;  %v5983_v8 = vld [vmem:[%s8340_s3 + $0x2b8] ss:$8 sps:$4 sm:$0xff]   ;;  %v5989_v11 = vld [vmem:[%s8340_s3 + $0x2a8] ss:$8 sps:$4 sm:$0xff]   ;;  %v5991_v55 = vld [vmem:[%s8340_s3 + $0x2ac] ss:$8 sps:$4 sm:$0xff]  }
 0x131   : > { %1370 = vmatpush1.bf16.msra.mxu1 %v7018_v19  ;;  %1488 = vmatprep.subr.bf16.mxu0 %v6991_v9  ;;  %v5986_v20 = vld [vmem:[%s8340_s3 + $0x3b8] ss:$8 sps:$4 sm:$0xff]   ;;  %v5992_v3 = vld [vmem:[%s8340_s3 + $0x3a8] ss:$8 sps:$4 sm:$0xff]  }
 0x132   : > { %1531 = vmatprep.subr.bf16.mxu1 %v6994_v10 }
 0x133   : > { %5118 = vmatmul.mubr.msk.bf16.vlgmr.msra.gmra.mxu0 %vm1292_vm4, %v5916_v4 }
 0x134   : > { %5119 = vmatmul.mubr.msk.bf16.vlgmr.msra.gmra.mxu1 %vm1292_vm4, %v5916_v4  ;;  %1489 = vmatpush1.bf16.msra.mxu0 %v6999_v21  ;;  %v5994_v4 = vld [vmem:[%s8340_s3 + $0x3ac] ss:$8 sps:$4 sm:$0xff]  }
 0x135   : > { %1532 = vmatpush1.bf16.msra.mxu1 %v7002_v50  ;;  %1490 = vmatprep.subr.bf16.mxu0 %v7006_v62 }
 0x136   : > { %1533 = vmatprep.subr.bf16.mxu1 %v7008_v0  ;;  %1508 = vmatprep.mubr.bf16.mxu0 %v8392_v13 }
 0x137   : > { %1551 = vmatprep.mubr.bf16.mxu1 %v8392_v13 }
 0x138   : > { %1491 = vmatpush1.bf16.msra.mxu0 %v7016_v48 }
 0x139   : > { %1534 = vmatpush1.bf16.msra.mxu1 %v7018_v19  ;;  %1956 = vmatprep.subr.bf16.mxu0 %v5920_v22  ;;  %v5995_v22 = vld [vmem:[%s8340_s3 + $0x298] ss:$8 sps:$4 sm:$0xff]  }
 0x13a   : > { %1999 = vmatprep.subr.bf16.mxu1 %v5923_v12  ;;  %v5997_v12 = vld [vmem:[%s8340_s3 + $0x29c] ss:$8 sps:$4 sm:$0xff]  }
 0x13b   : > { %5123 = vmatmul.mubr.msk.bf16.vlgmr.msra.gmra.mxu0 %vm1292_vm4, %v5917_v23 }
 0x13c   : > { %5124 = vmatmul.mubr.msk.bf16.vlgmr.msra.gmra.mxu1 %vm1292_vm4, %v5917_v23  ;;  %1957 = vmatpush1.bf16.msra.mxu0 %v5918_v14  ;;  %v5998_v23 = vld [vmem:[%s8340_s3 + $0x398] ss:$8 sps:$4 sm:$0xff]   ;;  %v6000_v14 = vld [vmem:[%s8340_s3 + $0x39c] ss:$8 sps:$4 sm:$0xff]  }
 0x13d   : > { %2000 = vmatpush1.bf16.msra.mxu1 %v5921_v15  ;;  %1958 = vmatprep.subr.bf16.mxu0 %v5926_v24  ;;  %v6001_v15 = vld [vmem:[%s8340_s3 + $0x288] ss:$8 sps:$4 sm:$0xff]   ;;  %v6003_v24 = vld [vmem:[%s8340_s3 + $0x28c] ss:$8 sps:$4 sm:$0xff]  }
 0x13e   : > { %2001 = vmatprep.subr.bf16.mxu1 %v5929_v25  ;;  %v6004_v25 = vld [vmem:[%s8340_s3 + $0x388] ss:$8 sps:$4 sm:$0xff]  }
 0x140   : > { %1959 = vmatpush1.bf16.msra.mxu0 %v5924_v26  ;;  %v6006_v26 = vld [vmem:[%s8340_s3 + $0x38c] ss:$8 sps:$4 sm:$0xff]  }
 0x141   : > { %2002 = vmatpush1.bf16.msra.mxu1 %v5927_v27  ;;  %1960 = vmatprep.subr.bf16.mxu0 %v5932_v28  ;;  %v6007_v27 = vld [vmem:[%s8340_s3 + $0x278] ss:$8 sps:$4 sm:$0xff]   ;;  %v6009_v28 = vld [vmem:[%s8340_s3 + $0x27c] ss:$8 sps:$4 sm:$0xff]  }
 0x142   : > { %2003 = vmatprep.subr.bf16.mxu1 %v5935_v29  ;;  %v6010_v29 = vld [vmem:[%s8340_s3 + $0x378] ss:$8 sps:$4 sm:$0xff]  }
 0x144   : > { %1961 = vmatpush1.bf16.msra.mxu0 %v5930_v16  ;;  %v6012_v16 = vld [vmem:[%s8340_s3 + $0x37c] ss:$8 sps:$4 sm:$0xff]  }
 0x145   : > { %2004 = vmatpush1.bf16.msra.mxu1 %v5933_v17  ;;  %1962 = vmatprep.subr.bf16.mxu0 %v5938_v30  ;;  %v6015_v17 = vld [vmem:[%s8340_s3 + $0x74] ss:$8 sps:$4 sm:$0xff]  }
 0x146   : > { %2005 = vmatprep.subr.bf16.mxu1 %v5941_v31  ;;  %v6018_v30 = vld [vmem:[%s8340_s3 + $0x174] ss:$8 sps:$4 sm:$0xff]  }
 0x148   : > { %1963 = vmatpush1.bf16.msra.mxu0 %v5936_v33 }
 0x149   : > { %2006 = vmatpush1.bf16.msra.mxu1 %v5939_v32  ;;  %1964 = vmatprep.subr.bf16.mxu0 %v5944_v34 }
 0x14a   : > { %2007 = vmatprep.subr.bf16.mxu1 %v5947_v35 }
 0x14c   : > { %1965 = vmatpush1.bf16.msra.mxu0 %v5942_v36 }
 0x14d   : > { %2008 = vmatpush1.bf16.msra.mxu1 %v5945_v37  ;;  %1966 = vmatprep.subr.bf16.mxu0 %v5950_v39 }
 0x14e   : > { %2009 = vmatprep.subr.bf16.mxu1 %v5953_v40 }
 0x150   : > { %1967 = vmatpush1.bf16.msra.mxu0 %v5948_v38 }
 0x151   : > { %2010 = vmatpush1.bf16.msra.mxu1 %v5951_v41  ;;  %1968 = vmatprep.subr.bf16.mxu0 %v5956_v42 }
 0x152   : > { %2011 = vmatprep.subr.bf16.mxu1 %v5959_v44 }
 0x154   : > { %1969 = vmatpush1.bf16.msra.mxu0 %v5954_v45 }
 0x155   : > { %2012 = vmatpush1.bf16.msra.mxu1 %v5957_v46  ;;  %1970 = vmatprep.subr.bf16.mxu0 %v5962_v47 }
 0x156   : > { %2013 = vmatprep.subr.bf16.mxu1 %v5965_v49 }
 0x158   : > { %1971 = vmatpush1.bf16.msra.mxu0 %v5960_v53 }
 0x159   : > { %2014 = vmatpush1.bf16.msra.mxu1 %v5963_v54  ;;  %1972 = vmatprep.subr.bf16.mxu0 %v5968_v57  ;;  %v6013_v57 = vld [vmem:[%s8340_s3 + $0x70] ss:$8 sps:$4 sm:$0xff]  }
 0x15a   : > { %5252 = vmatprep.subr.msk.bf16.mxu1 %vm1949_vm5, %v5251_v58  ;;  %v6016_v58 = vld [vmem:[%s8340_s3 + $0x170] ss:$8 sps:$4 sm:$0xff]  }
 0x15c   : > { %1973 = vmatpush2.bf16.msra.mxu0 %v5966_v60 }
 0x15d   : > { %2016 = vmatpush2.bf16.msra.mxu1 %v1951_v43  ;;  %1974 = vmatprep.subr.bf16.mxu0 %v5973_v52  ;;  %v6021_v43 = vld [vmem:[%s8340_s3 + $0x64] ss:$8 sps:$4 sm:$0xff]  }
 0x15e   : > { %2017 = vmatprep.subr.bf16.mxu1 %v5976_v56  ;;  %v6024_v52 = vld [vmem:[%s8340_s3 + $0x164] ss:$8 sps:$4 sm:$0xff]  }
 0x160   : > { %1975 = vmatpush2.bf16.msra.mxu0 %v5971_v61 }
 0x161   : > { %2018 = vmatpush2.bf16.msra.mxu1 %v5974_v63  ;;  %1976 = vmatprep.subr.bf16.mxu0 %v5979_v1  ;;  %v6019_v63 = vld [vmem:[%s8340_s3 + $0x60] ss:$8 sps:$4 sm:$0xff]  }
 0x162   : > { %2019 = vmatprep.subr.bf16.mxu1 %v5982_v18  ;;  %v6022_v1 = vld [vmem:[%s8340_s3 + $0x160] ss:$8 sps:$4 sm:$0xff]   ;;  %v6027_v18 = vld [vmem:[%s8340_s3 + $0x54] ss:$8 sps:$4 sm:$0xff]  }
 0x164   : > { %1977 = vmatpush2.bf16.msra.mxu0 %v5977_v2  ;;  %v6030_v2 = vld [vmem:[%s8340_s3 + $0x154] ss:$8 sps:$4 sm:$0xff]  }
 0x165   : > { %2020 = vmatpush2.bf16.msra.mxu1 %v5980_v5  ;;  %1978 = vmatprep.subr.bf16.mxu0 %v5985_v6  ;;  %v6025_v5 = vld [vmem:[%s8340_s3 + $0x50] ss:$8 sps:$4 sm:$0xff]  }
 0x166   : > { %2021 = vmatprep.subr.bf16.mxu1 %v5988_v7  ;;  %v6028_v6 = vld [vmem:[%s8340_s3 + $0x150] ss:$8 sps:$4 sm:$0xff]   ;;  %v6033_v7 = vld [vmem:[%s8340_s3 + $0x44] ss:$8 sps:$4 sm:$0xff]  }
 0x168   : > { %1979 = vmatpush2.bf16.msra.mxu0 %v5983_v8  ;;  %v6036_v8 = vld [vmem:[%s8340_s3 + $0x144] ss:$8 sps:$4 sm:$0xff]  }
 0x169   : > { %2022 = vmatpush2.bf16.msra.mxu1 %v5986_v20  ;;  %1980 = vmatprep.subr.bf16.mxu0 %v5991_v55  ;;  %v6031_v20 = vld [vmem:[%s8340_s3 + $0x40] ss:$8 sps:$4 sm:$0xff]   ;;  %v6039_v55 = vld [vmem:[%s8340_s3 + $0x34] ss:$8 sps:$4 sm:$0xff]  }
 0x16a   : > { %2023 = vmatprep.subr.bf16.mxu1 %v5994_v4  ;;  %v6037_v4 = vld [vmem:[%s8340_s3 + $0x30] ss:$8 sps:$4 sm:$0xff]  }
 0x16c   : > { %1981 = vmatpush2.bf16.msra.mxu0 %v5989_v11  ;;  %v6034_v11 = vld [vmem:[%s8340_s3 + $0x140] ss:$8 sps:$4 sm:$0xff]  }
 0x16d   : > { %2024 = vmatpush2.bf16.msra.mxu1 %v5992_v3  ;;  %1982 = vmatprep.subr.bf16.mxu0 %v5997_v12  ;;  %v6042_v3 = vld [vmem:[%s8340_s3 + $0x134] ss:$8 sps:$4 sm:$0xff]   ;;  %v6045_v12 = vld [vmem:[%s8340_s3 + $0x24] ss:$8 sps:$4 sm:$0xff]  }
 0x16e   : > { %2025 = vmatprep.subr.bf16.mxu1 %v6000_v14  ;;  %v6043_v14 = vld [vmem:[%s8340_s3 + $0x20] ss:$8 sps:$4 sm:$0xff]  }
 0x170   : > { %1983 = vmatpush2.bf16.msra.mxu0 %v5995_v22  ;;  %v6040_v22 = vld [vmem:[%s8340_s3 + $0x130] ss:$8 sps:$4 sm:$0xff]  }
 0x171   : > { %2026 = vmatpush2.bf16.msra.mxu1 %v5998_v23  ;;  %1984 = vmatprep.subr.bf16.mxu0 %v6003_v24  ;;  %v6048_v23 = vld [vmem:[%s8340_s3 + $0x124] ss:$8 sps:$4 sm:$0xff]   ;;  %v6051_v24 = vld [vmem:[%s8340_s3 + $0x14] ss:$8 sps:$4 sm:$0xff]  }
 0x172   : > { %2027 = vmatprep.subr.bf16.mxu1 %v6006_v26  ;;  %v6049_v26 = vld [vmem:[%s8340_s3 + $0x10] ss:$8 sps:$4 sm:$0xff]  }
 0x174   : > { %1985 = vmatpush2.bf16.msra.mxu0 %v6001_v15  ;;  %v6046_v15 = vld [vmem:[%s8340_s3 + $0x120] ss:$8 sps:$4 sm:$0xff]  }
 0x175   : > { %2028 = vmatpush2.bf16.msra.mxu1 %v6004_v25  ;;  %1986 = vmatprep.subr.bf16.mxu0 %v6009_v28  ;;  %v6054_v25 = vld [vmem:[%s8340_s3 + $0x114] ss:$8 sps:$4 sm:$0xff]   ;;  %v6057_v28 = vld [vmem:[%s8340_s3 + $0x4] ss:$8 sps:$4 sm:$0xff]  }
 0x176   : > { %2029 = vmatprep.subr.bf16.mxu1 %v6012_v16  ;;  %v1464_v16 = vld [vmem:[%s8340_s3 + $0x1f0] sm:$0x33] }
 0x178   : > { %1987 = vmatpush2.bf16.msra.mxu0 %v6007_v27  ;;  %v6052_v27 = vld [vmem:[%s8340_s3 + $0x110] ss:$8 sps:$4 sm:$0xff]  }
 0x179   : > { %2030 = vmatpush2.bf16.msra.mxu1 %v6010_v29  ;;  %2366 = vmatprep.subr.bf16.mxu0 %v6015_v17  ;;  %v6060_v29 = vld [vmem:[%s8340_s3 + $0x104] ss:$8 sps:$4 sm:$0xff]   ;;  %v6055_v17 = vld [vmem:[%s8340_s3] ss:$8 sps:$4 sm:$0xff]  }
 0x17a   : > { %2409 = vmatprep.subr.bf16.mxu1 %v6018_v30  ;;  %v6058_v30 = vld [vmem:[%s8340_s3 + $0x100] ss:$8 sps:$4 sm:$0xff]  }
 0x1f3   : > { %v7239_v31 = vpop.f32.mrf.mxu0 }
 0x1f4   : > { %v7241_v33 = vpop.f32.mrf.mxu1 }
 0x1f5   : > { %v1348_v32 = vpop.f32.mrf.mxu0 }
 0x1f6   : > { %v1391_v34 = vpop.f32.mrf.mxu1 }
 0x1f7   : > { %v7243_v35 = vpop.f32.mrf.mxu0 }
 0x1f8   : > { %v7245_v36 = vpop.f32.mrf.mxu1  ;;  %v1398_v37 = vpack.c.bf16 %v7243_v35, %v7239_v31  ;;  %v6114_v31 = vld [vmem:[%s8340_s3 + $0x564] ss:$8 sps:$4 sm:$0xff]   ;;  %v6109_v35 = vld [vmem:[%s8340_s3 + $0x460] ss:$8 sps:$4 sm:$0xff]  }
 0x1f9   : > { %v1400_v39 = vpack.c.bf16 %v7245_v36, %v7241_v33  ;;  %v1352_v40 = vpop.f32.mrf.mxu0  ;;  %v6108_v33 = vld [vmem:[%s8339_s2 + $0x10] sm:$0x3f]   ;;  %v6112_v36 = vld [vmem:[%s8340_s3 + $0x560] ss:$8 sps:$4 sm:$0xff]  }
 0x1fa   : > { %v1395_v38 = vpop.f32.mrf.mxu1  ;;  %v1399_v56 = vpack.c.bf16 %v1352_v40, %v1348_v32  ;;  %v6063_v32 = vld [vmem:[%s8340_s3 + $0xf4] ss:$8 sps:$4 sm:$0xff]   ;;  %v5316_v40 = vcombine.low %v1464_v16, %v1464_v16 }
 0x1fb   : > { %v1510_v41 = vpop.f32.mrf.mxu0  ;;  %v1401_v61 = vpack.c.bf16 %v1395_v38, %v1391_v34  ;;  %v5317_v34 = vcombine.high %v1464_v16, %v1464_v16  ;;  %v6061_v38 = vld [vmem:[%s8340_s3 + $0xf0] ss:$8 sps:$4 sm:$0xff]   ;;  %v6133_v16 = vld [vmem:[%s8340_s3 + $0x420] ss:$8 sps:$4 sm:$0xff]  }
 0x1fc   : > { %v1553_v42 = vpop.f32.mrf.mxu1 }
 0x1fd   : > { %v1512_v44 = vpop.f32.mrf.mxu0 }
 0x1fe   : > { %v1555_v45 = vpop.f32.mrf.mxu1 }
 0x1ff   : > { %v1514_v46 = vpop.f32.mrf.mxu0 }
 0x200   : > { %v1557_v47 = vpop.f32.mrf.mxu1  ;;  %v1562_v59 = vpack.c.bf16 %v1514_v46, %v1510_v41  ;;  %v2361_v41 = vsel %vm1949_vm5, %v5316_v40, 0  ;;  %v6069_v46 = vld [vmem:[%s8340_s3 + $0x1e0] ss:$8 sps:$4 sm:$0xff]   ;;  %v6142_v40 = vld [vmem:[%s8340_s3 + $0x510] ss:$8 sps:$4 sm:$0xff]  }
 0x201   : > { %v1516_v49 = vpop.f32.mrf.mxu0  ;;  %v1564_v60 = vpack.c.bf16 %v1557_v47, %v1553_v42  ;;  %v6068_v42 = vld [vmem:[%s8340_s3 + $0xe4] ss:$8 sps:$4 sm:$0xff]   ;;  %v6074_v47 = vld [vmem:[%s8340_s3 + $0xd4] ss:$8 sps:$4 sm:$0xff]  }
 0x202   : > { %v1559_v51 = vpop.f32.mrf.mxu1  ;;  %v1563_v53 = vpack.c.bf16 %v1516_v49, %v1512_v44  ;;  %v6071_v44 = vld [vmem:[%s8340_s3 + $0x1e4] ss:$8 sps:$4 sm:$0xff]   ;;  %v6077_v49 = vld [vmem:[%s8340_s3 + $0x1d4] ss:$8 sps:$4 sm:$0xff]  }
 0x203   : > { %v1565_v54 = vpack.c.bf16 %v1559_v51, %v1555_v45  ;;  %v6066_v45 = vld [vmem:[%s8340_s3 + $0xe0] ss:$8 sps:$4 sm:$0xff]   ;;  %v6072_v51 = vld [vmem:[%s8340_s3 + $0xd0] ss:$8 sps:$4 sm:$0xff]  }
 0x204   : > { %1988 = vmatprep.mubr.bf16.mxu0 %v1563_v53  ;;  %v6075_v53 = vld [vmem:[%s8340_s3 + $0x1d0] ss:$8 sps:$4 sm:$0xff]  }
 0x205   : > { %5253 = vmatprep.mubr.msk.bf16.mxu1 %vm1945_vm6, %v1565_v54  ;;  %1989 = vmatmul.mubr.bf16.vlgmr.msra.gmra.mxu0 %v1562_v59  ;;  %v6080_v54 = vld [vmem:[%s8340_s3 + $0xc4] ss:$8 sps:$4 sm:$0xff]   ;;  %v6081_v59 = vld [vmem:[%s8340_s3 + $0x1c0] ss:$8 sps:$4 sm:$0xff]  }
 0x206   : > { %2032 = vmatmul.mubr.bf16.vlgmr.msra.gmra.mxu1 %v1564_v60  ;;  %2367 = vmatpush1.bf16.msra.mxu0 %v6013_v57  ;;  %v6083_v57 = vld [vmem:[%s8340_s3 + $0x1c4] ss:$8 sps:$4 sm:$0xff]   ;;  %v6086_v60 = vld [vmem:[%s8340_s3 + $0xb4] ss:$8 sps:$4 sm:$0xff]  }
 0x207   : > { %2410 = vmatpush1.bf16.msra.mxu1 %v6016_v58  ;;  %2398 = vmatprep.mubr.bf16.mxu0 %v1399_v56  ;;  %v6078_v58 = vld [vmem:[%s8340_s3 + $0xc0] ss:$8 sps:$4 sm:$0xff]   ;;  %v6087_v56 = vld [vmem:[%s8340_s3 + $0x1b0] ss:$8 sps:$4 sm:$0xff]  }
 0x208   : > { %5319 = vmatprep.mubr.msk.bf16.mxu1 %vm1945_vm6, %v1401_v61  ;;  %2368 = vmatprep.subr.bf16.mxu0 %v6021_v43  ;;  %v6089_v43 = vld [vmem:[%s8340_s3 + $0x1b4] ss:$8 sps:$4 sm:$0xff]   ;;  %v6092_v61 = vld [vmem:[%s8340_s3 + $0xa4] ss:$8 sps:$4 sm:$0xff]  }
 0x209   : > { %2411 = vmatprep.subr.bf16.mxu1 %v6024_v52  ;;  %v6084_v52 = vld [vmem:[%s8340_s3 + $0xb0] ss:$8 sps:$4 sm:$0xff]  }
 0x20a   : > { %2369 = vmatpush1.bf16.msra.mxu0 %v6019_v63  ;;  %v6095_v63 = vld [vmem:[%s8340_s3 + $0x1a4] ss:$8 sps:$4 sm:$0xff]  }
 0x20b   : > { %2412 = vmatpush1.bf16.msra.mxu1 %v6022_v1  ;;  %2370 = vmatprep.subr.bf16.mxu0 %v6027_v18  ;;  %v6090_v1 = vld [vmem:[%s8340_s3 + $0xa0] ss:$8 sps:$4 sm:$0xff]  }
 0x20c   : > { %2413 = vmatprep.subr.bf16.mxu1 %v6030_v2  ;;  %v6093_v18 = vld [vmem:[%s8340_s3 + $0x1a0] ss:$8 sps:$4 sm:$0xff]   ;;  %v6098_v2 = vld [vmem:[%s8340_s3 + $0x94] ss:$8 sps:$4 sm:$0xff]  }
 0x20e   : > { %2371 = vmatpush1.bf16.msra.mxu0 %v6025_v5  ;;  %v6101_v5 = vld [vmem:[%s8340_s3 + $0x194] ss:$8 sps:$4 sm:$0xff]  }
 0x20f   : > { %2414 = vmatpush1.bf16.msra.mxu1 %v6028_v6  ;;  %2372 = vmatprep.subr.bf16.mxu0 %v6033_v7  ;;  %v6096_v6 = vld [vmem:[%s8340_s3 + $0x90] ss:$8 sps:$4 sm:$0xff]  }
 0x210   : > { %2415 = vmatprep.subr.bf16.mxu1 %v6036_v8  ;;  %v6099_v7 = vld [vmem:[%s8340_s3 + $0x190] ss:$8 sps:$4 sm:$0xff]   ;;  %v6104_v8 = vld [vmem:[%s8340_s3 + $0x84] ss:$8 sps:$4 sm:$0xff]  }
 0x212   : > { %2373 = vmatpush1.bf16.msra.mxu0 %v6031_v20  ;;  %v6107_v20 = vld [vmem:[%s8340_s3 + $0x184] ss:$8 sps:$4 sm:$0xff]  }
 0x213   : > { %2416 = vmatpush1.bf16.msra.mxu1 %v6034_v11  ;;  %2374 = vmatprep.subr.bf16.mxu0 %v6039_v55  ;;  %v6102_v11 = vld [vmem:[%s8340_s3 + $0x80] ss:$8 sps:$4 sm:$0xff]  }
 0x214   : > { %2417 = vmatprep.subr.bf16.mxu1 %v6042_v3  ;;  %v6105_v55 = vld [vmem:[%s8340_s3 + $0x180] ss:$8 sps:$4 sm:$0xff]   ;;  %v6111_v3 = vld [vmem:[%s8340_s3 + $0x464] ss:$8 sps:$4 sm:$0xff]  }
 0x216   : > { %2375 = vmatpush1.bf16.msra.mxu0 %v6037_v4  ;;  %v6115_v4 = vld [vmem:[%s8340_s3 + $0x450] ss:$8 sps:$4 sm:$0xff]  }
 0x217   : > { %2418 = vmatpush1.bf16.msra.mxu1 %v6040_v22  ;;  %2376 = vmatprep.subr.bf16.mxu0 %v6045_v12  ;;  %v6118_v22 = vld [vmem:[%s8340_s3 + $0x550] ss:$8 sps:$4 sm:$0xff]   ;;  %v6123_v12 = vld [vmem:[%s8340_s3 + $0x444] ss:$8 sps:$4 sm:$0xff]  }
 0x218   : > { %2419 = vmatprep.subr.bf16.mxu1 %v6048_v23  ;;  %v6126_v23 = vld [vmem:[%s8340_s3 + $0x544] ss:$8 sps:$4 sm:$0xff]  }
 0x21a   : > { %2377 = vmatpush1.bf16.msra.mxu0 %v6043_v14  ;;  %v6121_v14 = vld [vmem:[%s8340_s3 + $0x440] ss:$8 sps:$4 sm:$0xff]  }
 0x21b   : > { %2420 = vmatpush1.bf16.msra.mxu1 %v6046_v15  ;;  %2378 = vmatprep.subr.bf16.mxu0 %v6051_v24  ;;  %v6124_v15 = vld [vmem:[%s8340_s3 + $0x540] ss:$8 sps:$4 sm:$0xff]   ;;  %v6129_v24 = vld [vmem:[%s8340_s3 + $0x434] ss:$8 sps:$4 sm:$0xff]  }
 0x21c   : > { %2421 = vmatprep.subr.bf16.mxu1 %v6054_v25  ;;  %v6132_v25 = vld [vmem:[%s8340_s3 + $0x534] ss:$8 sps:$4 sm:$0xff]  }
 0x21e   : > { %2379 = vmatpush1.bf16.msra.mxu0 %v6049_v26  ;;  %v6127_v26 = vld [vmem:[%s8340_s3 + $0x430] ss:$8 sps:$4 sm:$0xff]  }
 0x21f   : > { %2422 = vmatpush1.bf16.msra.mxu1 %v6052_v27  ;;  %2380 = vmatprep.subr.bf16.mxu0 %v6057_v28  ;;  %v6130_v27 = vld [vmem:[%s8340_s3 + $0x530] ss:$8 sps:$4 sm:$0xff]   ;;  %v6135_v28 = vld [vmem:[%s8340_s3 + $0x424] ss:$8 sps:$4 sm:$0xff]  }
 0x220   : > { %2423 = vmatprep.subr.bf16.mxu1 %v6060_v29  ;;  %v6138_v29 = vld [vmem:[%s8340_s3 + $0x524] ss:$8 sps:$4 sm:$0xff]  }
 0x222   : > { %2381 = vmatpush1.bf16.msra.mxu0 %v6055_v17  ;;  %v6136_v17 = vld [vmem:[%s8340_s3 + $0x520] ss:$8 sps:$4 sm:$0xff]  }
 0x223   : > { %2424 = vmatpush1.bf16.msra.mxu1 %v6058_v30  ;;  %2382 = vmatprep.subr.bf16.mxu0 %v6063_v32  ;;  %v6141_v30 = vld [vmem:[%s8340_s3 + $0x414] ss:$8 sps:$4 sm:$0xff]  }
 0x224   : > { %5318 = vmatprep.subr.msk.bf16.mxu1 %vm1949_vm5, %v5317_v34  ;;  %v6144_v32 = vld [vmem:[%s8340_s3 + $0x514] ss:$8 sps:$4 sm:$0xff]   ;;  %v6139_v34 = vld [vmem:[%s8340_s3 + $0x410] ss:$8 sps:$4 sm:$0xff]  }
 0x226   : > { %2383 = vmatpush2.bf16.msra.mxu0 %v6061_v38  ;;  %v6147_v38 = vld [vmem:[%s8340_s3 + $0x404] ss:$8 sps:$4 sm:$0xff]  }
 0x227   : > { %2426 = vmatpush2.bf16.msra.mxu1 %v2361_v41  ;;  %2384 = vmatprep.subr.bf16.mxu0 %v6068_v42  ;;  %v6150_v41 = vld [vmem:[%s8340_s3 + $0x504] ss:$8 sps:$4 sm:$0xff]   ;;  %v6145_v42 = vld [vmem:[%s8340_s3 + $0x400] ss:$8 sps:$4 sm:$0xff]  }
 0x228   : > { %2427 = vmatprep.subr.bf16.mxu1 %v6071_v44  ;;  %v6148_v44 = vld [vmem:[%s8340_s3 + $0x500] ss:$8 sps:$4 sm:$0xff]  }
 0x22a   : > { %2385 = vmatpush2.bf16.msra.mxu0 %v6066_v45  ;;  %v6153_v45 = vld [vmem:[%s8340_s3 + $0x3f4] ss:$8 sps:$4 sm:$0xff]  }
 0x22b   : > { %2428 = vmatpush2.bf16.msra.mxu1 %v6069_v46  ;;  %2386 = vmatprep.subr.bf16.mxu0 %v6074_v47  ;;  %v6156_v46 = vld [vmem:[%s8340_s3 + $0x4f4] ss:$8 sps:$4 sm:$0xff]   ;;  %v5387_v47 = vld [vmem:[%s8340_s3 + $0x5e0] sm:$0x33] }
 0x22c   : > { %2429 = vmatprep.subr.bf16.mxu1 %v6077_v49  ;;  %v6151_v49 = vld [vmem:[%s8340_s3 + $0x3f0] ss:$8 sps:$4 sm:$0xff]  }
 0x22e   : > { %2387 = vmatpush2.bf16.msra.mxu0 %v6072_v51  ;;  %v6154_v51 = vld [vmem:[%s8340_s3 + $0x4f0] ss:$8 sps:$4 sm:$0xff]  }
 0x22f   : > { %2430 = vmatpush2.bf16.msra.mxu1 %v6075_v53  ;;  %2388 = vmatprep.subr.bf16.mxu0 %v6080_v54  ;;  %v6159_v53 = vld [vmem:[%s8340_s3 + $0x4e4] ss:$8 sps:$4 sm:$0xff]   ;;  %v5451_v54 = vcombine.high %v5387_v47, %v5387_v47 }
 0x230   : > { %2431 = vmatprep.subr.bf16.mxu1 %v6083_v57  ;;  %v5450_v57 = vcombine.low %v5387_v47, %v5387_v47 }
 0x232   : > { %2389 = vmatpush2.bf16.msra.mxu0 %v6078_v58  ;;  %v6157_v58 = vld [vmem:[%s8340_s3 + $0x4e0] ss:$8 sps:$4 sm:$0xff]  }
 0x233   : > { %2432 = vmatpush2.bf16.msra.mxu1 %v6081_v59  ;;  %2390 = vmatprep.subr.bf16.mxu0 %v6086_v60  ;;  %v2936_v59 = vsel %vm1949_vm5, %v5450_v57, 0  ;;  %v6164_v60 = vld [vmem:[%s8340_s3 + $0x4d4] ss:$8 sps:$4 sm:$0xff]  }
 0x234   : > { %2433 = vmatprep.subr.bf16.mxu1 %v6089_v43  ;;  %v6167_v43 = vld [vmem:[%s8340_s3 + $0x5d4] ss:$8 sps:$4 sm:$0xff]  }
 0x236   : > { %2391 = vmatpush2.bf16.msra.mxu0 %v6084_v52  ;;  %v6162_v52 = vld [vmem:[%s8340_s3 + $0x4d0] ss:$8 sps:$4 sm:$0xff]  }
 0x237   : > { %2434 = vmatpush2.bf16.msra.mxu1 %v6087_v56  ;;  %2392 = vmatprep.subr.bf16.mxu0 %v6092_v61  ;;  %v6165_v56 = vld [vmem:[%s8340_s3 + $0x5d0] ss:$8 sps:$4 sm:$0xff]   ;;  %v6170_v61 = vld [vmem:[%s8340_s3 + $0x4c4] ss:$8 sps:$4 sm:$0xff]  }
 0x238   : > { %2435 = vmatprep.subr.bf16.mxu1 %v6095_v63  ;;  %v6173_v63 = vld [vmem:[%s8340_s3 + $0x5c4] ss:$8 sps:$4 sm:$0xff]  }
 0x23a   : > { %2393 = vmatpush2.bf16.msra.mxu0 %v6090_v1  ;;  %v6168_v1 = vld [vmem:[%s8340_s3 + $0x4c0] ss:$8 sps:$4 sm:$0xff]  }
 0x23b   : > { %2436 = vmatpush2.bf16.msra.mxu1 %v6093_v18  ;;  %2394 = vmatprep.subr.bf16.mxu0 %v6098_v2  ;;  %v6171_v18 = vld [vmem:[%s8340_s3 + $0x5c0] ss:$8 sps:$4 sm:$0xff]   ;;  %v6176_v2 = vld [vmem:[%s8340_s3 + $0x4b4] ss:$8 sps:$4 sm:$0xff]  }
 0x23c   : > { %2437 = vmatprep.subr.bf16.mxu1 %v6101_v5  ;;  %v6179_v5 = vld [vmem:[%s8340_s3 + $0x5b4] ss:$8 sps:$4 sm:$0xff]  }
 0x23e   : > { %2395 = vmatpush2.bf16.msra.mxu0 %v6096_v6  ;;  %v6174_v6 = vld [vmem:[%s8340_s3 + $0x4b0] ss:$8 sps:$4 sm:$0xff]  }
 0x23f   : > { %2438 = vmatpush2.bf16.msra.mxu1 %v6099_v7  ;;  %2396 = vmatprep.subr.bf16.mxu0 %v6104_v8  ;;  %v6177_v7 = vld [vmem:[%s8340_s3 + $0x5b0] ss:$8 sps:$4 sm:$0xff]   ;;  %v6182_v8 = vld [vmem:[%s8340_s3 + $0x4a4] ss:$8 sps:$4 sm:$0xff]  }
 0x240   : > { %2439 = vmatprep.subr.bf16.mxu1 %v6107_v20  ;;  %v6185_v20 = vld [vmem:[%s8340_s3 + $0x5a4] ss:$8 sps:$4 sm:$0xff]  }
 0x242   : > { %2397 = vmatpush2.bf16.msra.mxu0 %v6102_v11  ;;  %v6180_v11 = vld [vmem:[%s8340_s3 + $0x4a0] ss:$8 sps:$4 sm:$0xff]  }
 0x243   : > { %2440 = vmatpush2.bf16.msra.mxu1 %v6105_v55  ;;  %2475 = vmatprep.subr.bf16.mxu0 %v6991_v9  ;;  %v6183_v55 = vld [vmem:[%s8340_s3 + $0x5a0] ss:$8 sps:$4 sm:$0xff]  }
 0x244   : > { %2518 = vmatprep.subr.bf16.mxu1 %v6994_v10 }
 0x245   : > { %2399 = vmatmul.mubr.bf16.vlgmr.msra.gmra.mxu0 %v1398_v37  ;;  %v6117_v37 = vld [vmem:[%s8340_s3 + $0x454] ss:$8 sps:$4 sm:$0xff]  }
 0x246   : > { %2442 = vmatmul.mubr.bf16.vlgmr.msra.gmra.mxu1 %v1400_v39  ;;  %2476 = vmatpush1.bf16.msra.mxu0 %v6999_v21  ;;  %v6120_v39 = vld [vmem:[%s8340_s3 + $0x554] ss:$8 sps:$4 sm:$0xff]  }
 0x247   : > { %2519 = vmatpush1.bf16.msra.mxu1 %v7002_v50  ;;  %2477 = vmatprep.subr.bf16.mxu0 %v7006_v62 }
 0x248   : > { %2520 = vmatprep.subr.bf16.mxu1 %v7008_v0  ;;  %2495 = vmatprep.mubr.bf16.mxu0 %v8392_v13 }
 0x249   : > { %2538 = vmatprep.mubr.bf16.mxu1 %v8392_v13 }
 0x24a   : > { %2478 = vmatpush1.bf16.msra.mxu0 %v7016_v48 }
 0x24b   : > { %2521 = vmatpush1.bf16.msra.mxu1 %v7018_v19  ;;  %2941 = vmatprep.subr.bf16.mxu0 %v6111_v3  ;;  %v6188_v3 = vld [vmem:[%s8340_s3 + $0x494] ss:$8 sps:$4 sm:$0xff]  }
 0x24c   : > { %2984 = vmatprep.subr.bf16.mxu1 %v6114_v31  ;;  %v6191_v31 = vld [vmem:[%s8340_s3 + $0x594] ss:$8 sps:$4 sm:$0xff]  }
 0x24d   : > { %5323 = vmatmul.mubr.msk.bf16.vlgmr.msra.gmra.mxu0 %vm1292_vm4, %v6108_v33 }
 0x24e   : > { %5324 = vmatmul.mubr.msk.bf16.vlgmr.msra.gmra.mxu1 %vm1292_vm4, %v6108_v33  ;;  %2942 = vmatpush1.bf16.msra.mxu0 %v6109_v35  ;;  %v6186_v33 = vld [vmem:[%s8340_s3 + $0x490] ss:$8 sps:$4 sm:$0xff]  }
 0x24f   : > { %2985 = vmatpush1.bf16.msra.mxu1 %v6112_v36  ;;  %2943 = vmatprep.subr.bf16.mxu0 %v6117_v37  ;;  %v6189_v35 = vld [vmem:[%s8340_s3 + $0x590] ss:$8 sps:$4 sm:$0xff]   ;;  %v6194_v36 = vld [vmem:[%s8340_s3 + $0x484] ss:$8 sps:$4 sm:$0xff]  }
 0x250   : > { %2986 = vmatprep.subr.bf16.mxu1 %v6120_v39  ;;  %v6197_v37 = vld [vmem:[%s8340_s3 + $0x584] ss:$8 sps:$4 sm:$0xff]   ;;  %v6192_v39 = vld [vmem:[%s8340_s3 + $0x480] ss:$8 sps:$4 sm:$0xff]  }
 0x252   : > { %2944 = vmatpush1.bf16.msra.mxu0 %v6115_v4  ;;  %v6195_v4 = vld [vmem:[%s8340_s3 + $0x580] ss:$8 sps:$4 sm:$0xff]  }
 0x253   : > { %2987 = vmatpush1.bf16.msra.mxu1 %v6118_v22  ;;  %2945 = vmatprep.subr.bf16.mxu0 %v6123_v12  ;;  %v6200_v22 = vld [vmem:[%s8340_s3 + $0x474] ss:$8 sps:$4 sm:$0xff]  }
 0x254   : > { %2988 = vmatprep.subr.bf16.mxu1 %v6126_v23  ;;  %v6203_v12 = vld [vmem:[%s8340_s3 + $0x574] ss:$8 sps:$4 sm:$0xff]   ;;  %v6198_v23 = vld [vmem:[%s8340_s3 + $0x470] ss:$8 sps:$4 sm:$0xff]  }
 0x256   : > { %2946 = vmatpush1.bf16.msra.mxu0 %v6121_v14  ;;  %v6201_v14 = vld [vmem:[%s8340_s3 + $0x570] ss:$8 sps:$4 sm:$0xff]  }
 0x257   : > { %2989 = vmatpush1.bf16.msra.mxu1 %v6124_v15  ;;  %2947 = vmatprep.subr.bf16.mxu0 %v6129_v24 }
 0x258   : > { %2990 = vmatprep.subr.bf16.mxu1 %v6132_v25 }
 0x25a   : > { %2948 = vmatpush1.bf16.msra.mxu0 %v6127_v26 }
 0x25b   : > { %2991 = vmatpush1.bf16.msra.mxu1 %v6130_v27  ;;  %2949 = vmatprep.subr.bf16.mxu0 %v6135_v28 }
 0x25c   : > { %2992 = vmatprep.subr.bf16.mxu1 %v6138_v29 }
 0x25e   : > { %2950 = vmatpush1.bf16.msra.mxu0 %v6133_v16 }
 0x25f   : > { %2993 = vmatpush1.bf16.msra.mxu1 %v6136_v17  ;;  %2951 = vmatprep.subr.bf16.mxu0 %v6141_v30 }
 0x260   : > { %2994 = vmatprep.subr.bf16.mxu1 %v6144_v32 }
 0x262   : > { %2952 = vmatpush1.bf16.msra.mxu0 %v6139_v34 }
 0x263   : > { %2995 = vmatpush1.bf16.msra.mxu1 %v6142_v40  ;;  %2953 = vmatprep.subr.bf16.mxu0 %v6147_v38 }
 0x264   : > { %2996 = vmatprep.subr.bf16.mxu1 %v6150_v41 }
 0x266   : > { %2954 = vmatpush1.bf16.msra.mxu0 %v6145_v42 }
 0x267   : > { %2997 = vmatpush1.bf16.msra.mxu1 %v6148_v44  ;;  %2955 = vmatprep.subr.bf16.mxu0 %v6153_v45 }
 0x268   : > { %2998 = vmatprep.subr.bf16.mxu1 %v6156_v46 }
 0x26a   : > { %2956 = vmatpush1.bf16.msra.mxu0 %v6151_v49 }
 0x26b   : > { %2999 = vmatpush1.bf16.msra.mxu1 %v6154_v51  ;;  %2957 = vmatprep.subr.bf16.mxu0 %v6159_v53 }
 0x26c   : > { %5452 = vmatprep.subr.msk.bf16.mxu1 %vm1949_vm5, %v5451_v54 }
 0x26e   : > { %2958 = vmatpush2.bf16.msra.mxu0 %v6157_v58 }
 0x26f   : > { %3001 = vmatpush2.bf16.msra.mxu1 %v2936_v59  ;;  %2959 = vmatprep.subr.bf16.mxu0 %v6164_v60 }
 0x270   : > { %3002 = vmatprep.subr.bf16.mxu1 %v6167_v43 }
 0x272   : > { %2960 = vmatpush2.bf16.msra.mxu0 %v6162_v52 }
 0x273   : > { %3003 = vmatpush2.bf16.msra.mxu1 %v6165_v56  ;;  %2961 = vmatprep.subr.bf16.mxu0 %v6170_v61 }
 0x274   : > { %3004 = vmatprep.subr.bf16.mxu1 %v6173_v63 }
 0x276   : > { %2962 = vmatpush2.bf16.msra.mxu0 %v6168_v1 }
 0x277   : > { %3005 = vmatpush2.bf16.msra.mxu1 %v6171_v18  ;;  %2963 = vmatprep.subr.bf16.mxu0 %v6176_v2 }
 0x278   : > { %3006 = vmatprep.subr.bf16.mxu1 %v6179_v5 }
 0x27a   : > { %2964 = vmatpush2.bf16.msra.mxu0 %v6174_v6 }
 0x27b   : > { %3007 = vmatpush2.bf16.msra.mxu1 %v6177_v7  ;;  %2965 = vmatprep.subr.bf16.mxu0 %v6182_v8  ;;  %v6207_v7 = vld [vmem:[%s8340_s3 + $0x65c] ss:$8 sps:$4 sm:$0xff]  }
 0x27c   : > { %3008 = vmatprep.subr.bf16.mxu1 %v6185_v20  ;;  %v6210_v8 = vld [vmem:[%s8340_s3 + $0x75c] ss:$8 sps:$4 sm:$0xff]   ;;  %v6214_v20 = vld [vmem:[%s8340_s3 + $0x748] ss:$8 sps:$4 sm:$0xff]  }
 0x27e   : > { %2966 = vmatpush2.bf16.msra.mxu0 %v6180_v11  ;;  %v6219_v11 = vld [vmem:[%s8340_s3 + $0x63c] ss:$8 sps:$4 sm:$0xff]  }
 0x27f   : > { %3009 = vmatpush2.bf16.msra.mxu1 %v6183_v55  ;;  %2967 = vmatprep.subr.bf16.mxu0 %v6188_v3  ;;  %v6222_v55 = vld [vmem:[%s8340_s3 + $0x73c] ss:$8 sps:$4 sm:$0xff]   ;;  %v6217_v3 = vld [vmem:[%s8340_s3 + $0x638] ss:$8 sps:$4 sm:$0xff]  }
 0x280   : > { %3010 = vmatprep.subr.bf16.mxu1 %v6191_v31  ;;  %v6220_v31 = vld [vmem:[%s8340_s3 + $0x738] ss:$8 sps:$4 sm:$0xff]  }
 0x282   : > { %2968 = vmatpush2.bf16.msra.mxu0 %v6186_v33  ;;  %v6225_v33 = vld [vmem:[%s8340_s3 + $0x62c] ss:$8 sps:$4 sm:$0xff]  }
 0x283   : > { %3011 = vmatpush2.bf16.msra.mxu1 %v6189_v35  ;;  %2969 = vmatprep.subr.bf16.mxu0 %v6194_v36  ;;  %v6228_v35 = vld [vmem:[%s8340_s3 + $0x72c] ss:$8 sps:$4 sm:$0xff]   ;;  %v6223_v36 = vld [vmem:[%s8340_s3 + $0x628] ss:$8 sps:$4 sm:$0xff]  }
 0x284   : > { %3012 = vmatprep.subr.bf16.mxu1 %v6197_v37  ;;  %v6226_v37 = vld [vmem:[%s8340_s3 + $0x728] ss:$8 sps:$4 sm:$0xff]  }
 0x286   : > { %2970 = vmatpush2.bf16.msra.mxu0 %v6192_v39  ;;  %v6231_v39 = vld [vmem:[%s8340_s3 + $0x61c] ss:$8 sps:$4 sm:$0xff]  }
 0x287   : > { %3013 = vmatpush2.bf16.msra.mxu1 %v6195_v4  ;;  %2971 = vmatprep.subr.bf16.mxu0 %v6200_v22  ;;  %v6234_v4 = vld [vmem:[%s8340_s3 + $0x71c] ss:$8 sps:$4 sm:$0xff]   ;;  %v6229_v22 = vld [vmem:[%s8340_s3 + $0x618] ss:$8 sps:$4 sm:$0xff]  }
 0x288   : > { %3014 = vmatprep.subr.bf16.mxu1 %v6203_v12  ;;  %v6232_v12 = vld [vmem:[%s8340_s3 + $0x718] ss:$8 sps:$4 sm:$0xff]  }
 0x28a   : > { %2972 = vmatpush2.bf16.msra.mxu0 %v6198_v23  ;;  %v6237_v23 = vld [vmem:[%s8340_s3 + $0x60c] ss:$8 sps:$4 sm:$0xff]  }
 0x28b   : > { %3015 = vmatpush2.bf16.msra.mxu1 %v6201_v14  ;;  %3054 = vmatprep.subr.bf16.mxu0 %v6991_v9  ;;  %v6240_v14 = vld [vmem:[%s8340_s3 + $0x70c] ss:$8 sps:$4 sm:$0xff]  }
 0x28c   : > { %3097 = vmatprep.subr.bf16.mxu1 %v6994_v10 }
 0x2c5   : > { %v1990_v15 = vpop.f32.mrf.mxu0 }
 0x2c6   : > { %v2033_v24 = vpop.f32.mrf.mxu1 }
 0x2c7   : > { %v2034_v25 = vadd.f32 %v2033_v24, %v1990_v15  ;;  %v1992_v26 = vpop.f32.mrf.mxu0  ;;  %v6235_v15 = vld [vmem:[%s8340_s3 + $0x608] ss:$8 sps:$4 sm:$0xff]  }
 0x2c8   : > { %v2035_v27 = vpop.f32.mrf.mxu1  ;;  %v6238_v24 = vld [vmem:[%s8340_s3 + $0x708] ss:$8 sps:$4 sm:$0xff]  }
 0x2c9   : > { %v2036_v28 = vadd.f32 %v2035_v27, %v1992_v26  ;;  %v1994_v29 = vpop.f32.mrf.mxu0  ;;  %v6246_v26 = vld [vmem:[%s8340_s3 + $0x6fc] ss:$8 sps:$4 sm:$0xff]   ;;  %v6241_v27 = vld [vmem:[%s8340_s3 + $0x5f8] ss:$8 sps:$4 sm:$0xff]  }
 0x2ca   : > { %v2037_v16 = vpop.f32.mrf.mxu1 }
 0x2cb   : > { %v2038_v17 = vadd.f32 %v2037_v16, %v1994_v29  ;;  %v1996_v30 = vpop.f32.mrf.mxu0  ;;  %v6249_v29 = vld [vmem:[%s8340_s3 + $0x5ec] ss:$8 sps:$4 sm:$0xff]  }
 0x2cc   : > { %v2039_v32 = vpop.f32.mrf.mxu1  ;;  %v6252_v16 = vld [vmem:[%s8340_s3 + $0x6ec] ss:$8 sps:$4 sm:$0xff]  }
 0x2cd   : > { %v2040_v34 = vadd.f32 %v2039_v32, %v1996_v30  ;;  %v6247_v30 = vld [vmem:[%s8340_s3 + $0x5e8] ss:$8 sps:$4 sm:$0xff]  }
 0x2ce   : > { %v6250_v32 = vld [vmem:[%s8340_s3 + $0x6e8] ss:$8 sps:$4 sm:$0xff]  }
 0x305   : > { %v2400_v40 = vpop.f32.mrf.mxu0 }
 0x306   : > { %v2443_v38 = vpop.f32.mrf.mxu1  ;;  %v2401_v41 = vadd.f32 %v2400_v40, %v2034_v25  ;;  %v6243_v25 = vld [vmem:[%s8340_s3 + $0x5fc] ss:$8 sps:$4 sm:$0xff]  }
 0x307   : > { %v2402_v42 = vpop.f32.mrf.mxu0 }
 0x308   : > { %v2445_v44 = vpop.f32.mrf.mxu1  ;;  %v7652_v9 = vadd.f32 %v2443_v38, %v2401_v41  ;;  %v2403_v10 = vadd.f32 %v2402_v42, %v2036_v28  ;;  %v6244_v28 = vld [vmem:[%s8340_s3 + $0x6f8] ss:$8 sps:$4 sm:$0xff]  }
 0x309   : > { %v2404_v45 = vpop.f32.mrf.mxu0  ;;  %v6253_v41 = vld [vmem:[%s8340_s3 + $0x6d8] ss:$8 sps:$4 sm:$0xff]  }
 0x30a   : > { %v2447_v46 = vpop.f32.mrf.mxu1  ;;  %v7654_v47 = vadd.f32 %v2445_v44, %v2403_v10  ;;  %v2405_v49 = vadd.f32 %v2404_v45, %v2038_v17  ;;  %v5521_v17 = vld [vmem:[%s8340_s3 + $0x7d8] sm:$0x33]  ;;  %v6260_v44 = vld [vmem:[%s8340_s3 + $0x6cc] ss:$8 sps:$4 sm:$0xff]   ;;  %v6258_v45 = vld [vmem:[%s8340_s3 + $0x6c8] ss:$8 sps:$4 sm:$0xff]  }
 0x30b   : > { %v2406_v51 = vpop.f32.mrf.mxu0  ;;  %v5585_v40 = vcombine.high %v5521_v17, %v5521_v17  ;;  %v5584_v38 = vcombine.low %v5521_v17, %v5521_v17  ;;  %v6263_v10 = vld [vmem:[%s8340_s3 + $0x7cc] ss:$8 sps:$4 sm:$0xff]  }
 0x30c   : > { %v2449_v53 = vpop.f32.mrf.mxu1  ;;  %v7656_v54 = vadd.f32 %v2447_v46, %v2405_v49  ;;  %v2407_v57 = vadd.f32 %v2406_v51, %v2040_v34  ;;  %v6255_v34 = vld [vmem:[%s8340_s3 + $0x6dc] ss:$8 sps:$4 sm:$0xff]   ;;  %v6261_v46 = vld [vmem:[%s8340_s3 + $0x7c8] ss:$8 sps:$4 sm:$0xff]  }
 0x30d   : > { %v2497_v58 = vpop.f32.mrf.mxu0  ;;  %v3515_v42 = vsel %vm1949_vm5, %v5584_v38, 0  ;;  %v6266_v49 = vld [vmem:[%s8340_s3 + $0x6bc] ss:$8 sps:$4 sm:$0xff]  }
 0x30e   : > { %v2540_v59 = vpop.f32.mrf.mxu1  ;;  %v7658_v60 = vadd.f32 %v2449_v53, %v2407_v57  ;;  %v6269_v51 = vld [vmem:[%s8340_s3 + $0x7bc] ss:$8 sps:$4 sm:$0xff]   ;;  %v6264_v53 = vld [vmem:[%s8340_s3 + $0x6b8] ss:$8 sps:$4 sm:$0xff]  }
 0x30f   : > { %v2499_v43 = vpop.f32.mrf.mxu0  ;;  %v6267_v57 = vld [vmem:[%s8340_s3 + $0x7b8] ss:$8 sps:$4 sm:$0xff]  }
 0x310   : > { %v2542_v52 = vpop.f32.mrf.mxu1  ;;  %v8393_v38 = vld [vmem:[#allocation7_spill] sm:$0xff] }
 0x311   : > { %v2501_v56 = vpop.f32.mrf.mxu0 }
 0x312   : > { %v2544_v61 = vpop.f32.mrf.mxu1  ;;  %v2549_v5 = vpack.c.bf16 %v2501_v56, %v2497_v58  ;;  %v6272_v58 = vld [vmem:[%s8340_s3 + $0x6ac] ss:$8 sps:$4 sm:$0xff]   ;;  %v6278_v56 = vld [vmem:[%s8340_s3 + $0x69c] ss:$8 sps:$4 sm:$0xff]  }
 0x313   : > { %v2503_v63 = vpop.f32.mrf.mxu0  ;;  %v2551_v6 = vpack.c.bf16 %v2544_v61, %v2540_v59  ;;  %v6275_v59 = vld [vmem:[%s8340_s3 + $0x7ac] ss:$8 sps:$4 sm:$0xff]   ;;  %v6281_v61 = vld [vmem:[%s8340_s3 + $0x79c] ss:$8 sps:$4 sm:$0xff]  }
 0x314   : > { %v2546_v1 = vpop.f32.mrf.mxu1  ;;  %v2550_v18 = vpack.c.bf16 %v2503_v63, %v2499_v43  ;;  %v6270_v43 = vld [vmem:[%s8340_s3 + $0x6a8] ss:$8 sps:$4 sm:$0xff]   ;;  %v6276_v63 = vld [vmem:[%s8340_s3 + $0x698] ss:$8 sps:$4 sm:$0xff]  }
 0x315   : > { %v2552_v2 = vpack.c.bf16 %v2546_v1, %v2542_v52  ;;  %v6273_v52 = vld [vmem:[%s8340_s3 + $0x7a8] ss:$8 sps:$4 sm:$0xff]   ;;  %v6279_v1 = vld [vmem:[%s8340_s3 + $0x798] ss:$8 sps:$4 sm:$0xff]  }
 0x316   : > { %2973 = vmatprep.mubr.bf16.mxu0 %v2550_v18  ;;  %v6284_v18 = vld [vmem:[%s8340_s3 + $0x68c] ss:$8 sps:$4 sm:$0xff]  }
 0x317   : > { %5453 = vmatprep.mubr.msk.bf16.mxu1 %vm1945_vm6, %v2552_v2  ;;  %2974 = vmatmul.mubr.bf16.vlgmr.msra.gmra.mxu0 %v2549_v5  ;;  %v6287_v2 = vld [vmem:[%s8340_s3 + $0x78c] ss:$8 sps:$4 sm:$0xff]   ;;  %v6282_v5 = vld [vmem:[%s8340_s3 + $0x688] ss:$8 sps:$4 sm:$0xff]  }
 0x318   : > { %3017 = vmatmul.mubr.bf16.vlgmr.msra.gmra.mxu1 %v2551_v6  ;;  %3055 = vmatpush1.bf16.msra.mxu0 %v6999_v21  ;;  %v6204_v21 = vld [vmem:[%s8339_s2 + $0x18] sm:$0x3f]   ;;  %v6285_v6 = vld [vmem:[%s8340_s3 + $0x788] ss:$8 sps:$4 sm:$0xff]  }
 0x319   : > { %3098 = vmatpush1.bf16.msra.mxu1 %v7002_v50  ;;  %3056 = vmatprep.subr.bf16.mxu0 %v7006_v62  ;;  %v6205_v50 = vld [vmem:[%s8340_s3 + $0x658] ss:$8 sps:$4 sm:$0xff]  }
 0x31a   : > { %3099 = vmatprep.subr.bf16.mxu1 %v7008_v0  ;;  %3074 = vmatprep.mubr.bf16.mxu0 %v8392_v13  ;;  %v6208_v62 = vld [vmem:[%s8340_s3 + $0x758] ss:$8 sps:$4 sm:$0xff]   ;;  %v6213_v0 = vld [vmem:[%s8340_s3 + $0x64c] ss:$8 sps:$4 sm:$0xff]  }
 0x31b   : > { %3117 = vmatprep.mubr.bf16.mxu1 %v8392_v13 }
 0x31c   : > { %3057 = vmatpush1.bf16.msra.mxu0 %v7016_v48  ;;  %v6216_v48 = vld [vmem:[%s8340_s3 + $0x74c] ss:$8 sps:$4 sm:$0xff]  }
 0x31d   : > { %3100 = vmatpush1.bf16.msra.mxu1 %v7018_v19  ;;  %3520 = vmatprep.subr.bf16.mxu0 %v6207_v7  ;;  %v6211_v19 = vld [vmem:[%s8340_s3 + $0x648] ss:$8 sps:$4 sm:$0xff]   ;;  %v6290_v7 = vld [vmem:[%s8340_s3 + $0x67c] ss:$8 sps:$4 sm:$0xff]  }
 0x31e   : > { %3563 = vmatprep.subr.bf16.mxu1 %v6210_v8  ;;  %v6288_v8 = vld [vmem:[%s8340_s3 + $0x678] ss:$8 sps:$4 sm:$0xff]  }
 0x31f   : > { %5457 = vmatmul.mubr.msk.bf16.vlgmr.msra.gmra.mxu0 %vm1292_vm4, %v6204_v21 }
 0x320   : > { %5458 = vmatmul.mubr.msk.bf16.vlgmr.msra.gmra.mxu1 %vm1292_vm4, %v6204_v21  ;;  %3521 = vmatpush1.bf16.msra.mxu0 %v6205_v50  ;;  %v6291_v21 = vld [vmem:[%s8340_s3 + $0x778] ss:$8 sps:$4 sm:$0xff]   ;;  %v6293_v50 = vld [vmem:[%s8340_s3 + $0x77c] ss:$8 sps:$4 sm:$0xff]  }
 0x321   : > { %3564 = vmatpush1.bf16.msra.mxu1 %v6208_v62  ;;  %3522 = vmatprep.subr.bf16.mxu0 %v6213_v0  ;;  %v6294_v62 = vld [vmem:[%s8340_s3 + $0x668] ss:$8 sps:$4 sm:$0xff]   ;;  %v6296_v0 = vld [vmem:[%s8340_s3 + $0x66c] ss:$8 sps:$4 sm:$0xff]  }
 0x322   : > { %3565 = vmatprep.subr.bf16.mxu1 %v6216_v48  ;;  %v6297_v48 = vld [vmem:[%s8340_s3 + $0x768] ss:$8 sps:$4 sm:$0xff]  }
 0x324   : > { %3523 = vmatpush1.bf16.msra.mxu0 %v6211_v19  ;;  %v6299_v19 = vld [vmem:[%s8340_s3 + $0x76c] ss:$8 sps:$4 sm:$0xff]  }
 0x325   : > { %3566 = vmatpush1.bf16.msra.mxu1 %v6214_v20  ;;  %3524 = vmatprep.subr.bf16.mxu0 %v6219_v11 }
 0x326   : > { %3567 = vmatprep.subr.bf16.mxu1 %v6222_v55 }
 0x328   : > { %3525 = vmatpush1.bf16.msra.mxu0 %v6217_v3 }
 0x329   : > { %3568 = vmatpush1.bf16.msra.mxu1 %v6220_v31  ;;  %3526 = vmatprep.subr.bf16.mxu0 %v6225_v33 }
 0x32a   : > { %3569 = vmatprep.subr.bf16.mxu1 %v6228_v35 }
 0x32c   : > { %3527 = vmatpush1.bf16.msra.mxu0 %v6223_v36 }
 0x32d   : > { %3570 = vmatpush1.bf16.msra.mxu1 %v6226_v37  ;;  %3528 = vmatprep.subr.bf16.mxu0 %v6231_v39 }
 0x32e   : > { %3571 = vmatprep.subr.bf16.mxu1 %v6234_v4 }
 0x330   : > { %3529 = vmatpush1.bf16.msra.mxu0 %v6229_v22 }
 0x331   : > { %3572 = vmatpush1.bf16.msra.mxu1 %v6232_v12  ;;  %3530 = vmatprep.subr.bf16.mxu0 %v6237_v23 }
 0x332   : > { %3573 = vmatprep.subr.bf16.mxu1 %v6240_v14 }
 0x334   : > { %3531 = vmatpush1.bf16.msra.mxu0 %v6235_v15 }
 0x335   : > { %3574 = vmatpush1.bf16.msra.mxu1 %v6238_v24  ;;  %3532 = vmatprep.subr.bf16.mxu0 %v6243_v25 }
 0x336   : > { %3575 = vmatprep.subr.bf16.mxu1 %v6246_v26 }
 0x338   : > { %3533 = vmatpush1.bf16.msra.mxu0 %v6241_v27 }
 0x339   : > { %3576 = vmatpush1.bf16.msra.mxu1 %v6244_v28  ;;  %3534 = vmatprep.subr.bf16.mxu0 %v6249_v29 }
 0x33a   : > { %3577 = vmatprep.subr.bf16.mxu1 %v6252_v16 }
 0x33c   : > { %3535 = vmatpush1.bf16.msra.mxu0 %v6247_v30 }
 0x33d   : > { %3578 = vmatpush1.bf16.msra.mxu1 %v6250_v32  ;;  %3536 = vmatprep.subr.bf16.mxu0 %v6255_v34 }
 0x33e   : > { %5586 = vmatprep.subr.msk.bf16.mxu1 %vm1949_vm5, %v5585_v40 }
 0x340   : > { %3537 = vmatpush2.bf16.msra.mxu0 %v6253_v41 }
 0x341   : > { %3580 = vmatpush2.bf16.msra.mxu1 %v3515_v42  ;;  %3538 = vmatprep.subr.bf16.mxu0 %v6260_v44 }
 0x342   : > { %3581 = vmatprep.subr.bf16.mxu1 %v6263_v10 }
 0x344   : > { %3539 = vmatpush2.bf16.msra.mxu0 %v6258_v45  ;;  %v5588_v45 = vld [vmem:[%s8346_s9 + $0x1] ss:$4 sm:$0x3] }
 0x345   : > { %3582 = vmatpush2.bf16.msra.mxu1 %v6261_v46  ;;  %3540 = vmatprep.subr.bf16.mxu0 %v6266_v49  ;;  %v8394_v49 = vld [vmem:[#allocation8_spill] sm:$0xff] }
 0x346   : > { %3583 = vmatprep.subr.bf16.mxu1 %v6269_v51 }
 0x348   : > { %3541 = vmatpush2.bf16.msra.mxu0 %v6264_v53 }
 0x349   : > { %3584 = vmatpush2.bf16.msra.mxu1 %v6267_v57  ;;  %3542 = vmatprep.subr.bf16.mxu0 %v6272_v58 }
 0x34a   : > { %3585 = vmatprep.subr.bf16.mxu1 %v6275_v59 }
 0x34c   : > { %3543 = vmatpush2.bf16.msra.mxu0 %v6270_v43 }
 0x34d   : > { %3586 = vmatpush2.bf16.msra.mxu1 %v6273_v52  ;;  %3544 = vmatprep.subr.bf16.mxu0 %v6278_v56  ;;  %v3636_v52 = vrot.slane %v5588_v45, %v8393_v38 }
 0x34e   : > { %3587 = vmatprep.subr.bf16.mxu1 %v6281_v61 }
 0x350   : > { %3545 = vmatpush2.bf16.msra.mxu0 %v6276_v63 }
 0x351   : > { %3588 = vmatpush2.bf16.msra.mxu1 %v6279_v1  ;;  %3546 = vmatprep.subr.bf16.mxu0 %v6284_v18 }
 0x352   : > { %3589 = vmatprep.subr.bf16.mxu1 %v6287_v2 }
 0x354   : > { %3547 = vmatpush2.bf16.msra.mxu0 %v6282_v5  ;;  %v5589_v5 = vld [vmem:[%s8346_s9 + $0x2] ss:$4 sm:$0x3] }
 0x355   : > { %3590 = vmatpush2.bf16.msra.mxu1 %v6285_v6  ;;  %3548 = vmatprep.subr.bf16.mxu0 %v6290_v7  ;;  %v3640_v7 = vrot.slane %v5588_v45, %v8394_v49 }
 0x356   : > { %3591 = vmatprep.subr.bf16.mxu1 %v6293_v50 }
 0x358   : > { %3549 = vmatpush2.bf16.msra.mxu0 %v6288_v8 }
 0x359   : > { %3592 = vmatpush2.bf16.msra.mxu1 %v6291_v21  ;;  %3550 = vmatprep.subr.bf16.mxu0 %v6296_v0 }
 0x35a   : > { %3593 = vmatprep.subr.bf16.mxu1 %v6299_v19 }
 0x35c   : > { %3551 = vmatpush2.bf16.msra.mxu0 %v6294_v62  ;;  %v3653_v62 = vrot.slane %v5589_v5, %v8393_v38 }
 0x35d   : > { %3594 = vmatpush2.bf16.msra.mxu1 %v6297_v48 }
 0x3d7   : > { %v2975_v20 = vpop.f32.mrf.mxu0 }
 0x3d8   : > { %v3018_v11 = vpop.f32.mrf.mxu1 }
 0x3d9   : > { %v3019_v55 = vadd.f32 %v3018_v11, %v2975_v20  ;;  %v2977_v3 = vpop.f32.mrf.mxu0 }
 0x3da   : > { %v3020_v31 = vpop.f32.mrf.mxu1 }
 0x3db   : > { %v3027_v33 = vadd.f32 %v3019_v55, %v7652_v9  ;;  %v3021_v35 = vadd.f32 %v3020_v31, %v2977_v3  ;;  %v2979_v36 = vpop.f32.mrf.mxu0  ;;  %v3657_v55 = vrot.slane %v5589_v5, %v8394_v49 }
 0x3dc   : > { %v3022_v37 = vpop.f32.mrf.mxu1 }
 0x3dd   : > { %v3028_v39 = vadd.f32 %v3021_v35, %v7654_v47  ;;  %v3023_v4 = vadd.f32 %v3022_v37, %v2979_v36  ;;  %v2981_v22 = vpop.f32.mrf.mxu0  ;;  %v8395_v35 = vmov 65535  }
 0x3de   : > { %v3024_v12 = vpop.f32.mrf.mxu1  ;;  %v3671_v36 = vsel %vm1297_vm3, 4294967295, %v8395_v35  ;;  %v6334_v35 = vld [vmem:[%s8343_s6 + $0x54] ss:$8 sps:$4 sm:$0xff]  }
 0x3df   : > { %v3029_v23 = vadd.f32 %v3023_v4, %v7656_v54  ;;  %v3025_v14 = vadd.f32 %v3024_v12, %v2981_v22  ;;  %v3076_v15 = vpop.f32.mrf.mxu0  ;;  %v3610_v54 = vld [vmem:[%s8346_s9] ss:$4 sm:$0x3]  ;;  %v3672_v12 = vsel %vm484_vm0, %v3671_v36, 0 }
 0x3e0   : > { %v3119_v24 = vpop.f32.mrf.mxu1  ;;  %v3615_v41 = vrot.slane %v3610_v54, %v8393_v38  ;;  %v3619_v51 = vrot.slane %v3610_v54, %v8394_v49  ;;  %v6311_v54 = vld [vmem:[%s8342_s5 + $0x80] sm:$0xff]  }
 0x3e1   : > { %v3030_v25 = vadd.f32 %v3025_v14, %v7658_v60  ;;  %v3078_v26 = vpop.f32.mrf.mxu0  ;;  %v6337_v36 = vld [vmem:[%s8343_s6 + $0xbc] ss:$8 sps:$4 sm:$0xff]  }
 0x3e2   : > { %v3121_v27 = vpop.f32.mrf.mxu1 }
 0x3e3   : > { %v3080_v28 = vpop.f32.mrf.mxu0 }
 0x3e4   : > { %v3123_v29 = vpop.f32.mrf.mxu1  ;;  %v3128_v32 = vpack.c.bf16 %v3080_v28, %v3076_v15  ;;  %v3666_v15 = vld [vmem:[%s8341_s4] sm:$0x7] }
 0x3e5   : > { %v3082_v9 = vpop.f32.mrf.mxu0  ;;  %v3130_v47 = vpack.c.bf16 %v3123_v29, %v3119_v24  ;;  %v5591_v24 = vld [vmem:[%s8341_s4 + $0x4] sm:$0x7]  ;;  %v6304_v29 = vld [vmem:[%s8342_s5 + $0x28] sm:$0xff]  }
 0x3e6   : > { %v3125_v16 = vpop.f32.mrf.mxu1  ;;  %v3129_v17 = vpack.c.bf16 %v3082_v9, %v3078_v26  ;;  %v6301_v26 = vld [vmem:[%s8342_s5 + $0xa8] sm:$0xff]   ;;  %v6303_v28 = vld [vmem:[%s8342_s5 + $0xa0] sm:$0xff]   ;;  %v6305_v9 = vld [vmem:[%s8342_s5 + $0x98] sm:$0xff]  }
 0x3e7   : > { %v3131_v30 = vpack.c.bf16 %v3125_v16, %v3121_v27  ;;  %v6302_v27 = vld [vmem:[%s8342_s5 + $0x30] sm:$0xff]   ;;  %v6306_v16 = vld [vmem:[%s8342_s5 + $0x20] sm:$0xff]  }
 0x3e8   : > { %3552 = vmatprep.mubr.bf16.mxu0 %v3129_v17  ;;  %v6307_v17 = vld [vmem:[%s8342_s5 + $0x90] sm:$0xff]  }
 0x3e9   : > { %5587 = vmatprep.mubr.msk.bf16.mxu1 %vm1945_vm6, %v3131_v30  ;;  %3553 = vmatmul.mubr.bf16.vlgmr.msra.gmra.mxu0 %v3128_v32  ;;  %v6308_v30 = vld [vmem:[%s8342_s5 + $0x18] sm:$0xff]   ;;  %v6309_v32 = vld [vmem:[%s8342_s5 + $0x88] sm:$0xff]  }
 0x3ea   : > { %3596 = vmatmul.mubr.bf16.vlgmr.msra.gmra.mxu1 %v3130_v47  ;;  %3711 = vmatprep.mubr.bf16.mxu0 %v8392_v13  ;;  %v6310_v47 = vld [vmem:[%s8342_s5 + $0x10] sm:$0xff]  }
 0x3eb   : > { %3757 = vmatprep.mubr.bf16.mxu1 %v8392_v13 }
 0x4a9   : > { %v3554_v60 = vpop.f32.mrf.mxu0 }
 0x4aa   : > { %v3597_v34 = vpop.f32.mrf.mxu1 }
 0x4ab   : > { %v3598_v40 = vadd.f32 %v3597_v34, %v3554_v60  ;;  %v3556_v42 = vpop.f32.mrf.mxu0  ;;  %v6312_v60 = vld [vmem:[%s8342_s5 + $0x8] sm:$0xff]   ;;  %v6313_v34 = vld [vmem:[%s8342_s5 + $0x78] sm:$0xff]  }
 0x4ac   : > { %v3599_v44 = vpop.f32.mrf.mxu1 }
 0x4ad   : > { %v3606_v10 = vadd.f32 %v3598_v40, %v3027_v33  ;;  %v3600_v46 = vadd.f32 %v3599_v44, %v3556_v42  ;;  %v3558_v53 = vpop.f32.mrf.mxu0  ;;  %v6314_v40 = vld [vmem:[%s8342_s5] sm:$0xff]   ;;  %v6316_v42 = vld [vmem:[%s8342_s5 + $0x68] sm:$0x3f]   ;;  %v6317_v44 = vld [vmem:[%s8342_s5 + $0xd8] sm:$0x3f]  }
 0x4ae   : > { %v3601_v57 = vpop.f32.mrf.mxu1  ;;  %v4041_v45 = vsel %vm484_vm0, %v6317_v44, 0 }
 0x4af   : > { %v3622_v58 = vadd.f32 %v3615_v41, %v3606_v10  ;;  %v3607_v59 = vadd.f32 %v3600_v46, %v3028_v39  ;;  %v3602_v43 = vadd.f32 %v3601_v57, %v3558_v53  ;;  %v3560_v56 = vpop.f32.mrf.mxu0  ;;  %v3886_v10 = vsel %vm484_vm0, %v6316_v42, 0  ;;  %v6318_v46 = vld [vmem:[%s8342_s5 + $0x60] sm:$0xff]   ;;  %v6320_v53 = vld [vmem:[%s8342_s5 + $0x58] sm:$0xff]   ;;  %v6321_v57 = vld [vmem:[%s8342_s5 + $0xc8] sm:$0xff]  }
 0x4b0   : > { %v3603_v61 = vpop.f32.mrf.mxu1 }
 0x4b1   : > { %v3626_v63 = vmax.f32 %v3622_v58, 0.0  ;;  %v3623_v1 = vadd.f32 %v3619_v51, %v3607_v59  ;;  %v3608_v18 = vadd.f32 %v3602_v43, %v3029_v23  ;;  %v3604_v2 = vadd.f32 %v3603_v61, %v3560_v56  ;;  %v6322_v58 = vld [vmem:[%s8342_s5 + $0x50] sm:$0xff]   ;;  %v6323_v59 = vld [vmem:[%s8342_s5 + $0xc0] sm:$0xff]   ;;  %v6324_v43 = vld [vmem:[%s8342_s5 + $0x48] sm:$0xff]  }
 0x4b2   : > { %v6326_v56 = vld [vmem:[%s8342_s5 + $0x40] sm:$0xff]   ;;  %v6327_v61 = vld [vmem:[%s8342_s5 + $0xb0] sm:$0xff]  }
 0x4b3   : > { %v3627_v6 = vmax.f32 %v3623_v1, 0.0  ;;  %v3624_v8 = vadd.f32 %v3615_v41, %v3608_v18  ;;  %v3609_v21 = vadd.f32 %v3604_v2, %v3030_v25  ;;  %v3643_v50 = vmul.f32 %v3636_v52, %v3626_v63  ;;  %v6300_v25 = vld [vmem:[%s8342_s5 + $0x38] sm:$0xff]   ;;  %v6315_v41 = vld [vmem:[%s8342_s5 + $0x70] sm:$0xff]   ;;  %v4097_v63 = vld [vmem:[%s8343_s6 + $0x60] sm:$0x33] }
 0x4b4   : > { %v5693_v1 = vcombine.high %v4097_v63, %v4097_v63  ;;  %v5663_v18 = vld [vmem:[%s8343_s6 + $0xc8] sm:$0x33] }
 0x4b5   : > { %v3628_v0 = vmax.f32 %v3624_v8, 0.0  ;;  %v3625_v48 = vadd.f32 %v3619_v51, %v3609_v21  ;;  %v3644_v19 = vmul.f32 %v3640_v7, %v3627_v6  ;;  %v3660_v3 = vadd.f32 %v3653_v62, %v3643_v50  ;;  %v6319_v51 = vld [vmem:[%s8342_s5 + $0xd0] sm:$0xff]  }
 0x4b6   : > { %v5677_v2 = vcombine.high %v5663_v18, %v5663_v18  ;;  %v5692_v50 = vcombine.low %v4097_v63, %v4097_v63 }
 0x4b7   : > { %v3645_v20 = vmul.f32 %v3636_v52, %v3628_v0  ;;  %v3629_v11 = vmax.f32 %v3625_v48, 0.0  ;;  %v3661_v37 = vadd.f32 %v3657_v55, %v3644_v19  ;;  %v6325_v52 = vld [vmem:[%s8342_s5 + $0xb8] sm:$0xff]  }
 0x4b9   : > { %v3662_v31 = vadd.f32 %v3653_v62, %v3645_v20  ;;  %v3646_v33 = vmul.f32 %v3640_v7, %v3629_v11  ;;  %v5676_v62 = vcombine.low %v5663_v18, %v5663_v18 }
 0x4bb   : > { %v3663_v39 = vadd.f32 %v3657_v55, %v3646_v33  ;;  %v3664_v4 = vpack.c.bf16 %v3662_v31, %v3660_v3  ;;  %v4299_v31 = vsel %vm1949_vm5, %v5692_v50, 0  ;;  %v4185_v33 = vsel %vm1949_vm5, %v5676_v62, 0  ;;  %v6386_v50 = vld [vmem:[%s8343_s6 + $0x16c] ss:$8 sps:$4 sm:$0xff]   ;;  %v6381_v62 = vld [vmem:[%s8343_s6 + $0x110] ss:$8 sps:$4 sm:$0xff]  }
 0x4bd   : > { %v3665_v22 = vpack.c.bf16 %v3663_v39, %v3661_v37  ;;  %v3674_v14 = vand.u32 %v3672_v12, %v3664_v4  ;;  %v6332_v37 = vld [vmem:[%s8343_s6 + $0x50] ss:$8 sps:$4 sm:$0xff]   ;;  %v6340_v4 = vld [vmem:[%s8343_s6 + $0x44] ss:$8 sps:$4 sm:$0xff]  }
 0x4be   : > { %v6335_v39 = vld [vmem:[%s8343_s6 + $0xb8] ss:$8 sps:$4 sm:$0xff]  }
 0x4bf   : > { %v3677_v23 = vand.u32 %v3672_v12, %v3665_v22  ;;  %v6343_v22 = vld [vmem:[%s8343_s6 + $0xac] ss:$8 sps:$4 sm:$0xff]   ;;  %v6338_v12 = vld [vmem:[%s8343_s6 + $0x40] ss:$8 sps:$4 sm:$0xff]  }
 0x4c1   : > { %3693 = vmatprep.subr.bf16.mxu0 %v3677_v23  ;;  %3739 = vmatprep.subr.bf16.mxu1 %v3677_v23  ;;  %v6341_v23 = vld [vmem:[%s8343_s6 + $0xa8] ss:$8 sps:$4 sm:$0xff]  }
 0x4c2   : > { %3694 = vmatpush1.bf16.msra.mxu0 %v3674_v14  ;;  %3740 = vmatpush1.bf16.msra.mxu1 %v3674_v14  ;;  %v6346_v14 = vld [vmem:[%s8343_s6 + $0x34] ss:$8 sps:$4 sm:$0xff]  }
 0x4c3   : > { %3888 = vmatprep.subr.bf16.mxu0 %v8392_v13  ;;  %4043 = vmatprep.subr.bf16.mxu1 %v8392_v13 }
 0x4c5   : > { %5590 = vmatmul.mubr.msk.bf16.vlgmr.msra.gmra.mxu0 %vm3667_vm7, %v3666_v15  ;;  %5592 = vmatmul.mubr.msk.bf16.vlgmr.msra.gmra.mxu1 %vm3667_vm7, %v5591_v24  ;;  %v6349_v15 = vld [vmem:[%s8343_s6 + $0x9c] ss:$8 sps:$4 sm:$0xff]   ;;  %v6344_v24 = vld [vmem:[%s8343_s6 + $0x30] ss:$8 sps:$4 sm:$0xff]  }
 0x4c6   : > { %3889 = vmatpush1.bf16.msra.mxu0 %v6300_v25  ;;  %4044 = vmatpush1.bf16.msra.mxu1 %v6301_v26  ;;  %v6347_v25 = vld [vmem:[%s8343_s6 + $0x98] ss:$8 sps:$4 sm:$0xff]   ;;  %v6352_v26 = vld [vmem:[%s8343_s6 + $0x24] ss:$8 sps:$4 sm:$0xff]  }
 0x4c7   : > { %3890 = vmatprep.subr.bf16.mxu0 %v8392_v13  ;;  %4045 = vmatprep.subr.bf16.mxu1 %v8392_v13 }
 0x4ca   : > { %3891 = vmatpush1.bf16.msra.mxu0 %v6302_v27  ;;  %4046 = vmatpush1.bf16.msra.mxu1 %v6303_v28  ;;  %v6355_v27 = vld [vmem:[%s8343_s6 + $0x8c] ss:$8 sps:$4 sm:$0xff]   ;;  %v6350_v28 = vld [vmem:[%s8343_s6 + $0x20] ss:$8 sps:$4 sm:$0xff]  }
 0x4cb   : > { %3892 = vmatprep.subr.bf16.mxu0 %v8392_v13  ;;  %4047 = vmatprep.subr.bf16.mxu1 %v8392_v13 }
 0x4ce   : > { %3893 = vmatpush1.bf16.msra.mxu0 %v6304_v29  ;;  %4048 = vmatpush1.bf16.msra.mxu1 %v6305_v9  ;;  %v6353_v29 = vld [vmem:[%s8343_s6 + $0x88] ss:$8 sps:$4 sm:$0xff]   ;;  %v6358_v9 = vld [vmem:[%s8343_s6 + $0x14] ss:$8 sps:$4 sm:$0xff]  }
 0x4cf   : > { %3894 = vmatprep.subr.bf16.mxu0 %v8392_v13  ;;  %4049 = vmatprep.subr.bf16.mxu1 %v8392_v13 }
 0x4d2   : > { %3895 = vmatpush1.bf16.msra.mxu0 %v6306_v16  ;;  %4050 = vmatpush1.bf16.msra.mxu1 %v6307_v17  ;;  %v6361_v16 = vld [vmem:[%s8343_s6 + $0x7c] ss:$8 sps:$4 sm:$0xff]   ;;  %v6356_v17 = vld [vmem:[%s8343_s6 + $0x10] ss:$8 sps:$4 sm:$0xff]  }
 0x4d3   : > { %3896 = vmatprep.subr.bf16.mxu0 %v8392_v13  ;;  %4051 = vmatprep.subr.bf16.mxu1 %v8392_v13 }
 0x4d6   : > { %3897 = vmatpush1.bf16.msra.mxu0 %v6308_v30  ;;  %4052 = vmatpush1.bf16.msra.mxu1 %v6309_v32  ;;  %v6359_v30 = vld [vmem:[%s8343_s6 + $0x78] ss:$8 sps:$4 sm:$0xff]   ;;  %v6364_v32 = vld [vmem:[%s8343_s6 + $0x4] ss:$8 sps:$4 sm:$0xff]  }
 0x4d7   : > { %3898 = vmatprep.subr.bf16.mxu0 %v8392_v13  ;;  %4053 = vmatprep.subr.bf16.mxu1 %v8392_v13 }
 0x4da   : > { %3899 = vmatpush1.bf16.msra.mxu0 %v6310_v47  ;;  %4054 = vmatpush1.bf16.msra.mxu1 %v6311_v54  ;;  %v6362_v47 = vld [vmem:[%s8343_s6] ss:$8 sps:$4 sm:$0xff]   ;;  %v6367_v54 = vld [vmem:[%s8343_s6 + $0x6c] ss:$8 sps:$4 sm:$0xff]  }
 0x4db   : > { %3900 = vmatprep.subr.bf16.mxu0 %v8392_v13  ;;  %4055 = vmatprep.subr.bf16.mxu1 %v8392_v13 }
 0x4de   : > { %3901 = vmatpush1.bf16.msra.mxu0 %v6312_v60  ;;  %4056 = vmatpush1.bf16.msra.mxu1 %v6313_v34  ;;  %v6365_v60 = vld [vmem:[%s8343_s6 + $0x68] ss:$8 sps:$4 sm:$0xff]   ;;  %v5737_v34 = vld [vmem:[%s8343_s6 + $0x198] sm:$0x33] }
 0x4df   : > { %3902 = vmatprep.subr.bf16.mxu0 %v8392_v13  ;;  %4057 = vmatprep.subr.bf16.mxu1 %v8392_v13  ;;  %v5750_v44 = vcombine.low %v5737_v34, %v5737_v34 }
 0x4e2   : > { %3903 = vmatpush1.bf16.msra.mxu0 %v6314_v40  ;;  %4058 = vmatpush1.bf16.msra.mxu1 %v6315_v41  ;;  %v5751_v40 = vcombine.high %v5737_v34, %v5737_v34  ;;  %v5708_v41 = vld [vmem:[%s8343_s6 + $0x130] sm:$0x33]  ;;  %v6428_v34 = vld [vmem:[%s8344_s7 + $0x78] sm:$0xff]  }
 0x4e3   : > { %3908 = vmatprep.subr.bf16.mxu0 %v8392_v13  ;;  %4063 = vmatprep.subr.bf16.mxu1 %v8392_v13  ;;  %v5722_v42 = vcombine.high %v5708_v41, %v5708_v41 }
 0x4e6   : > { %3909 = vmatpush2.bf16.msra.mxu0 %v3886_v10  ;;  %4064 = vmatpush2.bf16.msra.mxu1 %v4041_v45 }
 0x4e7   : > { %3910 = vmatprep.subr.bf16.mxu0 %v8392_v13  ;;  %4065 = vmatprep.subr.bf16.mxu1 %v8392_v13 }
 0x4ea   : > { %3911 = vmatpush2.bf16.msra.mxu0 %v6318_v46  ;;  %4066 = vmatpush2.bf16.msra.mxu1 %v6319_v51  ;;  %v5721_v51 = vcombine.low %v5708_v41, %v5708_v41  ;;  %v6430_v41 = vld [vmem:[%s8344_s7 + $0x70] sm:$0xff]  }
 0x4eb   : > { %3912 = vmatprep.subr.bf16.mxu0 %v8392_v13  ;;  %4067 = vmatprep.subr.bf16.mxu1 %v8392_v13 }
 0x4ec   : > { %v4430_v63 = vsel %vm1949_vm5, %v5721_v51, 0  ;;  %v6436_v51 = vld [vmem:[%s8344_s7 + $0x58] sm:$0xff]  }
 0x4ee   : > { %3913 = vmatpush2.bf16.msra.mxu0 %v6320_v53  ;;  %4068 = vmatpush2.bf16.msra.mxu1 %v6321_v57 }
 0x4ef   : > { %3914 = vmatprep.subr.bf16.mxu0 %v8392_v13  ;;  %4069 = vmatprep.subr.bf16.mxu1 %v8392_v13 }
 0x4f2   : > { %3915 = vmatpush2.bf16.msra.mxu0 %v6322_v58  ;;  %4070 = vmatpush2.bf16.msra.mxu1 %v6323_v59  ;;  %v4562_v59 = vsel %vm1949_vm5, %v5750_v44, 0  ;;  %v6432_v44 = vld [vmem:[%s8344_s7 + $0x68] sm:$0xff]  }
 0x4f3   : > { %3916 = vmatprep.subr.bf16.mxu0 %v8392_v13  ;;  %4071 = vmatprep.subr.bf16.mxu1 %v8392_v13 }
 0x4f6   : > { %3917 = vmatpush2.bf16.msra.mxu0 %v6324_v43  ;;  %4072 = vmatpush2.bf16.msra.mxu1 %v6325_v52  ;;  %v6374_v43 = vld [vmem:[%s8343_s6 + $0x18c] ss:$8 sps:$4 sm:$0xff]  }
 0x4f7   : > { %3918 = vmatprep.subr.bf16.mxu0 %v8392_v13  ;;  %4073 = vmatprep.subr.bf16.mxu1 %v8392_v13 }
 0x4fa   : > { %3919 = vmatpush2.bf16.msra.mxu0 %v6326_v56  ;;  %4074 = vmatpush2.bf16.msra.mxu1 %v6327_v61 }
 0x4fb   : > { %5694 = vmatprep.subr.msk.bf16.mxu1 %vm1949_vm5, %v5693_v1  ;;  %5678 = vmatprep.subr.msk.bf16.mxu0 %vm1949_vm5, %v5677_v2  ;;  %v6377_v1 = vld [vmem:[%s8343_s6 + $0x124] ss:$8 sps:$4 sm:$0xff]  }
 0x585   : > { %v3713_v5 = vpop.f32.mrf.mxu0  ;;  %v3759_v6 = vpop.f32.mrf.mxu1 }
 0x586   : > { %v3766_v7 = vmax.f32 %v3713_v5, %v3759_v6  ;;  %v6372_v5 = vld [vmem:[%s8343_s6 + $0x188] ss:$8 sps:$4 sm:$0xff]   ;;  %v6380_v6 = vld [vmem:[%s8343_s6 + $0x17c] ss:$8 sps:$4 sm:$0xff]  }
 0x587   : > { %v3715_v8 = vpop.f32.mrf.mxu0  ;;  %v3761_v21 = vpop.f32.mrf.mxu1 }
 0x588   : > { %v3767_v0 = vmax.f32 %v3715_v8, %v3761_v21  ;;  %v3768_v11 = vpack.c.bf16 %v3766_v7, %v3766_v7  ;;  %v6375_v7 = vld [vmem:[%s8343_s6 + $0x120] ss:$8 sps:$4 sm:$0xff]   ;;  %v6383_v8 = vld [vmem:[%s8343_s6 + $0x114] ss:$8 sps:$4 sm:$0xff]  }
 0x589   : > { %v3717_v48 = vpop.f32.mrf.mxu0  ;;  %v3763_v19 = vpop.f32.mrf.mxu1  ;;  %v6378_v21 = vld [vmem:[%s8343_s6 + $0x178] ss:$8 sps:$4 sm:$0xff]  }
 0x58a   : > { %v3769_v20 = vpack.c.bf16 %v3767_v0, %v3767_v0  ;;  %v6389_v0 = vld [vmem:[%s8343_s6 + $0x104] ss:$8 sps:$4 sm:$0xff]   ;;  %v6384_v48 = vld [vmem:[%s8343_s6 + $0x168] ss:$8 sps:$4 sm:$0xff]  }
 0x58b   : > { %v3718_v55 = vpop.f32.mrf.mxu0  ;;  %v3764_v3 = vpop.f32.mrf.mxu1  ;;  %v6392_v19 = vld [vmem:[%s8343_s6 + $0x15c] ss:$8 sps:$4 sm:$0xff]  }
 0x58c   : > { %5607 = vmatprep.mubr.msk.bf16.mxu0 %vm3881_vm8, %v3769_v20  ;;  %5650 = vmatprep.mubr.msk.bf16.mxu1 %vm3881_vm8, %v3769_v20  ;;  %v6387_v20 = vld [vmem:[%s8343_s6 + $0x100] ss:$8 sps:$4 sm:$0xff]   ;;  %v6398_v3 = vld [vmem:[%s8343_s6 + $0x14c] ss:$8 sps:$4 sm:$0xff]  }
 0x58d   : > { %3921 = vmatmul.mubr.bf16.vlgmr.msra.gmra.mxu0 %v3768_v11  ;;  %4076 = vmatmul.mubr.bf16.vlgmr.msra.gmra.mxu1 %v3768_v11  ;;  %v6395_v11 = vld [vmem:[%s8343_s6 + $0xf4] ss:$8 sps:$4 sm:$0xff]   ;;  %v6390_v55 = vld [vmem:[%s8343_s6 + $0x158] ss:$8 sps:$4 sm:$0xff]  }
 0x58e   : > { %4307 = vmatpush1.bf16.msra.mxu1 %v4299_v31  ;;  %4193 = vmatpush1.bf16.msra.mxu0 %v4185_v33  ;;  %v6393_v31 = vld [vmem:[%s8343_s6 + $0xf0] ss:$8 sps:$4 sm:$0xff]   ;;  %v6401_v33 = vld [vmem:[%s8343_s6 + $0xe4] ss:$8 sps:$4 sm:$0xff]  }
 0x58f   : > { %4308 = vmatprep.subr.bf16.mxu1 %v6334_v35  ;;  %4194 = vmatprep.subr.bf16.mxu0 %v6337_v36  ;;  %v6396_v35 = vld [vmem:[%s8343_s6 + $0x148] ss:$8 sps:$4 sm:$0xff]   ;;  %v6404_v36 = vld [vmem:[%s8343_s6 + $0x13c] ss:$8 sps:$4 sm:$0xff]  }
 0x590   : > { %4336 = vmatprep.mubr.bf16.mxu1 %v8392_v13  ;;  %4222 = vmatprep.mubr.bf16.mxu0 %v8392_v13 }
 0x592   : > { %4309 = vmatpush1.bf16.msra.mxu1 %v6332_v37  ;;  %4195 = vmatpush1.bf16.msra.mxu0 %v6335_v39  ;;  %v6399_v37 = vld [vmem:[%s8343_s6 + $0xe0] ss:$8 sps:$4 sm:$0xff]   ;;  %v6407_v39 = vld [vmem:[%s8343_s6 + $0xd4] ss:$8 sps:$4 sm:$0xff]  }
 0x593   : > { %4310 = vmatprep.subr.bf16.mxu1 %v6340_v4  ;;  %4196 = vmatprep.subr.bf16.mxu0 %v6343_v22  ;;  %v6402_v4 = vld [vmem:[%s8343_s6 + $0x138] ss:$8 sps:$4 sm:$0xff]  }
 0x594   : > { %v5766_v22 = vld [vmem:[%s8343_s6 + $0x200] sm:$0x33] }
 0x596   : > { %4311 = vmatpush1.bf16.msra.mxu1 %v6338_v12  ;;  %4197 = vmatpush1.bf16.msra.mxu0 %v6341_v23  ;;  %v6405_v12 = vld [vmem:[%s8343_s6 + $0xd0] ss:$8 sps:$4 sm:$0xff]   ;;  %v5780_v23 = vcombine.high %v5766_v22, %v5766_v22 }
 0x597   : > { %4312 = vmatprep.subr.bf16.mxu1 %v6346_v14  ;;  %4198 = vmatprep.subr.bf16.mxu0 %v6349_v15  ;;  %v5779_v14 = vcombine.low %v5766_v22, %v5766_v22 }
 0x59a   : > { %4313 = vmatpush1.bf16.msra.mxu1 %v6344_v24  ;;  %4199 = vmatpush1.bf16.msra.mxu0 %v6347_v25  ;;  %v4694_v25 = vsel %vm1949_vm5, %v5779_v14, 0 }
 0x59b   : > { %4314 = vmatprep.subr.bf16.mxu1 %v6352_v26  ;;  %4200 = vmatprep.subr.bf16.mxu0 %v6355_v27  ;;  %v6412_v26 = vld [vmem:[%s8343_s6 + $0x1f4] ss:$8 sps:$4 sm:$0xff]   ;;  %v6410_v27 = vld [vmem:[%s8343_s6 + $0x1f0] ss:$8 sps:$4 sm:$0xff]  }
 0x59e   : > { %4315 = vmatpush1.bf16.msra.mxu1 %v6350_v28  ;;  %4201 = vmatpush1.bf16.msra.mxu0 %v6353_v29  ;;  %v6415_v28 = vld [vmem:[%s8343_s6 + $0x1e4] ss:$8 sps:$4 sm:$0xff]   ;;  %v6413_v29 = vld [vmem:[%s8343_s6 + $0x1e0] ss:$8 sps:$4 sm:$0xff]  }
 0x59f   : > { %4316 = vmatprep.subr.bf16.mxu1 %v6358_v9  ;;  %4202 = vmatprep.subr.bf16.mxu0 %v6361_v16  ;;  %v6418_v9 = vld [vmem:[%s8343_s6 + $0x1d4] ss:$8 sps:$4 sm:$0xff]   ;;  %v6421_v16 = vld [vmem:[%s8343_s6 + $0x1c4] ss:$8 sps:$4 sm:$0xff]  }
 0x5a2   : > { %4317 = vmatpush1.bf16.msra.mxu1 %v6356_v17  ;;  %4203 = vmatpush1.bf16.msra.mxu0 %v6359_v30  ;;  %v6419_v17 = vld [vmem:[%s8343_s6 + $0x1c0] ss:$8 sps:$4 sm:$0xff]   ;;  %v6424_v30 = vld [vmem:[%s8343_s6 + $0x1b4] ss:$8 sps:$4 sm:$0xff]  }
 0x5a3   : > { %4318 = vmatprep.subr.bf16.mxu1 %v6364_v32  ;;  %4204 = vmatprep.subr.bf16.mxu0 %v6367_v54  ;;  %v6422_v32 = vld [vmem:[%s8343_s6 + $0x1b0] ss:$8 sps:$4 sm:$0xff]   ;;  %v6425_v54 = vld [vmem:[%s8343_s6 + $0x1a0] ss:$8 sps:$4 sm:$0xff]  }
 0x5a6   : > { %4319 = vmatpush1.bf16.msra.mxu1 %v6362_v47  ;;  %4205 = vmatpush1.bf16.msra.mxu0 %v6365_v60  ;;  %v6427_v47 = vld [vmem:[%s8343_s6 + $0x1a4] ss:$8 sps:$4 sm:$0xff]  }
 0x5a7   : > { %5752 = vmatprep.subr.msk.bf16.mxu1 %vm1949_vm5, %v5751_v40  ;;  %5723 = vmatprep.subr.msk.bf16.mxu0 %vm1949_vm5, %v5722_v42  ;;  %v6429_v40 = vld [vmem:[%s8344_s7 + $0x38] sm:$0xff]   ;;  %v6431_v42 = vld [vmem:[%s8344_s7 + $0x30] sm:$0xff]  }
 0x64d   : > { %v3922_v10 = vpop.f32.mrf.mxu0  ;;  %v4077_v45 = vpop.f32.mrf.mxu1 }
 0x64e   : > { %v4083_v46 = vmax.f32 %v3922_v10, %v4077_v45  ;;  %v6433_v10 = vld [vmem:[%s8344_s7 + $0x28] sm:$0xff]   ;;  %v6434_v45 = vld [vmem:[%s8344_s7 + $0x60] sm:$0xff]  }
 0x64f   : > { %v3924_v53 = vpop.f32.mrf.mxu0  ;;  %v4079_v57 = vpop.f32.mrf.mxu1 }
 0x650   : > { %v8102_v58 = vpack.c.bf16 %v4083_v46, %v4083_v46  ;;  %v6435_v46 = vld [vmem:[%s8344_s7 + $0x20] sm:$0xff]   ;;  %v6437_v53 = vld [vmem:[%s8344_s7 + $0x18] sm:$0xff]   ;;  %v6438_v57 = vld [vmem:[%s8344_s7 + $0x50] sm:$0xff]  }
 0x651   : > { %v3925_v52 = vpop.f32.mrf.mxu0  ;;  %v4080_v56 = vpop.f32.mrf.mxu1 }
 0x652   : > { %v4113_v61 = vshrl.u32 %v8102_v58, 16  ;;  %5695 = vmatmul.mubr.msk.bf16.vlgmr.msra.gmra.mxu1 %vm4180_vm9, %v8102_v58  ;;  %v4360_v24 = vrot.slane %v8102_v58, 1  ;;  %v4624_v60 = vrot.slane %v8102_v58, 2  ;;  %v6439_v58 = vld [vmem:[%s8344_s7 + $0x10] sm:$0xff]   ;;  %v6442_v52 = vld [vmem:[%s8344_s7 + $0x40] sm:$0xff]  }
 0x653   : > { %4570 = vmatpush1.bf16.msra.mxu1 %v4562_v59  ;;  %v3926_v18 = vpop.f32.mrf.mxu0  ;;  %v4081_v2 = vpop.f32.mrf.mxu1  ;;  %4599 = vmatprep.mubr.bf16.mxu1 %v8392_v13  ;;  %v6440_v59 = vld [vmem:[%s8344_s7 + $0x48] sm:$0xff]   ;;  %v6443_v56 = vld [vmem:[%s8344_s7] sm:$0xff]  }
 0x654   : > { %5679 = vmatmul.mubr.msk.bf16.vlgmr.msra.gmra.mxu0 %vm4180_vm9, %v4113_v61  ;;  %4571 = vmatprep.subr.bf16.mxu1 %v6374_v43  ;;  %v4492_v15 = vrot.slane %v4113_v61, 1  ;;  %v6441_v43 = vld [vmem:[%s8344_s7 + $0x8] sm:$0xff]  }
 0x655   : > { %4438 = vmatpush1.bf16.msra.mxu0 %v4430_v63  ;;  %4467 = vmatprep.mubr.bf16.mxu0 %v8392_v13 }
 0x656   : > { %4439 = vmatprep.subr.bf16.mxu0 %v6377_v1 }
 0x657   : > { %4572 = vmatpush1.bf16.msra.mxu1 %v6372_v5 }
 0x658   : > { %4573 = vmatprep.subr.bf16.mxu1 %v6380_v6 }
 0x659   : > { %4440 = vmatpush1.bf16.msra.mxu0 %v6375_v7 }
 0x65a   : > { %4441 = vmatprep.subr.bf16.mxu0 %v6383_v8 }
 0x65b   : > { %4574 = vmatpush1.bf16.msra.mxu1 %v6378_v21 }
 0x65c   : > { %4575 = vmatprep.subr.bf16.mxu1 %v6386_v50 }
 0x65d   : > { %4442 = vmatpush1.bf16.msra.mxu0 %v6381_v62 }
 0x65e   : > { %4443 = vmatprep.subr.bf16.mxu0 %v6389_v0 }
 0x65f   : > { %4576 = vmatpush1.bf16.msra.mxu1 %v6384_v48 }
 0x660   : > { %4577 = vmatprep.subr.bf16.mxu1 %v6392_v19 }
 0x661   : > { %4444 = vmatpush1.bf16.msra.mxu0 %v6387_v20 }
 0x662   : > { %4445 = vmatprep.subr.bf16.mxu0 %v6395_v11 }
 0x663   : > { %4578 = vmatpush1.bf16.msra.mxu1 %v6390_v55 }
 0x664   : > { %4579 = vmatprep.subr.bf16.mxu1 %v6398_v3 }
 0x665   : > { %4446 = vmatpush1.bf16.msra.mxu0 %v6393_v31  ;;  %v4742_v31 = vld [vmem:[%s8347_s10] ss:$4 sm:$0x3] }
 0x666   : > { %4447 = vmatprep.subr.bf16.mxu0 %v6401_v33 }
 0x667   : > { %4580 = vmatpush1.bf16.msra.mxu1 %v6396_v35 }
 0x668   : > { %4581 = vmatprep.subr.bf16.mxu1 %v6404_v36  ;;  %v4747_v36 = vrot.slane %v4742_v31, %v8393_v38 }
 0x669   : > { %4448 = vmatpush1.bf16.msra.mxu0 %v6399_v37 }
 0x66a   : > { %4449 = vmatprep.subr.bf16.mxu0 %v6407_v39  ;;  %v5783_v39 = vld [vmem:[%s8347_s10 + $0x1] ss:$4 sm:$0x3] }
 0x66b   : > { %4582 = vmatpush1.bf16.msra.mxu1 %v6402_v4 }
 0x66c   : > { %5805 = vmatprep.subr.bf16.mxu1 %v6428_v34 }
 0x66d   : > { %4450 = vmatpush1.bf16.msra.mxu0 %v6405_v12  ;;  %v4751_v12 = vrot.slane %v4742_v31, %v8394_v49 }
 0x66e   : > { %5753 = vmatmul.mubr.msk.bf16.vlgmr.msra.gmra.mxu1 %vm4180_vm9, %v4492_v15  ;;  %5781 = vmatprep.subr.msk.bf16.mxu0 %vm1949_vm5, %v5780_v23  ;;  %v4764_v15 = vrot.slane %v5783_v39, %v8393_v38 }
 0x66f   : > { %5806 = vmatpush3.bf16.msra.mxu1 %v6429_v40 }
 0x670   : > { %5724 = vmatmul.mubr.msk.bf16.vlgmr.msra.gmra.mxu0 %vm4180_vm9, %v4360_v24  ;;  %5807 = vmatprep.subr.bf16.mxu1 %v6430_v41  ;;  %v5784_v24 = vld [vmem:[%s8347_s10 + $0x2] ss:$4 sm:$0x3]  ;;  %v4822_v41 = vld [vmem:[%s8348_s11] sm:$0x1] }
 0x671   : > { %4702 = vmatpush1.bf16.msra.mxu0 %v4694_v25  ;;  %4731 = vmatprep.mubr.bf16.mxu0 %v8392_v13  ;;  %v6416_v13 = vld [vmem:[%s8343_s6 + $0x1d0] ss:$8 sps:$4 sm:$0xff]  }
 0x672   : > { %4703 = vmatprep.subr.bf16.mxu0 %v6412_v26 }
 0x673   : > { %5808 = vmatpush3.bf16.msra.mxu1 %v6431_v42 }
 0x674   : > { %5809 = vmatprep.subr.bf16.mxu1 %v6432_v44 }
 0x675   : > { %4704 = vmatpush1.bf16.msra.mxu0 %v6410_v27 }
 0x676   : > { %4705 = vmatprep.subr.bf16.mxu0 %v6415_v28 }
 0x677   : > { %5810 = vmatpush3.bf16.msra.mxu1 %v6433_v10 }
 0x678   : > { %5811 = vmatprep.subr.bf16.mxu1 %v6434_v45 }
 0x679   : > { %4706 = vmatpush1.bf16.msra.mxu0 %v6413_v29  ;;  %v4768_v29 = vrot.slane %v5783_v39, %v8394_v49 }
 0x67a   : > { %4707 = vmatprep.subr.bf16.mxu0 %v6418_v9  ;;  %v4779_v9 = vrot.slane %v5784_v24, %v8393_v38 }
 0x67b   : > { %5812 = vmatpush3.bf16.msra.mxu1 %v6435_v46 }
 0x67c   : > { %5813 = vmatprep.subr.bf16.mxu1 %v6436_v51 }
 0x67d   : > { %4708 = vmatpush1.bf16.msra.mxu0 %v6416_v13 }
 0x67e   : > { %4709 = vmatprep.subr.bf16.mxu0 %v6421_v16 }
 0x67f   : > { %5814 = vmatpush3.bf16.msra.mxu1 %v6437_v53 }
 0x680   : > { %5815 = vmatprep.subr.bf16.mxu1 %v6438_v57 }
 0x681   : > { %4710 = vmatpush1.bf16.msra.mxu0 %v6419_v17 }
 0x682   : > { %4711 = vmatprep.subr.bf16.mxu0 %v6424_v30  ;;  %v4783_v30 = vrot.slane %v5784_v24, %v8394_v49 }
 0x683   : > { %5816 = vmatpush3.bf16.msra.mxu1 %v6439_v58 }
 0x684   : > { %5817 = vmatprep.subr.bf16.mxu1 %v6440_v59 }
 0x685   : > { %4712 = vmatpush1.bf16.msra.mxu0 %v6422_v32 }
 0x686   : > { %4713 = vmatprep.subr.bf16.mxu0 %v6427_v47 }
 0x687   : > { %5818 = vmatpush3.bf16.msra.mxu1 %v6441_v43 }
 0x688   : > { %5819 = vmatprep.subr.bf16.mxu1 %v6442_v52 }
 0x689   : > { %4714 = vmatpush1.bf16.msra.mxu0 %v6425_v54 }
 0x68b   : > { %5820 = vmatpush3.bf16.msra.mxu1 %v6443_v56 }
 0x68c   : > { %5782 = vmatmul.mubr.msk.bf16.vlgmr.msra.gmra.mxu0 %vm4180_vm9, %v4624_v60 }
 0x712   : > { %v4338_v61 = vpop.f32.mrf.mxu1 }
 0x714   : > { %v4224_v63 = vpop.f32.mrf.mxu0  ;;  %v4340_v1 = vpop.f32.mrf.mxu1 }
 0x715   : > { %v4339_v11 = vadd.f32 %v4338_v61, %v4224_v63 }
 0x716   : > { %v4226_v18 = vpop.f32.mrf.mxu0  ;;  %v4342_v2 = vpop.f32.mrf.mxu1 }
 0x717   : > { %v4341_v55 = vadd.f32 %v4340_v1, %v4226_v18 }
 0x718   : > { %v4228_v5 = vpop.f32.mrf.mxu0  ;;  %v4343_v6 = vpop.f32.mrf.mxu1 }
 0x71a   : > { %v4229_v7 = vpop.f32.mrf.mxu0 }
 0x72e   : > { %v4601_v8 = vpop.f32.mrf.mxu1 }
 0x730   : > { %v4469_v21 = vpop.f32.mrf.mxu0  ;;  %v4603_v50 = vpop.f32.mrf.mxu1 }
 0x731   : > { %v4476_v3 = vadd.f32 %v4469_v21, %v4339_v11 }
 0x732   : > { %v4471_v62 = vpop.f32.mrf.mxu0  ;;  %v4605_v0 = vpop.f32.mrf.mxu1 }
 0x733   : > { %v4477_v33 = vadd.f32 %v4471_v62, %v4341_v55  ;;  %v4608_v35 = vadd.f32 %v4601_v8, %v4476_v3 }
 0x734   : > { %v4473_v48 = vpop.f32.mrf.mxu0  ;;  %v4606_v19 = vpop.f32.mrf.mxu1 }
 0x735   : > { %v4609_v22 = vadd.f32 %v4603_v50, %v4477_v33 }
 0x736   : > { %v4474_v20 = vpop.f32.mrf.mxu0 }
 0x74c   : > { %v4733_v37 = vpop.f32.mrf.mxu0 }
 0x74d   : > { %v4740_v4 = vadd.f32 %v4733_v37, %v4608_v35 }
 0x74e   : > { %v4735_v23 = vpop.f32.mrf.mxu0 }
 0x74f   : > { %v4754_v14 = vadd.f32 %v4747_v36, %v4740_v4  ;;  %v4741_v25 = vadd.f32 %v4735_v23, %v4609_v22 }
 0x750   : > { %v4737_v26 = vpop.f32.mrf.mxu0 }
 0x751   : > { %v4756_v27 = vmax.f32 %v4754_v14, 0.0  ;;  %v4755_v28 = vadd.f32 %v4751_v12, %v4741_v25 }
 0x752   : > { %v4738_v13 = vpop.f32.mrf.mxu0 }
 0x753   : > { %v4771_v16 = vmul.f32 %v4764_v15, %v4756_v27  ;;  %v4757_v17 = vmax.f32 %v4755_v28, 0.0 }
 0x755   : > { %v4772_v32 = vmul.f32 %v4768_v29, %v4757_v17  ;;  %v4786_v47 = vadd.f32 %v4779_v9, %v4771_v16 }
 0x757   : > { %v4787_v54 = vadd.f32 %v4783_v30, %v4772_v32  ;;  %v4788_v34 = vpack.c.bf16 %v4786_v47, %v4786_v47 }
 0x759   : > { %v4789_v60 = vpack.c.bf16 %v4787_v54, %v4787_v54 }
 0x75b   : > { %4951 = vmatprep.mubr.bf16.mxu1 %v4789_v60 }
 0x75c   : > { %4952 = vmatmul.mubr.bf16.vlgmr.msra.gmra.mxu1 %v4788_v34 }
 0x81c   : > { %v5821_v40 = vpop.f32.mrf.mxu1 }
 0x81e   : > { %v5822_v38 = vpop.f32.mrf.mxu1 }
 0x81f   : > { %v5823_v42 = vadd.f32 %v5822_v38, %v5821_v40 }
 0x820   : > { %v5824_v49 = vpop.f32.mrf.mxu1 }
 0x821   : > { %v4954_v44 = vadd.f32 %v5823_v42, %v4822_v41 }
 0x822   : > { %v5825_v10 = vpop.f32.mrf.mxu1 }
 0x823   : > { %4960 = vst.msk [vmem:[%s405_s26] sm:$0x1] %vm4959_vm10, %v4954_v44 }
 0x824   : > { %6457 = shalt.err (!%p6454_p3)
}
 0x825   : > { %s6458_s20 = scalar_lea.hbm %s8302_s30, 16  ;;  %s6462_s28 = scalar_lea.hbm %s8349_s12, 32 }
 0x826   : > { %p6459_p4 = scmp.ne.s32.totalorder %s8302_s30, %s6458_s20  ;;  %p6463_p9 = scmp.lt.s32.totalorder %s8302_s30, %s8349_s12 }
 0x827   : > { %p6464_p10 = scmp.lt.s32.totalorder %s6462_s28, %s6458_s20 }
 0x828   : > { %p6460_p7 = pnand %p6459_p4, %p6612_p5 }
 0x829   : > { %p6465_p11 = por %p6464_p10, %p6463_p9 }
 0x82a   : > { %p6461_p8 = pneg %p6460_p7 }
 0x82c   : > { %p6466_p12 = pnand %p6465_p11, %p6461_p8 }
 0x82e   : > { %6469 = shalt.err (!%p6466_p12)
}
 0x82f   : > { %5827 = dma.vmem_to_hbm [thread:$0]  (%p6612_p5), %s4975_s29, 16, %s8302_s30, %s4962_s15  }
 0x830 PF: > { %p5833_p13 = scmp.ge.s32.totalorder %s6504_s24, 2  ;;  %s4986_s16 = sand.u32 1, %s6492_s21  }
 0x831   : > { %s4987_s18 = scalar_lea.sflag [#allocation3], %s4986_s16 }
 0x832   : > { %p5830_p0 = pnand %p5833_p13, %p6616_p6 }
 0x834   : > { %p5831_p1 = pneg %p5830_p0 }
 0x836   : > { %6487 = dma.done.wait (%p5831_p1), %s4987_s18, 16  }
 0x837   : > { %6489 = vsyncadd (%p5831_p1), %s4987_s18, 4294967280  ;;  %s8396_s19 = sld [smem:[#allocation5_spill]]  ;;  %p22_p2 = scmp.ge.s32.totalorder %s6599_s27, 4  }
 0x838   : > { %s8397_s23 = sld [smem:[#allocation6_spill]]  ;;  %s8398_s21 = smov %s6496_s22 }
 0x839   : > { %s8400_s24 = smov %s6599_s27  ;;  %24 = sbr.rel (!%p22_p2) target bundleno = 3 (0x3), region = 124 }
 0x83d   : > { %s8399_s22 = smov %s8396_s19 }
 0x83e   :  { %4991 = vsyncpa [#allocation3], 1 }
 0x83f   :  { %4993 = vsyncpa [#allocation3 + $0x1], 1 }

</bundles_post_ra>
